<compile_context>
chip_gen: v6e
topology: v6e:2x2x1
jax: 0.10.0
libtpu: 0.0.40
codegen_flags: <defaults>
</compile_context>

<pallas_src>
import jax
import jax.numpy as jnp
from jax.experimental import pallas as pl
from jax.experimental.pallas import tpu as pltpu

L = 60             # sequence length implied by dense1: 16*L + L = 1020
C = 16             # conv1 output channels
FEAT = C * L + L   # 1020
K_IN = 128         # zero-padded input width for the expansion matmul (62 -> 128)
K_FEAT = 1024      # conv_flat(960) + xi(60) + zero pad(4)
NEG_SLOPE = 0.01   # F.leaky_relu default
TILE_B = 512       # batch tile for large batches


def _leaky(x):
    # max(x, a*x) == leaky_relu(x) for 0 < a < 1 (mul+max, no compare/select)
    return jnp.maximum(x, NEG_SLOPE * x)


# ----------------------------- Pallas kernel ------------------------------- #

def fused_net_kernel(xpad_ref, mexp_ref, bexp_ref, slope_ref,
                     w1_ref, b1_ref, w2_ref, b2_ref, w3_ref, b3_ref,
                     w4_ref, b4_ref, w5_ref, b5_ref, o_ref):
    """Whole Net forward for one batch tile.

    xpad_ref  : (TB, 128) f32   [0 | xi | 0 ... 0] zero-padded input
    mexp_ref  : (128, 1024) bf16  expansion matrix (conv taps + xi identity)
    bexp_ref  : (1, 1024) f32     conv bias broadcast over positions (0 for xi cols)
    slope_ref : (1, 1024) f32     0.01 on conv columns, 1.0 on xi / pad columns
    w1_ref    : (1024, 1024) bf16 dense1 weight, transposed + zero-row padded
    w{i}_ref  : (in, out) bf16    dense{i} weights, pre-transposed
    b{i}_ref  : (1, out) f32
    w5_ref    : (1, 128) f32,  b5_ref : (1, 1) f32
    o_ref     : (TB, 1) f32
    """
    xp = xpad_ref[...].astype(jnp.bfloat16)                       # (TB, 128)

    # Conv1d + flatten + cat(xi) as a single K=128 matmul, then per-column leaky.
    pre = jnp.dot(xp, mexp_ref[...],
                  preferred_element_type=jnp.float32) + bexp_ref[...]
    feat = jnp.maximum(pre, slope_ref[...] * pre)                  # (TB, 1024) f32

    def dense(h, w_ref, b_ref):
        return jnp.dot(h.astype(jnp.bfloat16), w_ref[...],
                       preferred_element_type=jnp.float32) + b_ref[...]

    h = _leaky(dense(feat, w1_ref, b1_ref))    # (TB, 1024)
    h = _leaky(dense(h, w2_ref, b2_ref))       # (TB, 512)
    h = _leaky(dense(h, w3_ref, b3_ref))       # (TB, 256)
    h = _leaky(dense(h, w4_ref, b4_ref))       # (TB, 128)

    # dense5 (128 -> 1): VPU multiply + lane reduction (skip an N=1 MXU pass).
    z = jnp.sum(h * w5_ref[...], axis=-1, keepdims=True) + b5_ref[...]   # (TB, 1)
    o_ref[...] = pl.reciprocal(1.0 + jnp.exp(-z), approx=True)           # sigmoid


# ------------------------------ weight prep -------------------------------- #

def prepare_params(params):
    """One-time prep: build expansion matmul, transpose/pad dense weights, bf16."""
    cw = params["conv_w"][:, 0, :].astype(jnp.float32)   # (C, 3)
    cb = params["conv_b"].astype(jnp.float32)            # (C,)

    # Expansion matrix M: (xpad @ M)[b, c*L + l] = sum_k cw[c,k]*xpad[b, l+k]
    #                     (xpad @ M)[b, 960 + l] = xi[b, l]   (xpad[b, l+1])
    c_idx, l_idx, k_idx = jnp.meshgrid(jnp.arange(C), jnp.arange(L), jnp.arange(3),
                                       indexing="ij")
    rows = (l_idx + k_idx).ravel()
    cols = (c_idx * L + l_idx).ravel()
    vals = cw[c_idx.ravel(), k_idx.ravel()]
    M = jnp.zeros((K_IN, K_FEAT), jnp.float32)
    M = M.at[rows, cols].set(vals)
    M = M.at[1 + jnp.arange(L), C * L + jnp.arange(L)].set(1.0)

    expand_b = jnp.zeros((1, K_FEAT), jnp.float32).at[0, :C * L].set(jnp.repeat(cb, L))
    slope = jnp.where(jnp.arange(K_FEAT) < C * L, NEG_SLOPE, 1.0)
    slope = slope.reshape(1, K_FEAT).astype(jnp.float32)

    prep = {
        "expand_w": M.astype(jnp.bfloat16),
        "expand_b": expand_b,
        "slope": slope,
        # dense1: transpose to (in, out) and pad 1020 -> 1024 rows with zeros.
        "dense1_w": jnp.pad(params["dense1_w"].T,
                            ((0, K_FEAT - FEAT), (0, 0))).astype(jnp.bfloat16),
        "dense1_b": params["dense1_b"][None, :].astype(jnp.float32),
    }
    for i in range(2, 5):
        prep[f"dense{i}_w"] = params[f"dense{i}_w"].T.astype(jnp.bfloat16)
        prep[f"dense{i}_b"] = params[f"dense{i}_b"][None, :].astype(jnp.float32)
    prep["dense5_w"] = params["dense5_w"].astype(jnp.float32)          # (1, 128)
    prep["dense5_b"] = params["dense5_b"].reshape(1, 1).astype(jnp.float32)
    return prep


# ------------------------------ wrapper ------------------------------------ #

def _pick_batch_tile(B, tile_b=TILE_B):
    """Batch tile: >=2 grid steps when B is non-trivial (v7x dual TensorCore)."""
    half = pl.cdiv(B, 2)
    tb = min(tile_b, max(8, ((half + 7) // 8) * 8))
    bp = pl.cdiv(B, tb) * tb
    return tb, bp


def net_forward(xi, prep, tile_b=TILE_B):
    B = xi.shape[0]
    tb, bp = _pick_batch_tile(B, tile_b)
    # [left-zero | xi | right-zero ... zero] -> width 128, plus batch padding.
    xpad = jnp.pad(xi.astype(jnp.float32), ((0, bp - B), (1, K_IN - L - 1)))

    def batch_spec(shape):
        n = len(shape) - 1
        return pl.BlockSpec((tb,) + tuple(shape[1:]),
                            lambda i, _n=n: (i,) + (0,) * _n)

    def resident_spec(arr):      # constant index_map -> stays in VMEM across tiles
        z = (0,) * arr.ndim
        return pl.BlockSpec(arr.shape, lambda i, _z=z: _z)

    weight_names = ["expand_w", "expand_b", "slope",
                    "dense1_w", "dense1_b", "dense2_w", "dense2_b",
                    "dense3_w", "dense3_b", "dense4_w", "dense4_b",
                    "dense5_w", "dense5_b"]
    weights = [prep[n] for n in weight_names]

    out = pl.pallas_call(
        fused_net_kernel,
        out_shape=jax.ShapeDtypeStruct((bp, 1), jnp.float32),
        grid=(bp // tb,),
        in_specs=[batch_spec(xpad.shape)] + [resident_spec(w) for w in weights],
        out_specs=batch_spec((bp, 1)),
        compiler_params=pltpu.CompilerParams(
            dimension_semantics=("parallel",),       # shard batch tiles across TCs
            vmem_limit_bytes=48 * 1024 * 1024),      # <= v7x's 64 MiB physical VMEM
    )(xpad, *weights)
    return out[:B]


# -------------------------- references (plain JAX) -------------------------- #

def reference_forward_f32(xi, params):
    """Float32 reference mirroring the PyTorch module exactly."""
    B = xi.shape[0]
    wc = params["conv_w"][:, 0, :]
    bc = params["conv_b"]
    xpad = jnp.pad(xi, ((0, 0), (1, 1)))
    windows = jnp.stack([xpad[:, k:k + L] for k in range(3)], axis=-1)   # (B, L, 3)
    conv = _leaky(jnp.einsum("blk,ck->bcl", windows, wc) + bc[None, :, None])
    h = jnp.concatenate([conv.reshape(B, -1), xi], axis=1)
    for i in range(1, 5):
        h = _leaky(h @ params[f"dense{i}_w"].T + params[f"dense{i}_b"])
    z = h @ params["dense5_w"].T + params["dense5_b"]
    return jax.nn.sigmoid(z)


def reference_forward_matched(xi, prep):
    """Same math as the kernel (bf16 weights / f32 accumulation), plain JAX."""
    xpad = jnp.pad(xi, ((0, 0), (1, K_IN - L - 1))).astype(jnp.bfloat16)
    pre = jnp.dot(xpad, prep["expand_w"],
                  preferred_element_type=jnp.float32) + prep["expand_b"]
    feat = jnp.maximum(pre, prep["slope"] * pre)

    def dense(h, w, b):
        return jnp.dot(h.astype(jnp.bfloat16), w,
                       preferred_element_type=jnp.float32) + b

    h = _leaky(dense(feat, prep["dense1_w"], prep["dense1_b"]))
    h = _leaky(dense(h, prep["dense2_w"], prep["dense2_b"]))
    h = _leaky(dense(h, prep["dense3_w"], prep["dense3_b"]))
    h = _leaky(dense(h, prep["dense4_w"], prep["dense4_b"]))
    z = jnp.sum(h * prep["dense5_w"], axis=-1, keepdims=True) + prep["dense5_b"]
    return jax.nn.sigmoid(z)


# --------------------------------- main ------------------------------------ #

def _uniform(key, shape, fan_in):
    bound = 1.0 / (fan_in ** 0.5)
    return jax.random.uniform(key, shape, jnp.float32, -bound, bound)


def make_params(key):
    ks = jax.random.split(key, 12)
    dims = [(1024, 1020), (512, 1024), (256, 512), (128, 256), (1, 128)]
    params = {
        "conv_w": _uniform(ks[0], (C, 1, 3), 3),
        "conv_b": _uniform(ks[1], (C,), 3),
    }
    for i, (out_d, in_d) in enumerate(dims, start=1):
        params[f"dense{i}_w"] = _uniform(ks[2 * i], (out_d, in_d), in_d)
        params[f"dense{i}_b"] = _uniform(ks[2 * i + 1], (out_d,), in_d)
    return params


if __name__ == "__main__":
    key = jax.random.PRNGKey(0)
    key_x, key_p = jax.random.split(key)

    B = 2
    xi = jax.random.normal(key_x, (B, L), jnp.float32)
    params = make_params(key_p)
    prep = prepare_params(params)   # one-time: expansion matmul, transpose, bf16

    out = jax.block_until_ready(net_forward(xi, prep))
    ref_matched = jax.block_until_ready(reference_forward_matched(xi, prep))
    ref_f32 = jax.block_until_ready(reference_forward_f32(xi, params))

    assert out.shape == (B, 1), out.shape
    d_matched = float(jnp.max(jnp.abs(out - ref_matched)))
    d_f32 = float(jnp.max(jnp.abs(out - ref_f32)))
    assert d_matched < 1e-2, f"mismatch vs bf16-matched reference: {d_matched}"
    assert d_f32 < 5e-2, f"mismatch vs float32 reference: {d_f32}"
    print("KERNEL_OK")
</pallas_src>

<mosaic_0001>
module attributes {stable_mosaic.version = 11 : i64} {
  func.func @fused_net_kernel(%arg0: i32, %arg1: memref<8x128xf32, #tpu.memory_space<vmem>>, %arg2: memref<128x1024xbf16, #tpu.memory_space<vmem>>, %arg3: memref<1x1024xf32, #tpu.memory_space<vmem>>, %arg4: memref<1x1024xf32, #tpu.memory_space<vmem>>, %arg5: memref<1024x1024xbf16, #tpu.memory_space<vmem>>, %arg6: memref<1x1024xf32, #tpu.memory_space<vmem>>, %arg7: memref<1024x512xbf16, #tpu.memory_space<vmem>>, %arg8: memref<1x512xf32, #tpu.memory_space<vmem>>, %arg9: memref<512x256xbf16, #tpu.memory_space<vmem>>, %arg10: memref<1x256xf32, #tpu.memory_space<vmem>>, %arg11: memref<256x128xbf16, #tpu.memory_space<vmem>>, %arg12: memref<1x128xf32, #tpu.memory_space<vmem>>, %arg13: memref<1x128xf32, #tpu.memory_space<vmem>>, %arg14: memref<1x1xf32, #tpu.memory_space<vmem>>, %arg15: memref<8x1xf32, #tpu.memory_space<vmem>>) attributes {dimension_semantics = [#tpu.dimension_semantics<parallel>], iteration_bounds = array<i64: 1>, scalar_prefetch = 0 : i64, scratch_operands = 0 : i64, tpu.core_type = #tpu.core_type<tc>, window_params = [{transform_indices = @transform_0, window_bounds = array<i64: 8, 128>}, {pipeline_mode = #tpu.pipeline_mode<synchronous>, transform_indices = @transform_1, window_bounds = array<i64: 128, 1024>}, {pipeline_mode = #tpu.pipeline_mode<synchronous>, transform_indices = @transform_2, window_bounds = array<i64: 1, 1024>}, {pipeline_mode = #tpu.pipeline_mode<synchronous>, transform_indices = @transform_3, window_bounds = array<i64: 1, 1024>}, {pipeline_mode = #tpu.pipeline_mode<synchronous>, transform_indices = @transform_4, window_bounds = array<i64: 1024, 1024>}, {pipeline_mode = #tpu.pipeline_mode<synchronous>, transform_indices = @transform_5, window_bounds = array<i64: 1, 1024>}, {pipeline_mode = #tpu.pipeline_mode<synchronous>, transform_indices = @transform_6, window_bounds = array<i64: 1024, 512>}, {pipeline_mode = #tpu.pipeline_mode<synchronous>, transform_indices = @transform_7, window_bounds = array<i64: 1, 512>}, {pipeline_mode = #tpu.pipeline_mode<synchronous>, transform_indices = @transform_8, window_bounds = array<i64: 512, 256>}, {pipeline_mode = #tpu.pipeline_mode<synchronous>, transform_indices = @transform_9, window_bounds = array<i64: 1, 256>}, {pipeline_mode = #tpu.pipeline_mode<synchronous>, transform_indices = @transform_10, window_bounds = array<i64: 256, 128>}, {pipeline_mode = #tpu.pipeline_mode<synchronous>, transform_indices = @transform_11, window_bounds = array<i64: 1, 128>}, {pipeline_mode = #tpu.pipeline_mode<synchronous>, transform_indices = @transform_12, window_bounds = array<i64: 1, 128>}, {pipeline_mode = #tpu.pipeline_mode<synchronous>, transform_indices = @transform_13, window_bounds = array<i64: 1, 1>}, {transform_indices = @transform_14, window_bounds = array<i64: 8, 1>}]} {
    %c0 = arith.constant 0 : index
    %c0_0 = arith.constant 0 : index
    %0 = vector.load %arg1[%c0, %c0_0] : memref<8x128xf32, #tpu.memory_space<vmem>>, vector<8x128xf32>
    %1 = arith.truncf %0 : vector<8x128xf32> to vector<8x128xbf16>
    %c0_1 = arith.constant 0 : index
    %c0_2 = arith.constant 0 : index
    %2 = vector.load %arg2[%c0_1, %c0_2] : memref<128x1024xbf16, #tpu.memory_space<vmem>>, vector<128x1024xbf16>
    %cst = arith.constant dense<0.000000e+00> : vector<8x1024xf32>
    %3 = tpu.matmul %1, %2, %cst {dimension_numbers = #tpu.dot_dimension_numbers<[1], [0], [0], [1], [0, 0, 1, 1], [], []>} : vector<8x128xbf16>, vector<128x1024xbf16>, vector<8x1024xf32> -> vector<8x1024xf32>
    %c0_3 = arith.constant 0 : index
    %c0_4 = arith.constant 0 : index
    %4 = vector.load %arg3[%c0_3, %c0_4] : memref<1x1024xf32, #tpu.memory_space<vmem>>, vector<1x1024xf32>
    %5 = vector.broadcast %4 : vector<1x1024xf32> to vector<8x1024xf32>
    %6 = arith.addf %3, %5 : vector<8x1024xf32>
    %c0_5 = arith.constant 0 : index
    %c0_6 = arith.constant 0 : index
    %7 = vector.load %arg4[%c0_5, %c0_6] : memref<1x1024xf32, #tpu.memory_space<vmem>>, vector<1x1024xf32>
    %8 = vector.broadcast %7 : vector<1x1024xf32> to vector<8x1024xf32>
    %9 = arith.mulf %8, %6 : vector<8x1024xf32>
    %10 = arith.maximumf %6, %9 : vector<8x1024xf32>
    %11 = arith.truncf %10 : vector<8x1024xf32> to vector<8x1024xbf16>
    %c0_7 = arith.constant 0 : index
    %c0_8 = arith.constant 0 : index
    %12 = vector.load %arg5[%c0_7, %c0_8] : memref<1024x1024xbf16, #tpu.memory_space<vmem>>, vector<1024x1024xbf16>
    %cst_9 = arith.constant dense<0.000000e+00> : vector<8x1024xf32>
    %13 = tpu.matmul %11, %12, %cst_9 {dimension_numbers = #tpu.dot_dimension_numbers<[1], [0], [0], [1], [0, 0, 1, 1], [], []>} : vector<8x1024xbf16>, vector<1024x1024xbf16>, vector<8x1024xf32> -> vector<8x1024xf32>
    %c0_10 = arith.constant 0 : index
    %c0_11 = arith.constant 0 : index
    %14 = vector.load %arg6[%c0_10, %c0_11] : memref<1x1024xf32, #tpu.memory_space<vmem>>, vector<1x1024xf32>
    %15 = vector.broadcast %14 : vector<1x1024xf32> to vector<8x1024xf32>
    %16 = arith.addf %13, %15 : vector<8x1024xf32>
    %cst_12 = arith.constant 0.00999999977 : f32
    %17 = vector.broadcast %cst_12 : f32 to vector<8x1024xf32>
    %18 = arith.mulf %17, %16 : vector<8x1024xf32>
    %19 = arith.maximumf %16, %18 : vector<8x1024xf32>
    %20 = arith.truncf %19 : vector<8x1024xf32> to vector<8x1024xbf16>
    %c0_13 = arith.constant 0 : index
    %c0_14 = arith.constant 0 : index
    %21 = vector.load %arg7[%c0_13, %c0_14] : memref<1024x512xbf16, #tpu.memory_space<vmem>>, vector<1024x512xbf16>
    %cst_15 = arith.constant dense<0.000000e+00> : vector<8x512xf32>
    %22 = tpu.matmul %20, %21, %cst_15 {dimension_numbers = #tpu.dot_dimension_numbers<[1], [0], [0], [1], [0, 0, 1, 1], [], []>} : vector<8x1024xbf16>, vector<1024x512xbf16>, vector<8x512xf32> -> vector<8x512xf32>
    %c0_16 = arith.constant 0 : index
    %c0_17 = arith.constant 0 : index
    %23 = vector.load %arg8[%c0_16, %c0_17] : memref<1x512xf32, #tpu.memory_space<vmem>>, vector<1x512xf32>
    %24 = vector.broadcast %23 : vector<1x512xf32> to vector<8x512xf32>
    %25 = arith.addf %22, %24 : vector<8x512xf32>
    %cst_18 = arith.constant 0.00999999977 : f32
    %26 = vector.broadcast %cst_18 : f32 to vector<8x512xf32>
    %27 = arith.mulf %26, %25 : vector<8x512xf32>
    %28 = arith.maximumf %25, %27 : vector<8x512xf32>
    %29 = arith.truncf %28 : vector<8x512xf32> to vector<8x512xbf16>
    %c0_19 = arith.constant 0 : index
    %c0_20 = arith.constant 0 : index
    %30 = vector.load %arg9[%c0_19, %c0_20] : memref<512x256xbf16, #tpu.memory_space<vmem>>, vector<512x256xbf16>
    %cst_21 = arith.constant dense<0.000000e+00> : vector<8x256xf32>
    %31 = tpu.matmul %29, %30, %cst_21 {dimension_numbers = #tpu.dot_dimension_numbers<[1], [0], [0], [1], [0, 0, 1, 1], [], []>} : vector<8x512xbf16>, vector<512x256xbf16>, vector<8x256xf32> -> vector<8x256xf32>
    %c0_22 = arith.constant 0 : index
    %c0_23 = arith.constant 0 : index
    %32 = vector.load %arg10[%c0_22, %c0_23] : memref<1x256xf32, #tpu.memory_space<vmem>>, vector<1x256xf32>
    %33 = vector.broadcast %32 : vector<1x256xf32> to vector<8x256xf32>
    %34 = arith.addf %31, %33 : vector<8x256xf32>
    %cst_24 = arith.constant 0.00999999977 : f32
    %35 = vector.broadcast %cst_24 : f32 to vector<8x256xf32>
    %36 = arith.mulf %35, %34 : vector<8x256xf32>
    %37 = arith.maximumf %34, %36 : vector<8x256xf32>
    %38 = arith.truncf %37 : vector<8x256xf32> to vector<8x256xbf16>
    %c0_25 = arith.constant 0 : index
    %c0_26 = arith.constant 0 : index
    %39 = vector.load %arg11[%c0_25, %c0_26] : memref<256x128xbf16, #tpu.memory_space<vmem>>, vector<256x128xbf16>
    %cst_27 = arith.constant dense<0.000000e+00> : vector<8x128xf32>
    %40 = tpu.matmul %38, %39, %cst_27 {dimension_numbers = #tpu.dot_dimension_numbers<[1], [0], [0], [1], [0, 0, 1, 1], [], []>} : vector<8x256xbf16>, vector<256x128xbf16>, vector<8x128xf32> -> vector<8x128xf32>
    %c0_28 = arith.constant 0 : index
    %c0_29 = arith.constant 0 : index
    %41 = vector.load %arg12[%c0_28, %c0_29] : memref<1x128xf32, #tpu.memory_space<vmem>>, vector<1x128xf32>
    %42 = vector.broadcast %41 : vector<1x128xf32> to vector<8x128xf32>
    %43 = arith.addf %40, %42 : vector<8x128xf32>
    %cst_30 = arith.constant 0.00999999977 : f32
    %44 = vector.broadcast %cst_30 : f32 to vector<8x128xf32>
    %45 = arith.mulf %44, %43 : vector<8x128xf32>
    %46 = arith.maximumf %43, %45 : vector<8x128xf32>
    %c0_31 = arith.constant 0 : index
    %c0_32 = arith.constant 0 : index
    %47 = vector.load %arg13[%c0_31, %c0_32] : memref<1x128xf32, #tpu.memory_space<vmem>>, vector<1x128xf32>
    %48 = vector.broadcast %47 : vector<1x128xf32> to vector<8x128xf32>
    %49 = arith.mulf %46, %48 : vector<8x128xf32>
    %cst_33 = arith.constant dense<0.000000e+00> : vector<8xf32>
    %50 = vector.multi_reduction <add>, %49, %cst_33 [1] : vector<8x128xf32> to vector<8xf32>
    %51 = vector.shape_cast %50 : vector<8xf32> to vector<8x1xf32>
    %c0_34 = arith.constant 0 : index
    %c0_35 = arith.constant 0 : index
    %52 = vector.load %arg14[%c0_34, %c0_35] : memref<1x1xf32, #tpu.memory_space<vmem>>, vector<1x1xf32>
    %53 = vector.broadcast %52 : vector<1x1xf32> to vector<8x1xf32>
    %54 = arith.addf %51, %53 : vector<8x1xf32>
    %cst_36 = arith.constant 0.000000e+00 : f32
    %55 = vector.broadcast %cst_36 : f32 to vector<8x1xf32>
    %56 = arith.subf %55, %54 : vector<8x1xf32>
    %57 = math.exp %56 : vector<8x1xf32>
    %cst_37 = arith.constant 1.000000e+00 : f32
    %58 = vector.broadcast %cst_37 : f32 to vector<8x1xf32>
    %59 = arith.addf %58, %57 : vector<8x1xf32>
    %60 = tpu.reciprocal %59 {approx = true} : vector<8x1xf32> -> vector<8x1xf32>
    %c0_38 = arith.constant 0 : index
    %c0_39 = arith.constant 0 : index
    %61 = vector.load %arg15[%c0_38, %c0_39] : memref<8x1xf32, #tpu.memory_space<vmem>>, vector<8x1xf32>
    tpu.vector_store %arg15[%c0_38, %c0_39], %60 {strides = array<i32>} : memref<8x1xf32, #tpu.memory_space<vmem>>, vector<8x1xf32>,
    return
  }
  func.func @transform_0(%arg0: i32) -> (i32, i32) {
    %c0_i32 = arith.constant 0 : i32
    %c0_i32_0 = arith.constant 0 : i32
    return %arg0, %c0_i32 : i32, i32
  }
  func.func @transform_1(%arg0: i32) -> (i32, i32) {
    %c0_i32 = arith.constant 0 : i32
    %c0_i32_0 = arith.constant 0 : i32
    %c0_i32_1 = arith.constant 0 : i32
    return %c0_i32, %c0_i32_0 : i32, i32
  }
  func.func @transform_2(%arg0: i32) -> (i32, i32) {
    %c0_i32 = arith.constant 0 : i32
    %c0_i32_0 = arith.constant 0 : i32
    %c0_i32_1 = arith.constant 0 : i32
    return %c0_i32, %c0_i32_0 : i32, i32
  }
  func.func @transform_3(%arg0: i32) -> (i32, i32) {
    %c0_i32 = arith.constant 0 : i32
    %c0_i32_0 = arith.constant 0 : i32
    %c0_i32_1 = arith.constant 0 : i32
    return %c0_i32, %c0_i32_0 : i32, i32
  }
  func.func @transform_4(%arg0: i32) -> (i32, i32) {
    %c0_i32 = arith.constant 0 : i32
    %c0_i32_0 = arith.constant 0 : i32
    %c0_i32_1 = arith.constant 0 : i32
    return %c0_i32, %c0_i32_0 : i32, i32
  }
  func.func @transform_5(%arg0: i32) -> (i32, i32) {
    %c0_i32 = arith.constant 0 : i32
    %c0_i32_0 = arith.constant 0 : i32
    %c0_i32_1 = arith.constant 0 : i32
    return %c0_i32, %c0_i32_0 : i32, i32
  }
  func.func @transform_6(%arg0: i32) -> (i32, i32) {
    %c0_i32 = arith.constant 0 : i32
    %c0_i32_0 = arith.constant 0 : i32
    %c0_i32_1 = arith.constant 0 : i32
    return %c0_i32, %c0_i32_0 : i32, i32
  }
  func.func @transform_7(%arg0: i32) -> (i32, i32) {
    %c0_i32 = arith.constant 0 : i32
    %c0_i32_0 = arith.constant 0 : i32
    %c0_i32_1 = arith.constant 0 : i32
    return %c0_i32, %c0_i32_0 : i32, i32
  }
  func.func @transform_8(%arg0: i32) -> (i32, i32) {
    %c0_i32 = arith.constant 0 : i32
    %c0_i32_0 = arith.constant 0 : i32
    %c0_i32_1 = arith.constant 0 : i32
    return %c0_i32, %c0_i32_0 : i32, i32
  }
  func.func @transform_9(%arg0: i32) -> (i32, i32) {
    %c0_i32 = arith.constant 0 : i32
    %c0_i32_0 = arith.constant 0 : i32
    %c0_i32_1 = arith.constant 0 : i32
    return %c0_i32, %c0_i32_0 : i32, i32
  }
  func.func @transform_10(%arg0: i32) -> (i32, i32) {
    %c0_i32 = arith.constant 0 : i32
    %c0_i32_0 = arith.constant 0 : i32
    %c0_i32_1 = arith.constant 0 : i32
    return %c0_i32, %c0_i32_0 : i32, i32
  }
  func.func @transform_11(%arg0: i32) -> (i32, i32) {
    %c0_i32 = arith.constant 0 : i32
    %c0_i32_0 = arith.constant 0 : i32
    %c0_i32_1 = arith.constant 0 : i32
    return %c0_i32, %c0_i32_0 : i32, i32
  }
  func.func @transform_12(%arg0: i32) -> (i32, i32) {
    %c0_i32 = arith.constant 0 : i32
    %c0_i32_0 = arith.constant 0 : i32
    %c0_i32_1 = arith.constant 0 : i32
    return %c0_i32, %c0_i32_0 : i32, i32
  }
  func.func @transform_13(%arg0: i32) -> (i32, i32) {
    %c0_i32 = arith.constant 0 : i32
    %c0_i32_0 = arith.constant 0 : i32
    %c0_i32_1 = arith.constant 0 : i32
    return %c0_i32, %c0_i32_0 : i32, i32
  }
  func.func @transform_14(%arg0: i32) -> (i32, i32) {
    %c0_i32 = arith.constant 0 : i32
    %c0_i32_0 = arith.constant 0 : i32
    return %arg0, %c0_i32 : i32, i32
  }
}

</mosaic_0001>

<bundles_post_ra>
// kernel: tpu_custom_call.1
= control target key start
LH: loop header
LB: loop body
LE: loop exit
PB: predicated region body
PF: predicated region fallthrough
CT: control target
= control target key end

     0   :  { %s9420_s0 = inlined_call_operand.hbm [shape: f32[8,128], index: 0, kind: input, shape index: {}]   ;;  %s9421_s1 = inlined_call_operand.hbm [shape: bf16[128,1024], index: 1, kind: input, shape index: {}]   ;;  %s9422_s2 = inlined_call_operand.hbm [shape: f32[1,1024], index: 2, kind: input, shape index: {}]   ;;  %s9423_s3 = inlined_call_operand.hbm [shape: f32[1,1024], index: 3, kind: input, shape index: {}]   ;;  %s9424_s4 = inlined_call_operand.hbm [shape: bf16[1024,1024], index: 4, kind: input, shape index: {}]   ;;  %s9425_s5 = inlined_call_operand.hbm [shape: f32[1,1024], index: 5, kind: input, shape index: {}]   ;;  %s9426_s6 = inlined_call_operand.hbm [shape: bf16[1024,512], index: 6, kind: input, shape index: {}]   ;;  %s9427_s7 = inlined_call_operand.hbm [shape: f32[1,512], index: 7, kind: input, shape index: {}]   ;;  %s9428_s8 = inlined_call_operand.hbm [shape: bf16[512,256], index: 8, kind: input, shape index: {}]   ;;  %s9429_s9 = inlined_call_operand.hbm [shape: f32[1,256], index: 9, kind: input, shape index: {}]   ;;  %s9430_s10 = inlined_call_operand.hbm [shape: bf16[256,128], index: 10, kind: input, shape index: {}]   ;;  %s9431_s11 = inlined_call_operand.hbm [shape: f32[1,128], index: 11, kind: input, shape index: {}]   ;;  %s9432_s12 = inlined_call_operand.hbm [shape: f32[1,128], index: 12, kind: input, shape index: {}]   ;;  %s9433_s13 = inlined_call_operand.<no memory space> [shape: f32[1,1], index: 13, kind: input, shape index: {}]   ;;  %s9434_s14 = inlined_call_operand.vmem [shape: f32[8,1], index: 14, kind: output, shape index: {}]  }
   0x1   :  { %v19_v0 = vstv %s9433_s13 }
   0x2   :  { %20 = vst [vmem:[#allocation2] sm:$0x1] %v19_v0 }
   0x3   :  { %21 = vsyncpa [#allocation4], 0 }
   0x4   :  { %22 = vsyncpa [#allocation6], 0 }
   0x5   :  { %23 = vsyncpa [#allocation9], 0 }
   0x6   :  { %24 = vsyncpa [#allocation12], 0 }
   0x7   :  { %25 = vsyncpa [#allocation15], 0 }
   0x8   :  { %26 = vsyncpa [#allocation18], 0 }
   0x9   :  { %27 = vsyncpa [#allocation21], 0  ;;  %s8991_s15 = smov [#allocation5]  }
   0xa   :  { %s43_s16 = sshll.u32 %s8991_s15, 4  ;;  %s44_s16 = int_to_ptr.vmem [resolvable:$true] %s43_s16 }
   0xb   :  { %s8725_s17 = scalar_lea.vmem %s44_s16, 8192  ;;  %p8730_p1 = scmp.lt.s32.totalorder %s44_s16, %s44_s16 }
   0xc   :  { %p8726_p0 = scmp.ne.s32.totalorder %s44_s16, %s8725_s17  ;;  %p8731_p2 = scmp.lt.s32.totalorder %s8725_s17, %s8725_s17 }
   0xe   :  { %p8732_p3 = por %p8731_p2, %p8730_p1 }
  0x10   :  { %p8733_p4 = pnand %p8732_p3, %p8726_p0 }
  0x12   :  { %8736 = shalt.err (!%p8733_p4)
}
  0x13   :  { %s8992_s18 = smov 512   ;;  %s8993_s13 = smov 32  }
  0x14   :  { %49 = dma.hbm_to_vmem [thread:$0]  %s9421_s1, 8192, %s44_s16, [#allocation6], %s8992_s18, %s8992_s18, %s8993_s13  }
  0x15   :  { %s8994_s21 = smov [#allocation8]   ;;  %s8995_s23 = smov [#allocation11]  }
  0x16   :  { %s66_s22 = sshll.u32 %s8994_s21, 4  ;;  %s88_s24 = sshll.u32 %s8995_s23, 4  ;;  %s67_s22 = int_to_ptr.vmem [resolvable:$true] %s66_s22  ;;  %s89_s24 = int_to_ptr.vmem [resolvable:$true] %s88_s24 }
  0x17   :  { %s8745_s25 = scalar_lea.vmem %s67_s22, 128  ;;  %p8750_p6 = scmp.lt.s32.totalorder %s67_s22, %s67_s22 }
  0x18   :  { %p8746_p5 = scmp.ne.s32.totalorder %s67_s22, %s8745_s25  ;;  %p8751_p7 = scmp.lt.s32.totalorder %s8745_s25, %s8745_s25 }
  0x1a   :  { %p8752_p8 = por %p8751_p7, %p8750_p6 }
  0x1c   :  { %p8753_p9 = pnand %p8752_p8, %p8746_p5 }
  0x1e   :  { %8756 = shalt.err (!%p8753_p9)
}
  0x1f   :  { %69 = dma.hbm_to_vmem [thread:$0]  %s9423_s3, 128, %s67_s22, [#allocation9]  }
  0x20   :  { %s8765_s28 = scalar_lea.vmem %s89_s24, 128  ;;  %p8770_p11 = scmp.lt.s32.totalorder %s89_s24, %s89_s24 }
  0x21   :  { %p8766_p10 = scmp.ne.s32.totalorder %s89_s24, %s8765_s28  ;;  %p8771_p12 = scmp.lt.s32.totalorder %s8765_s28, %s8765_s28 }
  0x23   :  { %p8772_p13 = por %p8771_p12, %p8770_p11 }
  0x25   :  { %p8773_p0 = pnand %p8772_p13, %p8766_p10 }
  0x27   :  { %8776 = shalt.err (!%p8773_p0)
}
  0x28   :  { %91 = dma.hbm_to_vmem [thread:$0]  %s9425_s5, 128, %s89_s24, [#allocation12]  }
  0x29   :  { %s8996_s30 = smov [#allocation14]   ;;  %s8997_s16 = smov [#allocation17]  }
  0x2a   :  { %s110_s15 = sshll.u32 %s8996_s30, 4  ;;  %s132_s17 = sshll.u32 %s8997_s16, 4  ;;  %s111_s15 = int_to_ptr.vmem [resolvable:$true] %s110_s15  ;;  %s133_s17 = int_to_ptr.vmem [resolvable:$true] %s132_s17 }
  0x2b   :  { %s8785_s19 = scalar_lea.vmem %s111_s15, 64  ;;  %p8790_p2 = scmp.lt.s32.totalorder %s111_s15, %s111_s15 }
  0x2c   :  { %p8786_p1 = scmp.ne.s32.totalorder %s111_s15, %s8785_s19  ;;  %p8791_p3 = scmp.lt.s32.totalorder %s8785_s19, %s8785_s19 }
  0x2e   :  { %p8792_p4 = por %p8791_p3, %p8790_p2 }
  0x30   :  { %p8793_p5 = pnand %p8792_p4, %p8786_p1 }
  0x32   :  { %8796 = shalt.err (!%p8793_p5)
}
  0x33   :  { %113 = dma.hbm_to_vmem [thread:$0]  %s9427_s7, 64, %s111_s15, [#allocation15]  }
  0x34   :  { %s8805_s21 = scalar_lea.vmem %s133_s17, 32  ;;  %p8810_p7 = scmp.lt.s32.totalorder %s133_s17, %s133_s17 }
  0x35   :  { %p8806_p6 = scmp.ne.s32.totalorder %s133_s17, %s8805_s21  ;;  %p8811_p8 = scmp.lt.s32.totalorder %s8805_s21, %s8805_s21 }
  0x37   :  { %p8812_p9 = por %p8811_p8, %p8810_p7 }
  0x39   :  { %p8813_p10 = pnand %p8812_p9, %p8806_p6 }
  0x3b   :  { %8816 = shalt.err (!%p8813_p10)
}
  0x3c   :  { %135 = dma.hbm_to_vmem [thread:$0]  %s9429_s9, 32, %s133_s17, [#allocation18]  }
  0x3d   :  { %s8998_s23 = smov [#allocation20]   ;;  %s8999_s25 = smov [#allocation3]  }
  0x3e   :  { %s154_s24 = sshll.u32 %s8998_s23, 4  ;;  %s34_s26 = sshll.u32 %s8999_s25, 4  ;;  %s155_s24 = int_to_ptr.vmem [resolvable:$true] %s154_s24  ;;  %s35_s26 = int_to_ptr.vmem [resolvable:$true] %s34_s26 }
  0x3f   :  { %s8825_s27 = scalar_lea.vmem %s155_s24, 16  ;;  %s8829_s7 = scalar_lea.vmem %s155_s24, 32 }
  0x40   :  { %p8826_p11 = scmp.ne.s32.totalorder %s155_s24, %s8825_s27  ;;  %p8830_p12 = scmp.lt.s32.totalorder %s155_s24, %s155_s24 }
  0x41   :  { %p8831_p13 = scmp.lt.s32.totalorder %s8829_s7, %s8825_s27 }
  0x43   :  { %p8832_p0 = por %p8831_p13, %p8830_p12 }
  0x45   :  { %p8833_p1 = pnand %p8832_p0, %p8826_p11 }
  0x47   :  { %8836 = shalt.err (!%p8833_p1)
}
  0x48   :  { %157 = dma.hbm_to_vmem [thread:$0]  %s9431_s11, 16, %s155_s24, [#allocation21]  }
  0x49   :  { %s8845_s29 = scalar_lea.vmem %s35_s26, 128  ;;  %p8850_p3 = scmp.lt.s32.totalorder %s35_s26, %s35_s26 }
  0x4a   :  { %p8846_p2 = scmp.ne.s32.totalorder %s35_s26, %s8845_s29  ;;  %p8851_p4 = scmp.lt.s32.totalorder %s8845_s29, %s8845_s29 }
  0x4c   :  { %p8852_p5 = por %p8851_p4, %p8850_p3 }
  0x4e   :  { %p8853_p6 = pnand %p8852_p5, %p8846_p2 }
  0x50   :  { %8856 = shalt.err (!%p8853_p6)
}
  0x51   :  { %37 = dma.hbm_to_vmem [thread:$0]  %s9420_s0, 128, %s35_s26, [#allocation4]  }
  0x52   :  { %s9000_s15 = smov [#allocation7]   ;;  %s9001_s17 = smov [#allocation10]  }
  0x53   :  { %s56_s16 = sshll.u32 %s9000_s15, 4  ;;  %s75_s19 = sshll.u32 %s9001_s17, 4  ;;  %s57_s16 = int_to_ptr.vmem [resolvable:$true] %s56_s16  ;;  %s76_s19 = int_to_ptr.vmem [resolvable:$true] %s75_s19 }
  0x54   :  { %s8865_s3 = scalar_lea.vmem %s57_s16, 128  ;;  %p8870_p8 = scmp.lt.s32.totalorder %s57_s16, %s57_s16 }
  0x55   :  { %p8866_p7 = scmp.ne.s32.totalorder %s57_s16, %s8865_s3  ;;  %p8871_p9 = scmp.lt.s32.totalorder %s8865_s3, %s8865_s3 }
  0x57   :  { %p8872_p10 = por %p8871_p9, %p8870_p8 }
  0x59   :  { %p8873_p11 = pnand %p8872_p10, %p8866_p7 }
  0x5b   :  { %8876 = shalt.err (!%p8873_p11)
}
  0x5c   :  { %59 = dma.hbm_to_vmem [thread:$0]  %s9422_s2, 128, %s57_s16, [#allocation6]  }
  0x5d   :  { %s8885_s21 = scalar_lea.vmem %s76_s19, 65536  ;;  %p8890_p13 = scmp.lt.s32.totalorder %s76_s19, %s76_s19 }
  0x5e   :  { %p8886_p12 = scmp.ne.s32.totalorder %s76_s19, %s8885_s21  ;;  %p8891_p0 = scmp.lt.s32.totalorder %s8885_s21, %s8885_s21 }
  0x60   :  { %p8892_p1 = por %p8891_p0, %p8890_p13 }
  0x62   :  { %p8893_p2 = pnand %p8892_p1, %p8886_p12 }
  0x64   :  { %8896 = shalt.err (!%p8893_p2)
}
  0x65   :  { %81 = dma.hbm_to_vmem [thread:$0]  %s9424_s4, 65536, %s76_s19, [#allocation9], %s8992_s18, %s8992_s18, %s8993_s13  }
  0x66   :  { %s9002_s22 = smov [#allocation13]  }
  0x67   :  { %s97_s23 = sshll.u32 %s9002_s22, 4  ;;  %s98_s23 = int_to_ptr.vmem [resolvable:$true] %s97_s23 }
  0x68   :  { %s8905_s24 = scalar_lea.vmem %s98_s23, 32768  ;;  %p8910_p4 = scmp.lt.s32.totalorder %s98_s23, %s98_s23 }
  0x69   :  { %p8906_p3 = scmp.ne.s32.totalorder %s98_s23, %s8905_s24  ;;  %p8911_p5 = scmp.lt.s32.totalorder %s8905_s24, %s8905_s24 }
  0x6b   :  { %p8912_p6 = por %p8911_p5, %p8910_p4 }
  0x6d   :  { %p8913_p7 = pnand %p8912_p6, %p8906_p3 }
  0x6f   :  { %8916 = shalt.err (!%p8913_p7)
}
  0x70   :  { %s9003_s2 = smov 256   ;;  %s9004_s25 = smov 16  }
  0x71   :  { %103 = dma.hbm_to_vmem [thread:$0]  %s9426_s6, 32768, %s98_s23, [#allocation12], %s9003_s2, %s9003_s2, %s9004_s25  }
  0x72   :  { %s9005_s7 = smov [#allocation16]  }
  0x73   :  { %s119_s28 = sshll.u32 %s9005_s7, 4  ;;  %s120_s28 = int_to_ptr.vmem [resolvable:$true] %s119_s28 }
  0x74   :  { %s8925_s4 = scalar_lea.vmem %s120_s28, 8192  ;;  %p8930_p9 = scmp.lt.s32.totalorder %s120_s28, %s120_s28 }
  0x75   :  { %p8926_p8 = scmp.ne.s32.totalorder %s120_s28, %s8925_s4  ;;  %p8931_p10 = scmp.lt.s32.totalorder %s8925_s4, %s8925_s4 }
  0x77   :  { %p8932_p11 = por %p8931_p10, %p8930_p9 }
  0x79   :  { %p8933_p12 = pnand %p8932_p11, %p8926_p8 }
  0x7b   :  { %8936 = shalt.err (!%p8933_p12)
}
  0x7c   :  { %s9006_s18 = smov 128   ;;  %s9007_s13 = smov 8  }
  0x7d   :  { %125 = dma.hbm_to_vmem [thread:$0]  %s9428_s8, 8192, %s120_s28, [#allocation15], %s9006_s18, %s9006_s18, %s9007_s13  }
  0x7e   :  { %s9008_s9 = smov [#allocation19]  }
  0x7f   :  { %s141_s30 = sshll.u32 %s9008_s9, 4  ;;  %s142_s30 = int_to_ptr.vmem [resolvable:$true] %s141_s30 }
  0x80   :  { %s8945_s6 = scalar_lea.vmem %s142_s30, 2048  ;;  %p8950_p0 = scmp.lt.s32.totalorder %s142_s30, %s142_s30 }
  0x81   :  { %p8946_p13 = scmp.ne.s32.totalorder %s142_s30, %s8945_s6  ;;  %p8951_p1 = scmp.lt.s32.totalorder %s8945_s6, %s8945_s6 }
  0x83   :  { %p8952_p2 = por %p8951_p1, %p8950_p0 }
  0x85   :  { %p8953_p3 = pnand %p8952_p2, %p8946_p13 }
  0x87   :  { %8956 = shalt.err (!%p8953_p3)
}
  0x88   :  { %s9009_s15 = smov 64   ;;  %s9010_s16 = smov 4  }
  0x89   :  { %147 = dma.hbm_to_vmem [thread:$0]  %s9430_s10, 2048, %s142_s30, [#allocation18], %s9009_s15, %s9009_s15, %s9010_s16  }
  0x8a   :  { %s9011_s3 = smov [#allocation22]  }
  0x8b   :  { %s164_s11 = sshll.u32 %s9011_s3, 4  ;;  %s165_s11 = int_to_ptr.vmem [resolvable:$true] %s164_s11 }
  0x8c   :  { %s8965_s8 = scalar_lea.vmem %s165_s11, 16  ;;  %s8969_s20 = scalar_lea.vmem %s165_s11, 32 }
  0x8d   :  { %p8966_p4 = scmp.ne.s32.totalorder %s165_s11, %s8965_s8  ;;  %p8970_p5 = scmp.lt.s32.totalorder %s165_s11, %s165_s11 }
  0x8e   :  { %p8971_p6 = scmp.lt.s32.totalorder %s8969_s20, %s8965_s8 }
  0x90   :  { %p8972_p7 = por %p8971_p6, %p8970_p5 }
  0x92   :  { %p8973_p8 = pnand %p8972_p7, %p8966_p4 }
  0x94   :  { %8976 = shalt.err (!%p8973_p8)
}
  0x95   :  { %167 = dma.hbm_to_vmem [thread:$0]  %s9432_s12, 16, %s165_s11, [#allocation21]  }
  0x96   :  { %8977 = dma.done.wait [#allocation4], 128  }
  0x97   :  { %8978 = vsyncadd [#allocation4], 4294967168 }
  0x98   :  { %8979 = dma.done.wait [#allocation6], 8320  }
  0x99   :  { %8980 = vsyncadd [#allocation6], 4294958976 }
  0x9a   :  { %8981 = dma.done.wait [#allocation9], 65664  }
  0x9b   :  { %8982 = vsyncadd [#allocation9], 4294901632 }
  0x9c   :  { %8983 = dma.done.wait [#allocation12], 32896  }
  0x9d   :  { %8984 = vsyncadd [#allocation12], 4294934400 }
  0x9e   :  { %8985 = dma.done.wait [#allocation15], 8256  }
  0x9f   :  { %8986 = vsyncadd [#allocation15], 4294959040 }
  0xa0   :  { %8987 = dma.done.wait [#allocation18], 2080  }
  0xa1   :  { %8988 = vsyncadd [#allocation18], 4294965216 }
  0xa2   :  { %8989 = dma.done.wait [#allocation21], 32  }
  0xa3   :  { %8990 = vsyncadd [#allocation21], 4294967264  ;;  %v9012_v1 = vmov 0   ;;  %v268_v2 = vld [vmem:[#allocation5 + $0x1c0] sm:$0xff]  ;;  %v269_v4 = vld [vmem:[#allocation5 + $0x1c8] sm:$0xff]  ;;  %vm7244_vm0 = vcmask 7168  }
  0xa4   :  { %670 = vmatprep.mubr.bf16.mxu0 %v9012_v1  ;;  %711 = vmatprep.mubr.bf16.mxu1 %v9012_v1  ;;  %v272_v3 = vld [vmem:[#allocation5 + $0x1e0] sm:$0xff]  ;;  %v273_v6 = vld [vmem:[#allocation5 + $0x1e8] sm:$0xff]  ;;  %v270_v0 = vld [vmem:[#allocation5 + $0x1d0] sm:$0xff] }
  0xa5   :  { %v7314_v5 = vcombine.high %v268_v2, %v272_v3  ;;  %v7313_v7 = vcombine.low %v268_v2, %v272_v3  ;;  %v260_v8 = vld [vmem:[#allocation5 + $0x180] sm:$0xff]  ;;  %v7316_v10 = vcombine.high %v269_v4, %v273_v6  ;;  %v7315_v11 = vcombine.low %v269_v4, %v273_v6  ;;  %v261_v13 = vld [vmem:[#allocation5 + $0x188] sm:$0xff]  ;;  %v274_v2 = vld [vmem:[#allocation5 + $0x1f0] sm:$0xff] }
  0xa6   :  { %v264_v9 = vld [vmem:[#allocation5 + $0x1a0] sm:$0xff]  ;;  %v265_v14 = vld [vmem:[#allocation5 + $0x1a8] sm:$0xff]  ;;  %v271_v3 = vld [vmem:[#allocation5 + $0x1d8] sm:$0xff] }
  0xa7   :  { %v7306_v12 = vcombine.high %v260_v8, %v264_v9  ;;  %v252_v15 = vld [vmem:[#allocation5 + $0x140] sm:$0xff]  ;;  %638 = vmatprep.subr.bf16.mxu0 %v7314_v5  ;;  %v7308_v16 = vcombine.high %v261_v13, %v265_v14  ;;  %v253_v18 = vld [vmem:[#allocation5 + $0x148] sm:$0xff]  ;;  %679 = vmatprep.subr.bf16.mxu1 %v7316_v10  ;;  %v7305_v20 = vcombine.low %v260_v8, %v264_v9  ;;  %v275_v4 = vld [vmem:[#allocation5 + $0x1f8] sm:$0xff] }
  0xa8   :  { %v256_v17 = vld [vmem:[#allocation5 + $0x160] sm:$0xff]  ;;  %v257_v19 = vld [vmem:[#allocation5 + $0x168] sm:$0xff]  ;;  %639 = vmatpush1.bf16.msra.mxu0 %v7313_v7  ;;  %680 = vmatpush1.bf16.msra.mxu1 %v7315_v11  ;;  %v7307_v21 = vcombine.low %v261_v13, %v265_v14  ;;  %v210_v6 = vld [vmem:[#allocation3] sm:$0xff]  ;;  %v7318_v8 = vcombine.high %v270_v0, %v274_v2  ;;  %v7320_v9 = vcombine.high %v271_v3, %v275_v4 }
  0xa9   :  { %640 = vmatprep.subr.bf16.mxu0 %v7306_v12  ;;  %v7298_v22 = vcombine.high %v252_v15, %v256_v17  ;;  %681 = vmatprep.subr.bf16.mxu1 %v7308_v16  ;;  %v7300_v23 = vcombine.high %v253_v18, %v257_v19  ;;  %v244_v24 = vld [vmem:[#allocation5 + $0x100] sm:$0xff]  ;;  %v245_v26 = vld [vmem:[#allocation5 + $0x108] sm:$0xff]  ;;  %v7297_v28 = vcombine.low %v252_v15, %v256_v17  ;;  %v262_v10 = vld [vmem:[#allocation5 + $0x190] sm:$0xff] }
  0xaa   :  { %v248_v25 = vld [vmem:[#allocation5 + $0x120] sm:$0xff]  ;;  %v249_v27 = vld [vmem:[#allocation5 + $0x128] sm:$0xff]  ;;  %v7299_v29 = vcombine.low %v253_v18, %v257_v19  ;;  %v266_v11 = vld [vmem:[#allocation5 + $0x1b0] sm:$0xff]  ;;  %v9138_v12 = vpack.c.bf16 %v210_v6, %v210_v6  ;;  %v7317_v15 = vcombine.low %v270_v0, %v274_v2  ;;  %v7319_v16 = vcombine.low %v271_v3, %v275_v4 }
  0xab   :  { %v7290_v30 = vcombine.high %v244_v24, %v248_v25  ;;  %v7292_v31 = vcombine.high %v245_v26, %v249_v27  ;;  %v236_v32 = vld [vmem:[#allocation5 + $0xc0] sm:$0xff]  ;;  %v237_v34 = vld [vmem:[#allocation5 + $0xc8] sm:$0xff]  ;;  %v7289_v36 = vcombine.low %v244_v24, %v248_v25  ;;  %v7291_v37 = vcombine.low %v245_v26, %v249_v27  ;;  %v263_v13 = vld [vmem:[#allocation5 + $0x198] sm:$0xff] }
  0xac   :  { %641 = vmatpush1.bf16.msra.mxu0 %v7305_v20  ;;  %682 = vmatpush1.bf16.msra.mxu1 %v7307_v21  ;;  %v240_v33 = vld [vmem:[#allocation5 + $0xe0] sm:$0xff]  ;;  %v241_v35 = vld [vmem:[#allocation5 + $0xe8] sm:$0xff]  ;;  %v267_v14 = vld [vmem:[#allocation5 + $0x1b8] sm:$0xff]  ;;  %v7310_v17 = vcombine.high %v262_v10, %v266_v11 }
  0xad   :  { %642 = vmatprep.subr.bf16.mxu0 %v7298_v22  ;;  %683 = vmatprep.subr.bf16.mxu1 %v7300_v23  ;;  %v7282_v38 = vcombine.high %v236_v32, %v240_v33  ;;  %v7284_v39 = vcombine.high %v237_v34, %v241_v35  ;;  %v228_v40 = vld [vmem:[#allocation5 + $0x80] sm:$0xff]  ;;  %v229_v42 = vld [vmem:[#allocation5 + $0x88] sm:$0xff]  ;;  %v7281_v44 = vcombine.low %v236_v32, %v240_v33  ;;  %v254_v19 = vld [vmem:[#allocation5 + $0x150] sm:$0xff] }
  0xae   :  { %v232_v41 = vld [vmem:[#allocation5 + $0xa0] sm:$0xff]  ;;  %v233_v43 = vld [vmem:[#allocation5 + $0xa8] sm:$0xff]  ;;  %v7283_v45 = vcombine.low %v237_v34, %v241_v35  ;;  %v7312_v18 = vcombine.high %v263_v13, %v267_v14  ;;  %v258_v20 = vld [vmem:[#allocation5 + $0x170] sm:$0xff]  ;;  %v7309_v23 = vcombine.low %v262_v10, %v266_v11  ;;  %v7311_v24 = vcombine.low %v263_v13, %v267_v14 }
  0xaf   :  { %v7274_v46 = vcombine.high %v228_v40, %v232_v41  ;;  %v7276_v47 = vcombine.high %v229_v42, %v233_v43  ;;  %v220_v48 = vld [vmem:[#allocation5 + $0x40] sm:$0xff]  ;;  %v221_v50 = vld [vmem:[#allocation5 + $0x48] sm:$0xff]  ;;  %v7273_v52 = vcombine.low %v228_v40, %v232_v41  ;;  %v7275_v53 = vcombine.low %v229_v42, %v233_v43  ;;  %v255_v21 = vld [vmem:[#allocation5 + $0x158] sm:$0xff] }
  0xb0   :  { %643 = vmatpush1.bf16.msra.mxu0 %v7297_v28  ;;  %684 = vmatpush1.bf16.msra.mxu1 %v7299_v29  ;;  %v224_v49 = vld [vmem:[#allocation5 + $0x60] sm:$0xff]  ;;  %v225_v51 = vld [vmem:[#allocation5 + $0x68] sm:$0xff]  ;;  %v259_v22 = vld [vmem:[#allocation5 + $0x178] sm:$0xff]  ;;  %v7302_v25 = vcombine.high %v254_v19, %v258_v20 }
  0xb1   :  { %644 = vmatprep.subr.bf16.mxu0 %v7290_v30  ;;  %685 = vmatprep.subr.bf16.mxu1 %v7292_v31  ;;  %v7266_v54 = vcombine.high %v220_v48, %v224_v49  ;;  %v7268_v55 = vcombine.high %v221_v50, %v225_v51  ;;  %v212_v56 = vld [vmem:[#allocation5] sm:$0xff]  ;;  %v213_v58 = vld [vmem:[#allocation5 + $0x8] sm:$0xff]  ;;  %v7265_v60 = vcombine.low %v220_v48, %v224_v49  ;;  %v246_v27 = vld [vmem:[#allocation5 + $0x110] sm:$0xff] }
  0xb2   :  { %v216_v57 = vld [vmem:[#allocation5 + $0x20] sm:$0xff]  ;;  %v217_v59 = vld [vmem:[#allocation5 + $0x28] sm:$0xff]  ;;  %v7267_v61 = vcombine.low %v221_v50, %v225_v51  ;;  %v7304_v26 = vcombine.high %v255_v21, %v259_v22  ;;  %v250_v28 = vld [vmem:[#allocation5 + $0x130] sm:$0xff]  ;;  %v7301_v31 = vcombine.low %v254_v19, %v258_v20  ;;  %v7303_v34 = vcombine.low %v255_v21, %v259_v22 }
  0xb3   :  { %v7258_v62 = vcombine.high %v212_v56, %v216_v57  ;;  %v7260_v63 = vcombine.high %v213_v58, %v217_v59  ;;  %v7257_v5 = vcombine.low %v212_v56, %v216_v57  ;;  %v7259_v7 = vcombine.low %v213_v58, %v217_v59  ;;  %v247_v29 = vld [vmem:[#allocation5 + $0x118] sm:$0xff]  ;;  %v238_v32 = vld [vmem:[#allocation5 + $0xd0] sm:$0xff] }
  0xb4   :  { %645 = vmatpush1.bf16.msra.mxu0 %v7289_v36  ;;  %686 = vmatpush1.bf16.msra.mxu1 %v7291_v37  ;;  %v251_v30 = vld [vmem:[#allocation5 + $0x138] sm:$0xff]  ;;  %v242_v33 = vld [vmem:[#allocation5 + $0xf0] sm:$0xff]  ;;  %v7294_v35 = vcombine.high %v246_v27, %v250_v28 }
  0xb5   :  { %646 = vmatprep.subr.bf16.mxu0 %v7282_v38  ;;  %687 = vmatprep.subr.bf16.mxu1 %v7284_v39  ;;  %v239_v36 = vld [vmem:[#allocation5 + $0xd8] sm:$0xff]  ;;  %v7296_v38 = vcombine.high %v247_v29, %v251_v30  ;;  %v7293_v39 = vcombine.low %v246_v27, %v250_v28  ;;  %v230_v40 = vld [vmem:[#allocation5 + $0x90] sm:$0xff]  ;;  %v7295_v42 = vcombine.low %v247_v29, %v251_v30 }
  0xb6   :  { %v243_v37 = vld [vmem:[#allocation5 + $0xf8] sm:$0xff]  ;;  %v234_v41 = vld [vmem:[#allocation5 + $0xb0] sm:$0xff] }
  0xb7   :  { %v231_v43 = vld [vmem:[#allocation5 + $0x98] sm:$0xff]  ;;  %v226_v48 = vld [vmem:[#allocation5 + $0x70] sm:$0xff]  ;;  %v7287_v49 = vcombine.low %v239_v36, %v243_v37  ;;  %v7278_v50 = vcombine.high %v230_v40, %v234_v41 }
  0xb8   :  { %647 = vmatpush1.bf16.msra.mxu0 %v7281_v44  ;;  %688 = vmatpush1.bf16.msra.mxu1 %v7283_v45  ;;  %v235_v44 = vld [vmem:[#allocation5 + $0xb8] sm:$0xff]  ;;  %v7288_v45 = vcombine.high %v239_v36, %v243_v37  ;;  %v218_v56 = vld [vmem:[#allocation5 + $0x30] sm:$0xff] }
  0xb9   :  { %648 = vmatprep.subr.bf16.mxu0 %v7274_v46  ;;  %689 = vmatprep.subr.bf16.mxu1 %v7276_v47  ;;  %v7285_v46 = vcombine.low %v238_v32, %v242_v33  ;;  %v222_v47 = vld [vmem:[#allocation5 + $0x50] sm:$0xff]  ;;  %v223_v51 = vld [vmem:[#allocation5 + $0x58] sm:$0xff]  ;;  %v7279_v57 = vcombine.low %v231_v43, %v235_v44 }
  0xba   :  { %v7270_v58 = vcombine.high %v222_v47, %v226_v48  ;;  %v215_v59 = vld [vmem:[#allocation5 + $0x18] sm:$0xff]  ;;  %v928_v0 = vld [vmem:[#allocation10 + $0x1e0] sm:$0xff] }
  0xbb   :  { %v1052_v4 = vld [vmem:[#allocation10 + $0x5c0] sm:$0xff] }
  0xbc   :  { %649 = vmatpush1.bf16.msra.mxu0 %v7273_v52  ;;  %690 = vmatpush1.bf16.msra.mxu1 %v7275_v53  ;;  %v227_v52 = vld [vmem:[#allocation5 + $0x78] sm:$0xff]  ;;  %v7280_v53 = vcombine.high %v231_v43, %v235_v44  ;;  %v1044_v13 = vld [vmem:[#allocation10 + $0x580] sm:$0xff] }
  0xbd   :  { %650 = vmatprep.subr.bf16.mxu0 %v7266_v54  ;;  %691 = vmatprep.subr.bf16.mxu1 %v7268_v55  ;;  %v7277_v54 = vcombine.low %v230_v40, %v234_v41  ;;  %v214_v55 = vld [vmem:[#allocation5 + $0x10] sm:$0xff]  ;;  %v7271_v2 = vcombine.low %v223_v51, %v227_v52 }
  0xbe   :  { %v7262_v3 = vcombine.high %v214_v55, %v218_v56  ;;  %v1048_v14 = vld [vmem:[#allocation10 + $0x5a0] sm:$0xff] }
  0xbf   :  { %v1036_v21 = vld [vmem:[#allocation10 + $0x540] sm:$0xff]  ;;  %v7497_v27 = vcombine.low %v1044_v13, %v1048_v14 }
  0xc0   :  { %651 = vmatpush1.bf16.msra.mxu0 %v7265_v60  ;;  %692 = vmatpush1.bf16.msra.mxu1 %v7267_v61  ;;  %v219_v60 = vld [vmem:[#allocation5 + $0x38] sm:$0xff]  ;;  %v7272_v61 = vcombine.high %v223_v51, %v227_v52  ;;  %v1040_v22 = vld [vmem:[#allocation10 + $0x560] sm:$0xff] }
  0xc1   :  { %652 = vmatprep.subr.bf16.mxu0 %v7258_v62  ;;  %693 = vmatprep.subr.bf16.mxu1 %v7260_v63  ;;  %v7269_v62 = vcombine.low %v222_v47, %v226_v48  ;;  %v924_v63 = vld [vmem:[#allocation10 + $0x1c0] sm:$0xff]  ;;  %v7264_v6 = vcombine.high %v215_v59, %v219_v60  ;;  %v7263_v10 = vcombine.low %v215_v59, %v219_v60 }
  0xc2   :  { %v7378_v11 = vcombine.high %v924_v63, %v928_v0  ;;  %v1028_v29 = vld [vmem:[#allocation10 + $0x500] sm:$0xff] }
  0xc3   :  { %v1032_v30 = vld [vmem:[#allocation10 + $0x520] sm:$0xff] }
  0xc4   :  { %653 = vmatpush1.bf16.msra.mxu0 %v7257_v5  ;;  %694 = vmatpush1.bf16.msra.mxu1 %v7259_v7  ;;  %v1056_v5 = vld [vmem:[#allocation10 + $0x5e0] sm:$0xff]  ;;  %v7261_v7 = vcombine.low %v214_v55, %v218_v56 }
  0xc5   :  { %720 = vmatprep.subr.bf16.mxu0 %v7318_v8  ;;  %761 = vmatprep.subr.bf16.mxu1 %v7320_v9  ;;  %v916_v8 = vld [vmem:[#allocation10 + $0x180] sm:$0xff]  ;;  %v7505_v19 = vcombine.low %v1052_v4, %v1056_v5 }
  0xc6   :  { %v920_v9 = vld [vmem:[#allocation10 + $0x1a0] sm:$0xff] }
  0xc7   :  { %671 = vmatmul.mubr.bf16.vlgmr.msra.gmra.mxu0 %v9138_v12  ;;  %712 = vmatmul.mubr.bf16.vlgmr.msra.gmra.mxu1 %v9138_v12  ;;  %v7370_v20 = vcombine.high %v916_v8, %v920_v9  ;;  %v1020_v36 = vld [vmem:[#allocation10 + $0x4c0] sm:$0xff] }
  0xc8   :  { %721 = vmatpush1.bf16.msra.mxu0 %v7317_v15  ;;  %762 = vmatpush1.bf16.msra.mxu1 %v7319_v16  ;;  %v7506_v15 = vcombine.high %v1052_v4, %v1056_v5  ;;  %v7377_v16 = vcombine.low %v924_v63, %v928_v0  ;;  %v1024_v37 = vld [vmem:[#allocation10 + $0x4e0] sm:$0xff] }
  0xc9   :  { %722 = vmatprep.subr.bf16.mxu0 %v7310_v17  ;;  %763 = vmatprep.subr.bf16.mxu1 %v7312_v18  ;;  %v908_v17 = vld [vmem:[#allocation10 + $0x140] sm:$0xff] }
  0xca   :  { %752 = vmatprep.mubr.bf16.mxu0 %v9012_v1  ;;  %793 = vmatprep.mubr.bf16.mxu1 %v9012_v1  ;;  %v7286_v1 = vcombine.high %v238_v32, %v242_v33  ;;  %v912_v18 = vld [vmem:[#allocation10 + $0x160] sm:$0xff] }
  0xcb   :  { %v7362_v28 = vcombine.high %v908_v17, %v912_v18  ;;  %v7361_v32 = vcombine.low %v908_v17, %v912_v18  ;;  %v892_v33 = vld [vmem:[#allocation10 + $0xc0] sm:$0xff] }
  0xcc   :  { %723 = vmatpush1.bf16.msra.mxu0 %v7309_v23  ;;  %764 = vmatpush1.bf16.msra.mxu1 %v7311_v24  ;;  %v7498_v23 = vcombine.high %v1044_v13, %v1048_v14  ;;  %v7369_v24 = vcombine.low %v916_v8, %v920_v9  ;;  %v884_v40 = vld [vmem:[#allocation10 + $0x80] sm:$0xff] }
  0xcd   :  { %724 = vmatprep.subr.bf16.mxu0 %v7302_v25  ;;  %765 = vmatprep.subr.bf16.mxu1 %v7304_v26  ;;  %v900_v25 = vld [vmem:[#allocation10 + $0x100] sm:$0xff] }
  0xce   :  { %v904_v26 = vld [vmem:[#allocation10 + $0x120] sm:$0xff] }
  0xcf   :  { %v888_v41 = vld [vmem:[#allocation10 + $0xa0] sm:$0xff] }
  0xd0   :  { %725 = vmatpush1.bf16.msra.mxu0 %v7301_v31  ;;  %766 = vmatpush1.bf16.msra.mxu1 %v7303_v34  ;;  %v7490_v31 = vcombine.high %v1036_v21, %v1040_v22  ;;  %v896_v34 = vld [vmem:[#allocation10 + $0xe0] sm:$0xff] }
  0xd1   :  { %726 = vmatprep.subr.bf16.mxu0 %v7294_v35  ;;  %767 = vmatprep.subr.bf16.mxu1 %v7296_v38  ;;  %v7489_v35 = vcombine.low %v1036_v21, %v1040_v22  ;;  %v7482_v38 = vcombine.high %v1028_v29, %v1032_v30  ;;  %v1012_v43 = vld [vmem:[#allocation10 + $0x480] sm:$0xff] }
  0xd2   :  { %v1016_v44 = vld [vmem:[#allocation10 + $0x4a0] sm:$0xff] }
  0xd3   :  { %v876_v47 = vld [vmem:[#allocation10 + $0x40] sm:$0xff] }
  0xd4   :  { %727 = vmatpush1.bf16.msra.mxu0 %v7293_v39  ;;  %768 = vmatpush1.bf16.msra.mxu1 %v7295_v42  ;;  %v7353_v39 = vcombine.low %v900_v25, %v904_v26  ;;  %v7481_v42 = vcombine.low %v1028_v29, %v1032_v30  ;;  %v880_v48 = vld [vmem:[#allocation10 + $0x60] sm:$0xff] }
  0xd5   :  { %728 = vmatprep.subr.bf16.mxu0 %v7286_v1  ;;  %769 = vmatprep.subr.bf16.mxu1 %v7288_v45  ;;  %v7346_v1 = vcombine.high %v892_v33, %v896_v34  ;;  %v7474_v45 = vcombine.high %v1020_v36, %v1024_v37  ;;  %v1004_v51 = vld [vmem:[#allocation10 + $0x440] sm:$0xff] }
  0xd6   :  { %v1008_v52 = vld [vmem:[#allocation10 + $0x460] sm:$0xff] }
  0xd7   :  { %v868_v55 = vld [vmem:[#allocation10] sm:$0xff] }
  0xd8   :  { %729 = vmatpush1.bf16.msra.mxu0 %v7285_v46  ;;  %770 = vmatpush1.bf16.msra.mxu1 %v7287_v49  ;;  %v7345_v46 = vcombine.low %v892_v33, %v896_v34  ;;  %v7473_v49 = vcombine.low %v1020_v36, %v1024_v37  ;;  %v872_v56 = vld [vmem:[#allocation10 + $0x20] sm:$0xff] }
  0xd9   :  { %730 = vmatprep.subr.bf16.mxu0 %v7278_v50  ;;  %771 = vmatprep.subr.bf16.mxu1 %v7280_v53  ;;  %v7338_v50 = vcombine.high %v884_v40, %v888_v41  ;;  %v7466_v53 = vcombine.high %v1012_v43, %v1016_v44  ;;  %v996_v59 = vld [vmem:[#allocation10 + $0x400] sm:$0xff] }
  0xda   :  { %v1000_v60 = vld [vmem:[#allocation10 + $0x420] sm:$0xff] }
  0xdb   :  { %v988_v63 = vld [vmem:[#allocation10 + $0x3c0] sm:$0xff] }
  0xdc   :  { %731 = vmatpush1.bf16.msra.mxu0 %v7277_v54  ;;  %772 = vmatpush1.bf16.msra.mxu1 %v7279_v57  ;;  %v7337_v54 = vcombine.low %v884_v40, %v888_v41  ;;  %v7465_v57 = vcombine.low %v1012_v43, %v1016_v44  ;;  %v992_v0 = vld [vmem:[#allocation10 + $0x3e0] sm:$0xff] }
  0xdd   :  { %732 = vmatprep.subr.bf16.mxu0 %v7270_v58  ;;  %773 = vmatprep.subr.bf16.mxu1 %v7272_v61  ;;  %v7330_v58 = vcombine.high %v876_v47, %v880_v48  ;;  %v7458_v61 = vcombine.high %v1004_v51, %v1008_v52  ;;  %v1116_v4 = vld [vmem:[#allocation10 + $0x7c0] sm:$0xff] }
  0xde   :  { %v1120_v5 = vld [vmem:[#allocation10 + $0x7e0] sm:$0xff] }
  0xdf   :  { %v980_v8 = vld [vmem:[#allocation10 + $0x380] sm:$0xff] }
  0xe0   :  { %733 = vmatpush1.bf16.msra.mxu0 %v7269_v62  ;;  %774 = vmatpush1.bf16.msra.mxu1 %v7271_v2  ;;  %v7329_v62 = vcombine.low %v876_v47, %v880_v48  ;;  %v7457_v2 = vcombine.low %v1004_v51, %v1008_v52  ;;  %v984_v9 = vld [vmem:[#allocation10 + $0x3a0] sm:$0xff] }
  0xe1   :  { %734 = vmatprep.subr.bf16.mxu0 %v7262_v3  ;;  %775 = vmatprep.subr.bf16.mxu1 %v7264_v6  ;;  %v7322_v3 = vcombine.high %v868_v55, %v872_v56  ;;  %v7450_v6 = vcombine.high %v996_v59, %v1000_v60  ;;  %v1108_v13 = vld [vmem:[#allocation10 + $0x780] sm:$0xff] }
  0xe2   :  { %v1112_v14 = vld [vmem:[#allocation10 + $0x7a0] sm:$0xff] }
  0xe3   :  { %v972_v17 = vld [vmem:[#allocation10 + $0x340] sm:$0xff] }
  0xe4   :  { %735 = vmatpush1.bf16.msra.mxu0 %v7261_v7  ;;  %776 = vmatpush1.bf16.msra.mxu1 %v7263_v10  ;;  %v7321_v7 = vcombine.low %v868_v55, %v872_v56  ;;  %v7449_v10 = vcombine.low %v996_v59, %v1000_v60  ;;  %v976_v18 = vld [vmem:[#allocation10 + $0x360] sm:$0xff] }
  0xe5   :  { %3982 = vmatprep.subr.bf16.mxu0 %v7378_v11  ;;  %4023 = vmatprep.subr.bf16.mxu1 %v7506_v15  ;;  %v7442_v11 = vcombine.high %v988_v63, %v992_v0  ;;  %v7570_v15 = vcombine.high %v1116_v4, %v1120_v5  ;;  %v1100_v21 = vld [vmem:[#allocation10 + $0x740] sm:$0xff] }
  0xe6   :  { %v1104_v22 = vld [vmem:[#allocation10 + $0x760] sm:$0xff] }
  0xe7   :  { %753 = vmatmul.mubr.bf16.vlgmr.msra.gmra.mxu0 %v9138_v12  ;;  %794 = vmatmul.mubr.bf16.vlgmr.msra.gmra.mxu1 %v9138_v12  ;;  %v7354_v12 = vcombine.high %v900_v25, %v904_v26  ;;  %v964_v25 = vld [vmem:[#allocation10 + $0x300] sm:$0xff] }
  0xe8   :  { %3983 = vmatpush1.bf16.msra.mxu0 %v7377_v16  ;;  %4024 = vmatpush1.bf16.msra.mxu1 %v7505_v19  ;;  %v7441_v16 = vcombine.low %v988_v63, %v992_v0  ;;  %v7569_v19 = vcombine.low %v1116_v4, %v1120_v5  ;;  %v968_v26 = vld [vmem:[#allocation10 + $0x320] sm:$0xff] }
  0xe9   :  { %3984 = vmatprep.subr.bf16.mxu0 %v7370_v20  ;;  %4025 = vmatprep.subr.bf16.mxu1 %v7498_v23  ;;  %v7434_v20 = vcombine.high %v980_v8, %v984_v9  ;;  %v7562_v23 = vcombine.high %v1108_v13, %v1112_v14  ;;  %v1092_v29 = vld [vmem:[#allocation10 + $0x700] sm:$0xff] }
  0xea   :  { %v1096_v30 = vld [vmem:[#allocation10 + $0x720] sm:$0xff] }
  0xeb   :  { %v956_v33 = vld [vmem:[#allocation10 + $0x2c0] sm:$0xff]  ;;  %v7545_v44 = vcombine.low %v1092_v29, %v1096_v30 }
  0xec   :  { %3985 = vmatpush1.bf16.msra.mxu0 %v7369_v24  ;;  %4026 = vmatpush1.bf16.msra.mxu1 %v7497_v27  ;;  %v7433_v24 = vcombine.low %v980_v8, %v984_v9  ;;  %v7561_v27 = vcombine.low %v1108_v13, %v1112_v14  ;;  %v960_v34 = vld [vmem:[#allocation10 + $0x2e0] sm:$0xff]  ;;  %v278_v14 = vlaneseq }
  0xed   :  { %3986 = vmatprep.subr.bf16.mxu0 %v7362_v28  ;;  %4027 = vmatprep.subr.bf16.mxu1 %v7490_v31  ;;  %v7426_v28 = vcombine.high %v972_v17, %v976_v18  ;;  %v7554_v31 = vcombine.high %v1100_v21, %v1104_v22  ;;  %v1084_v36 = vld [vmem:[#allocation10 + $0x6c0] sm:$0xff]  ;;  %v7409_v52 = vcombine.low %v956_v33, %v960_v34 }
  0xee   :  { %v1088_v37 = vld [vmem:[#allocation10 + $0x6e0] sm:$0xff] }
  0xef   :  { %v948_v40 = vld [vmem:[#allocation10 + $0x280] sm:$0xff] }
  0xf0   :  { %3987 = vmatpush1.bf16.msra.mxu0 %v7361_v32  ;;  %4028 = vmatpush1.bf16.msra.mxu1 %v7489_v35  ;;  %v7425_v32 = vcombine.low %v972_v17, %v976_v18  ;;  %v7553_v35 = vcombine.low %v1100_v21, %v1104_v22  ;;  %v952_v41 = vld [vmem:[#allocation10 + $0x2a0] sm:$0xff]  ;;  %v9167_v17 = vld [vmem:[#allocation7] sm:$0xff] }
  0xf1   :  { %3988 = vmatprep.subr.bf16.mxu0 %v7354_v12  ;;  %4029 = vmatprep.subr.bf16.mxu1 %v7482_v38  ;;  %v7418_v12 = vcombine.high %v964_v25, %v968_v26  ;;  %v7546_v38 = vcombine.high %v1092_v29, %v1096_v30  ;;  %v9150_v43 = vld [vmem:[#allocation10 + $0xdc0] sm:$0xff]  ;;  %v7401_v60 = vcombine.low %v948_v40, %v952_v41 }
  0xf2   :  { %v1080_v47 = vld [vmem:[#allocation10 + $0x6a0] sm:$0xff] }
  0xf3   :  { %v9152_v48 = vld [vmem:[#allocation10 + $0xde0] sm:$0xff] }
  0xf4   :  { %3989 = vmatpush1.bf16.msra.mxu0 %v7353_v39  ;;  %4030 = vmatpush1.bf16.msra.mxu1 %v7481_v42  ;;  %v7417_v39 = vcombine.low %v964_v25, %v968_v26  ;;  %v9146_v42 = vld [vmem:[#allocation10 + $0x9c0] sm:$0xff]  ;;  %v7761_v51 = vcombine.low %v9150_v43, %v9152_v48  ;;  %v7762_v13 = vcombine.high %v9150_v43, %v9152_v48 }
  0xf5   :  { %3990 = vmatprep.subr.bf16.mxu0 %v7346_v1  ;;  %4031 = vmatprep.subr.bf16.mxu1 %v7474_v45  ;;  %v9148_v1 = vld [vmem:[#allocation10 + $0x9e0] sm:$0xff]  ;;  %v7410_v45 = vcombine.high %v956_v33, %v960_v34 }
  0xf6   :  { %v940_v55 = vld [vmem:[#allocation10 + $0x240] sm:$0xff] }
  0xf7   :  { %v944_v56 = vld [vmem:[#allocation10 + $0x260] sm:$0xff] }
  0xf8   :  { %3991 = vmatpush1.bf16.msra.mxu0 %v7345_v46  ;;  %4032 = vmatpush1.bf16.msra.mxu1 %v7473_v49  ;;  %v1076_v46 = vld [vmem:[#allocation10 + $0x680] sm:$0xff]  ;;  %v7538_v49 = vcombine.high %v1084_v36, %v1088_v37  ;;  %v7393_v5 = vcombine.low %v940_v55, %v944_v56 }
  0xf9   :  { %3992 = vmatprep.subr.bf16.mxu0 %v7338_v50  ;;  %4033 = vmatprep.subr.bf16.mxu1 %v7466_v53  ;;  %v7633_v50 = vcombine.low %v9146_v42, %v9148_v1  ;;  %v7537_v53 = vcombine.low %v1084_v36, %v1088_v37  ;;  %v1072_v59 = vld [vmem:[#allocation10 + $0x660] sm:$0xff] }
  0xfa   :  { %v932_v63 = vld [vmem:[#allocation10 + $0x200] sm:$0xff] }
  0xfb   :  { %v936_v0 = vld [vmem:[#allocation10 + $0x220] sm:$0xff] }
  0xfc   :  { %3993 = vmatpush1.bf16.msra.mxu0 %v7337_v54  ;;  %4034 = vmatpush1.bf16.msra.mxu1 %v7465_v57  ;;  %v7402_v54 = vcombine.high %v948_v40, %v952_v41  ;;  %v1068_v57 = vld [vmem:[#allocation10 + $0x640] sm:$0xff]  ;;  %v7385_v9 = vcombine.low %v932_v63, %v936_v0 }
  0xfd   :  { %3994 = vmatprep.subr.bf16.mxu0 %v7330_v58  ;;  %4035 = vmatprep.subr.bf16.mxu1 %v7458_v61  ;;  %v7530_v58 = vcombine.high %v1076_v46, %v1080_v47  ;;  %v7529_v61 = vcombine.low %v1076_v46, %v1080_v47  ;;  %v1064_v4 = vld [vmem:[#allocation10 + $0x620] sm:$0xff] }
  0xfe   :  { %v1152_v43 = vld [vmem:[#allocation10 + $0x8e0] sm:$0xff] }
  0xff   :  { %v1276_v48 = vld [vmem:[#allocation10 + $0xcc0] sm:$0xff] }
 0x100   :  { %3995 = vmatpush1.bf16.msra.mxu0 %v7329_v62  ;;  %4036 = vmatpush1.bf16.msra.mxu1 %v7457_v2  ;;  %v7394_v62 = vcombine.high %v940_v55, %v944_v56  ;;  %v1060_v2 = vld [vmem:[#allocation10 + $0x600] sm:$0xff] }
 0x101   :  { %3996 = vmatprep.subr.bf16.mxu0 %v7322_v3  ;;  %4037 = vmatprep.subr.bf16.mxu1 %v7450_v6  ;;  %v7522_v3 = vcombine.high %v1068_v57, %v1072_v59  ;;  %v7521_v6 = vcombine.low %v1068_v57, %v1072_v59  ;;  %v7514_v8 = vcombine.high %v1060_v2, %v1064_v4  ;;  %v1300_v56 = vld [vmem:[#allocation10 + $0xd80] sm:$0xff] }
 0x102   :  { %v1304_v57 = vld [vmem:[#allocation10 + $0xda0] sm:$0xff] }
 0x104   :  { %3997 = vmatpush1.bf16.msra.mxu0 %v7321_v7  ;;  %4038 = vmatpush1.bf16.msra.mxu1 %v7449_v10  ;;  %v7386_v7 = vcombine.high %v932_v63, %v936_v0  ;;  %v7513_v10 = vcombine.low %v1060_v2, %v1064_v4  ;;  %v7754_v63 = vcombine.high %v1300_v56, %v1304_v57  ;;  %v1164_v0 = vld [vmem:[#allocation10 + $0x940] sm:$0xff] }
 0x105   :  { %3998 = vmatprep.subr.bf16.mxu0 %v7442_v11  ;;  %4039 = vmatprep.subr.bf16.mxu1 %v7570_v15  ;;  %v7634_v11 = vcombine.high %v9146_v42, %v9148_v1  ;;  %v9162_v15 = vshrl.u32 %v278_v14, 7  ;;  %v1168_v2 = vld [vmem:[#allocation10 + $0x960] sm:$0xff] }
 0x106   :  { %v1296_v4 = vld [vmem:[#allocation10 + $0xd60] sm:$0xff]  ;;  %v7617_v14 = vcombine.low %v1164_v0, %v1168_v2 }
 0x107   :  { %v9170_v18 = vsub.s32 2, %v9162_v15  ;;  %v9178_v21 = vsub.s32 3, %v9162_v15 }
 0x108   :  { %3999 = vmatpush2.bf16.msra.mxu0 %v7441_v16  ;;  %4040 = vmatpush2.bf16.msra.mxu1 %v7569_v19  ;;  %v9165_v16 = vsub.s32 0, %v9162_v15  ;;  %v9173_v19 = vsub.s32 1, %v9162_v15 }
 0x109   :  { %4000 = vmatprep.subr.bf16.mxu0 %v7434_v20  ;;  %4041 = vmatprep.subr.bf16.mxu1 %v7562_v23  ;;  %v9175_v20 = vld [vmem:[#allocation8] sm:$0xff]  ;;  %v289_v23 = vrot.slane %v9167_v17, %v9170_v18 }
 0x10a   :  { %v281_v22 = vrot.slane %v9167_v17, %v9165_v16  ;;  %v285_v25 = vrot.slane %v9167_v17, %v9173_v19  ;;  %v819_v34 = vrot.slane %v9175_v20, %v9178_v21 }
 0x10c   :  { %4001 = vmatpush2.bf16.msra.mxu0 %v7433_v24  ;;  %4042 = vmatpush2.bf16.msra.mxu1 %v7561_v27  ;;  %v807_v24 = vrot.slane %v9175_v20, %v9165_v16  ;;  %v815_v27 = vrot.slane %v9175_v20, %v9170_v18 }
 0x10d   :  { %4002 = vmatprep.subr.bf16.mxu0 %v7426_v28  ;;  %4043 = vmatprep.subr.bf16.mxu1 %v7554_v31  ;;  %v293_v28 = vrot.slane %v9167_v17, %v9178_v21  ;;  %v811_v31 = vrot.slane %v9175_v20, %v9173_v19 }
 0x110   :  { %4003 = vmatpush2.bf16.msra.mxu0 %v7425_v32  ;;  %4044 = vmatpush2.bf16.msra.mxu1 %v7553_v35 }
 0x111   :  { %4004 = vmatprep.subr.bf16.mxu0 %v7418_v12  ;;  %4045 = vmatprep.subr.bf16.mxu1 %v7546_v38 }
 0x114   :  { %4005 = vmatpush2.bf16.msra.mxu0 %v7417_v39  ;;  %4046 = vmatpush2.bf16.msra.mxu1 %v7545_v44 }
 0x115   :  { %4006 = vmatprep.subr.bf16.mxu0 %v7410_v45  ;;  %4047 = vmatprep.subr.bf16.mxu1 %v7538_v49 }
 0x118   :  { %4007 = vmatpush2.bf16.msra.mxu0 %v7409_v52  ;;  %4048 = vmatpush2.bf16.msra.mxu1 %v7537_v53  ;;  %v1172_v53 = vld [vmem:[#allocation10 + $0x980] sm:$0xff] }
 0x119   :  { %4008 = vmatprep.subr.bf16.mxu0 %v7402_v54  ;;  %4049 = vmatprep.subr.bf16.mxu1 %v7530_v58  ;;  %v1176_v54 = vld [vmem:[#allocation10 + $0x9a0] sm:$0xff] }
 0x11c   :  { %4009 = vmatpush2.bf16.msra.mxu0 %v7401_v60  ;;  %4050 = vmatpush2.bf16.msra.mxu1 %v7529_v61  ;;  %v7626_v61 = vcombine.high %v1172_v53, %v1176_v54 }
 0x11d   :  { %4010 = vmatprep.subr.bf16.mxu0 %v7394_v62  ;;  %4051 = vmatprep.subr.bf16.mxu1 %v7522_v3  ;;  %v1292_v3 = vld [vmem:[#allocation10 + $0xd40] sm:$0xff] }
 0x11e   :  { %v7745_v42 = vcombine.low %v1292_v3, %v1296_v4 }
 0x120   :  { %4011 = vmatpush2.bf16.msra.mxu0 %v7393_v5  ;;  %4052 = vmatpush2.bf16.msra.mxu1 %v7521_v6  ;;  %v7625_v5 = vcombine.low %v1172_v53, %v1176_v54  ;;  %v7753_v6 = vcombine.low %v1300_v56, %v1304_v57  ;;  %v1256_v53 = vld [vmem:[#allocation10 + $0xc20] sm:$0xff] }
 0x121   :  { %4012 = vmatprep.subr.bf16.mxu0 %v7386_v7  ;;  %4053 = vmatprep.subr.bf16.mxu1 %v7514_v8  ;;  %v7618_v7 = vcombine.high %v1164_v0, %v1168_v2  ;;  %v7746_v8 = vcombine.high %v1292_v3, %v1296_v4 }
 0x124   :  { %4013 = vmatpush2.bf16.msra.mxu0 %v7385_v9  ;;  %4054 = vmatpush2.bf16.msra.mxu1 %v7513_v10  ;;  %v1156_v9 = vld [vmem:[#allocation10 + $0x900] sm:$0xff] }
 0x125   :  { %4064 = vmatprep.subr.bf16.mxu0 %v7634_v11  ;;  %4105 = vmatprep.subr.bf16.mxu1 %v7762_v13  ;;  %v1160_v10 = vld [vmem:[#allocation10 + $0x920] sm:$0xff] }
 0x126   :  { %v1284_v11 = vld [vmem:[#allocation10 + $0xd00] sm:$0xff]  ;;  %v7610_v1 = vcombine.high %v1156_v9, %v1160_v10 }
 0x127   :  { %v1288_v13 = vld [vmem:[#allocation10 + $0xd20] sm:$0xff] }
 0x187   :  { %v672_v26 = vpop.f32.mrf.mxu0  ;;  %v713_v30 = vpop.f32.mrf.mxu1 }
 0x188   :  { %v673_v29 = vadd.f32 %v672_v26, %v281_v22  ;;  %v714_v32 = vadd.f32 %v713_v30, %v289_v23  ;;  %v1148_v22 = vld [vmem:[#allocation10 + $0x8c0] sm:$0xff]  ;;  %v7609_v23 = vcombine.low %v1156_v9, %v1160_v10 }
 0x189   :  { %v674_v33 = vpop.f32.mrf.mxu0  ;;  %v715_v36 = vpop.f32.mrf.mxu1  ;;  %v1272_v30 = vld [vmem:[#allocation10 + $0xca0] sm:$0xff] }
 0x18a   :  { %v844_v35 = vmul.f32 %v807_v24, %v673_v29  ;;  %v675_v12 = vadd.f32 %v674_v33, %v285_v25  ;;  %v846_v37 = vmul.f32 %v815_v27, %v714_v32  ;;  %v716_v38 = vadd.f32 %v715_v36, %v293_v28  ;;  %v1140_v27 = vld [vmem:[#allocation10 + $0x880] sm:$0xff] }
 0x18b   :  { %v676_v39 = vpop.f32.mrf.mxu0  ;;  %v717_v41 = vpop.f32.mrf.mxu1  ;;  %v7737_v24 = vcombine.low %v1284_v11, %v1288_v13  ;;  %v7602_v25 = vcombine.high %v1148_v22, %v1152_v43  ;;  %v1144_v28 = vld [vmem:[#allocation10 + $0x8a0] sm:$0xff]  ;;  %v9215_v36 = vsub.s32 5, %v9162_v15 }
 0x18c   :  { %v845_v40 = vmul.f32 %v811_v31, %v675_v12  ;;  %v852_v44 = vmax.f32 %v673_v29, %v844_v35  ;;  %v847_v45 = vmul.f32 %v819_v34, %v716_v38  ;;  %v854_v47 = vmax.f32 %v714_v32, %v846_v37  ;;  %v1268_v29 = vld [vmem:[#allocation10 + $0xc80] sm:$0xff] }
 0x18d   :  { %v677_v46 = vpop.f32.mrf.mxu0  ;;  %v718_v52 = vpop.f32.mrf.mxu1  ;;  %v7601_v31 = vcombine.low %v1148_v22, %v1152_v43  ;;  %v7594_v33 = vcombine.high %v1140_v27, %v1144_v28  ;;  %v7722_v34 = vcombine.high %v1268_v29, %v1272_v30  ;;  %v1132_v35 = vld [vmem:[#allocation10 + $0x840] sm:$0xff]  ;;  %v9218_v39 = vsub.s32 7, %v9162_v15 }
 0x18e   :  { %v853_v49 = vmax.f32 %v675_v12, %v845_v40  ;;  %v855_v55 = vmax.f32 %v716_v38, %v847_v45  ;;  %v9198_v59 = vpack.c.bf16 %v852_v44, %v852_v44  ;;  %v9202_v62 = vpack.c.bf16 %v854_v47, %v854_v47  ;;  %v1136_v12 = vld [vmem:[#allocation10 + $0x860] sm:$0xff] }
 0x18f   :  { %v1260_v37 = vld [vmem:[#allocation10 + $0xc40] sm:$0xff]  ;;  %v7593_v40 = vcombine.low %v1140_v27, %v1144_v28  ;;  %v7721_v41 = vcombine.low %v1268_v29, %v1272_v30  ;;  %v7586_v44 = vcombine.high %v1132_v35, %v1136_v12  ;;  %v7585_v56 = vcombine.low %v1132_v35, %v1136_v12 }
 0x190   :  { %v9196_v58 = vpack.c.bf16 %v853_v49, %v853_v49  ;;  %v9200_v60 = vpack.c.bf16 %v855_v55, %v855_v55  ;;  %v1264_v38 = vld [vmem:[#allocation10 + $0xc60] sm:$0xff]  ;;  %v301_v49 = vrot.slane %v9167_v17, %v9215_v36  ;;  %v309_v55 = vrot.slane %v9167_v17, %v9218_v39 }
 0x191   :  { %v7714_v45 = vcombine.high %v1260_v37, %v1264_v38  ;;  %v1124_v46 = vld [vmem:[#allocation10 + $0x800] sm:$0xff]  ;;  %v827_v57 = vrot.slane %v9175_v20, %v9215_v36  ;;  %v835_v3 = vrot.slane %v9175_v20, %v9218_v39 }
 0x192   :  { %4014 = vmatprep.mubr.bf16.mxu0 %v9196_v58  ;;  %4055 = vmatprep.mubr.bf16.mxu1 %v9200_v60  ;;  %v1128_v47 = vld [vmem:[#allocation10 + $0x820] sm:$0xff] }
 0x193   :  { %4015 = vmatmul.mubr.bf16.vlgmr.msra.gmra.mxu0 %v9198_v59  ;;  %4056 = vmatmul.mubr.bf16.vlgmr.msra.gmra.mxu1 %v9202_v62  ;;  %v1252_v52 = vld [vmem:[#allocation10 + $0xc00] sm:$0xff]  ;;  %v7578_v0 = vcombine.high %v1124_v46, %v1128_v47 }
 0x194   :  { %4065 = vmatpush1.bf16.msra.mxu0 %v7633_v50  ;;  %4106 = vmatpush1.bf16.msra.mxu1 %v7761_v51  ;;  %v7738_v50 = vcombine.high %v1284_v11, %v1288_v13  ;;  %v1280_v51 = vld [vmem:[#allocation10 + $0xce0] sm:$0xff]  ;;  %v7706_v4 = vcombine.high %v1252_v52, %v1256_v53 }
 0x195   :  { %4066 = vmatprep.subr.bf16.mxu0 %v7626_v61  ;;  %4107 = vmatprep.subr.bf16.mxu1 %v7754_v63  ;;  %v7730_v26 = vcombine.high %v1276_v48, %v1280_v51  ;;  %v7729_v32 = vcombine.low %v1276_v48, %v1280_v51  ;;  %v7713_v63 = vcombine.low %v1260_v37, %v1264_v38  ;;  %v1372_v9 = vld [vmem:[#allocation10 + $0xfc0] sm:$0xff] }
 0x196   :  { %v1376_v10 = vld [vmem:[#allocation10 + $0xfe0] sm:$0xff] }
 0x197   :  { %v7826_v51 = vcombine.high %v1372_v9, %v1376_v10  ;;  %v1364_v27 = vld [vmem:[#allocation10 + $0xf80] sm:$0xff] }
 0x198   :  { %4067 = vmatpush1.bf16.msra.mxu0 %v7625_v5  ;;  %4108 = vmatpush1.bf16.msra.mxu1 %v7753_v6  ;;  %v1244_v5 = vld [vmem:[#allocation10 + $0xbc0] sm:$0xff] }
 0x199   :  { %4068 = vmatprep.subr.bf16.mxu0 %v7618_v7  ;;  %4109 = vmatprep.subr.bf16.mxu1 %v7746_v8  ;;  %v1248_v6 = vld [vmem:[#allocation10 + $0xbe0] sm:$0xff] }
 0x19a   :  { %v7698_v22 = vcombine.high %v1244_v5, %v1248_v6  ;;  %v1368_v28 = vld [vmem:[#allocation10 + $0xfa0] sm:$0xff]  ;;  %v7697_v30 = vcombine.low %v1244_v5, %v1248_v6 }
 0x19b   :  { %v7818_v35 = vcombine.high %v1364_v27, %v1368_v28  ;;  %v1228_v12 = vld [vmem:[#allocation10 + $0xb40] sm:$0xff] }
 0x19c   :  { %4069 = vmatpush1.bf16.msra.mxu0 %v7617_v14  ;;  %4110 = vmatpush1.bf16.msra.mxu1 %v7745_v42  ;;  %v7577_v14 = vcombine.low %v1124_v46, %v1128_v47  ;;  %v1232_v37 = vld [vmem:[#allocation10 + $0xb60] sm:$0xff] }
 0x19d   :  { %4070 = vmatprep.subr.bf16.mxu0 %v7610_v1  ;;  %4111 = vmatprep.subr.bf16.mxu1 %v7738_v50  ;;  %v7705_v50 = vcombine.low %v1252_v52, %v1256_v53  ;;  %v1356_v38 = vld [vmem:[#allocation10 + $0xf40] sm:$0xff] }
 0x19e   :  { %v1220_v47 = vld [vmem:[#allocation10 + $0xb00] sm:$0xff] }
 0x19f   :  { %v1348_v52 = vld [vmem:[#allocation10 + $0xf00] sm:$0xff] }
 0x1a0   :  { %4071 = vmatpush1.bf16.msra.mxu0 %v7609_v23  ;;  %4112 = vmatpush1.bf16.msra.mxu1 %v7737_v24  ;;  %v1236_v23 = vld [vmem:[#allocation10 + $0xb80] sm:$0xff] }
 0x1a1   :  { %4072 = vmatprep.subr.bf16.mxu0 %v7602_v25  ;;  %4113 = vmatprep.subr.bf16.mxu1 %v7730_v26  ;;  %v1240_v24 = vld [vmem:[#allocation10 + $0xba0] sm:$0xff] }
 0x1a2   :  { %v1352_v53 = vld [vmem:[#allocation10 + $0xf20] sm:$0xff] }
 0x1a3   :  { %v7801_v6 = vcombine.low %v1348_v52, %v1352_v53 }
 0x1a4   :  { %4073 = vmatpush1.bf16.msra.mxu0 %v7601_v31  ;;  %4114 = vmatpush1.bf16.msra.mxu1 %v7729_v32  ;;  %v7825_v32 = vcombine.low %v1372_v9, %v1376_v10  ;;  %v9242_v10 = vsub.s32 6, %v9162_v15 }
 0x1a5   :  { %4074 = vmatprep.subr.bf16.mxu0 %v7594_v33  ;;  %4115 = vmatprep.subr.bf16.mxu1 %v7722_v34  ;;  %v7690_v33 = vcombine.high %v1236_v23, %v1240_v24 }
 0x1a7   :  { %v9222_v54 = vpop.f32.mrf.mxu0  ;;  %v9228_v61 = vpop.f32.mrf.mxu1 }
 0x1a8   :  { %4075 = vmatpush1.bf16.msra.mxu0 %v7593_v40  ;;  %4116 = vmatpush1.bf16.msra.mxu1 %v7721_v41  ;;  %v1360_v40 = vld [vmem:[#allocation10 + $0xf60] sm:$0xff]  ;;  %v7689_v41 = vcombine.low %v1236_v23, %v1240_v24 }
 0x1a9   :  { %4076 = vmatprep.subr.bf16.mxu0 %v7586_v44  ;;  %v756_v2 = vpop.f32.mrf.mxu0  ;;  %4117 = vmatprep.subr.bf16.mxu1 %v7714_v45  ;;  %v797_v8 = vpop.f32.mrf.mxu1  ;;  %v7817_v44 = vcombine.low %v1364_v27, %v1368_v28  ;;  %v7682_v45 = vcombine.high %v1228_v12, %v1232_v37  ;;  %v7810_v46 = vcombine.high %v1356_v38, %v1360_v40  ;;  %v1200_v23 = vld [vmem:[#allocation10 + $0xa60] sm:$0xff] }
 0x1aa   :  { %v757_v7 = vadd.f32 %v756_v2, %v301_v49  ;;  %v798_v13 = vadd.f32 %v797_v8, %v309_v55  ;;  %v1224_v49 = vld [vmem:[#allocation10 + $0xb20] sm:$0xff]  ;;  %v7681_v55 = vcombine.low %v1228_v12, %v1232_v37 }
 0x1ab   :  { %v758_v11 = vpop.f32.mrf.mxu0  ;;  %v799_v1 = vpop.f32.mrf.mxu1  ;;  %v1216_v2 = vld [vmem:[#allocation10 + $0xae0] sm:$0xff]  ;;  %v7673_v5 = vcombine.low %v1220_v47, %v1224_v49 }
 0x1ac   :  { %4077 = vmatpush1.bf16.msra.mxu0 %v7585_v56  ;;  %v849_v42 = vmul.f32 %v827_v57, %v757_v7  ;;  %4118 = vmatpush1.bf16.msra.mxu1 %v7713_v63  ;;  %v851_v43 = vmul.f32 %v835_v3, %v798_v13  ;;  %v7809_v56 = vcombine.low %v1356_v38, %v1360_v40  ;;  %v1340_v3 = vld [vmem:[#allocation10 + $0xec0] sm:$0xff] }
 0x1ad   :  { %4078 = vmatprep.subr.bf16.mxu0 %v7578_v0  ;;  %v759_v48 = vpop.f32.mrf.mxu0  ;;  %4119 = vmatprep.subr.bf16.mxu1 %v7706_v4  ;;  %v800_v26 = vpop.f32.mrf.mxu1  ;;  %v7674_v57 = vcombine.high %v1220_v47, %v1224_v49  ;;  %v7802_v63 = vcombine.high %v1348_v52, %v1352_v53  ;;  %v1212_v0 = vld [vmem:[#allocation10 + $0xac0] sm:$0xff]  ;;  %v929_v47 = vld [vmem:[#allocation10 + $0x1e8] sm:$0xff] }
 0x1ae   :  { %v857_v25 = vmax.f32 %v757_v7, %v849_v42  ;;  %v859_v29 = vmax.f32 %v798_v13, %v851_v43  ;;  %v1344_v4 = vld [vmem:[#allocation10 + $0xee0] sm:$0xff]  ;;  %v9239_v7 = vsub.s32 4, %v9162_v15  ;;  %v7666_v8 = vcombine.high %v1212_v0, %v1216_v2  ;;  %v1053_v49 = vld [vmem:[#allocation10 + $0x5c8] sm:$0xff] }
 0x1af   :  { %v7794_v9 = vcombine.high %v1340_v3, %v1344_v4  ;;  %v1204_v11 = vld [vmem:[#allocation10 + $0xa80] sm:$0xff]  ;;  %v7665_v1 = vcombine.low %v1212_v0, %v1216_v2  ;;  %v305_v48 = vrot.slane %v9167_v17, %v9242_v10  ;;  %v917_v0 = vld [vmem:[#allocation10 + $0x188] sm:$0xff] }
 0x1b0   :  { %4079 = vmatpush1.bf16.msra.mxu0 %v7577_v14  ;;  %v9232_v31 = vpack.c.bf16 %v857_v25, %v857_v25  ;;  %4120 = vmatpush1.bf16.msra.mxu1 %v7705_v50  ;;  %v9234_v34 = vpack.c.bf16 %v859_v29, %v859_v29  ;;  %v1208_v13 = vld [vmem:[#allocation10 + $0xaa0] sm:$0xff]  ;;  %v297_v50 = vrot.slane %v9167_v17, %v9239_v7  ;;  %v921_v2 = vld [vmem:[#allocation10 + $0x1a8] sm:$0xff] }
 0x1b1   :  { %4080 = vmatprep.subr.bf16.mxu0 %v7698_v22  ;;  %4121 = vmatprep.subr.bf16.mxu1 %v7826_v51  ;;  %v1332_v14 = vld [vmem:[#allocation10 + $0xe80] sm:$0xff]  ;;  %v7793_v22 = vcombine.low %v1340_v3, %v1344_v4  ;;  %v7658_v43 = vcombine.high %v1204_v11, %v1208_v13  ;;  %v823_v26 = vrot.slane %v9175_v20, %v9239_v7  ;;  %v1045_v4 = vld [vmem:[#allocation10 + $0x588] sm:$0xff] }
 0x1b2   :  { %4096 = vmatprep.mubr.bf16.mxu0 %v9232_v31  ;;  %4137 = vmatprep.mubr.bf16.mxu1 %v9234_v34  ;;  %v1336_v42 = vld [vmem:[#allocation10 + $0xea0] sm:$0xff]  ;;  %v7657_v27 = vcombine.low %v1204_v11, %v1208_v13  ;;  %v755_v28 = vadd.f32 %v9222_v54, %v297_v50  ;;  %v831_v17 = vrot.slane %v9175_v20, %v9242_v10  ;;  %v1057_v20 = vld [vmem:[#allocation10 + $0x5e8] sm:$0xff] }
 0x1b3   :  { %v7786_v51 = vcombine.high %v1332_v14, %v1336_v42  ;;  %v1196_v15 = vld [vmem:[#allocation10 + $0xa40] sm:$0xff]  ;;  %v7785_v29 = vcombine.low %v1332_v14, %v1336_v42  ;;  %v7372_v11 = vcombine.high %v917_v0, %v921_v2  ;;  %v909_v13 = vld [vmem:[#allocation10 + $0x148] sm:$0xff] }
 0x1b4   :  { %4081 = vmatpush2.bf16.msra.mxu0 %v7697_v30  ;;  %4122 = vmatpush2.bf16.msra.mxu1 %v7825_v32  ;;  %v1324_v24 = vld [vmem:[#allocation10 + $0xe40] sm:$0xff]  ;;  %v7650_v30 = vcombine.high %v1196_v15, %v1200_v23  ;;  %v796_v32 = vadd.f32 %v9228_v61, %v305_v48  ;;  %v7649_v40 = vcombine.low %v1196_v15, %v1200_v23  ;;  %v925_v61 = vld [vmem:[#allocation10 + $0x1c8] sm:$0xff] }
 0x1b5   :  { %4082 = vmatprep.subr.bf16.mxu0 %v7690_v33  ;;  %4123 = vmatprep.subr.bf16.mxu1 %v7818_v35  ;;  %v1328_v25 = vld [vmem:[#allocation10 + $0xe60] sm:$0xff]  ;;  %v7379_v3 = vcombine.low %v925_v61, %v929_v47  ;;  %v913_v14 = vld [vmem:[#allocation10 + $0x168] sm:$0xff] }
 0x1b6   :  { %v7778_v33 = vcombine.high %v1324_v24, %v1328_v25  ;;  %v1188_v35 = vld [vmem:[#allocation10 + $0xa00] sm:$0xff]  ;;  %v7777_v54 = vcombine.low %v1324_v24, %v1328_v25  ;;  %v1041_v50 = vld [vmem:[#allocation10 + $0x568] sm:$0xff]  ;;  %v7364_v48 = vcombine.high %v909_v13, %v913_v14 }
 0x1b7   :  { %v1192_v12 = vld [vmem:[#allocation10 + $0xa20] sm:$0xff]  ;;  %v901_v15 = vld [vmem:[#allocation10 + $0x108] sm:$0xff] }
 0x1b8   :  { %4083 = vmatpush2.bf16.msra.mxu0 %v7689_v41  ;;  %4124 = vmatpush2.bf16.msra.mxu1 %v7817_v44  ;;  %v1316_v37 = vld [vmem:[#allocation10 + $0xe00] sm:$0xff]  ;;  %v848_v41 = vmul.f32 %v823_v26, %v755_v28  ;;  %v7642_v44 = vcombine.high %v1188_v35, %v1192_v12  ;;  %v7641_v52 = vcombine.low %v1188_v35, %v1192_v12  ;;  %v905_v23 = vld [vmem:[#allocation10 + $0x128] sm:$0xff] }
 0x1b9   :  { %4084 = vmatprep.subr.bf16.mxu0 %v7682_v45  ;;  %4125 = vmatprep.subr.bf16.mxu1 %v7810_v46  ;;  %v1320_v38 = vld [vmem:[#allocation10 + $0xe20] sm:$0xff]  ;;  %v850_v45 = vmul.f32 %v831_v17, %v796_v32  ;;  %v1029_v24 = vld [vmem:[#allocation10 + $0x508] sm:$0xff]  ;;  %v7363_v26 = vcombine.low %v909_v13, %v913_v14  ;;  %v7355_v35 = vcombine.low %v901_v15, %v905_v23 }
 0x1ba   :  { %v7770_v46 = vcombine.high %v1316_v37, %v1320_v38  ;;  %v856_v53 = vmax.f32 %v755_v28, %v848_v41  ;;  %v1033_v25 = vld [vmem:[#allocation10 + $0x528] sm:$0xff]  ;;  %v7356_v28 = vcombine.high %v901_v15, %v905_v23 }
 0x1bb   :  { %v1021_v17 = vld [vmem:[#allocation10 + $0x4c8] sm:$0xff]  ;;  %v7483_v12 = vcombine.low %v1029_v24, %v1033_v25 }
 0x1bc   :  { %4085 = vmatpush2.bf16.msra.mxu0 %v7681_v55  ;;  %4126 = vmatpush2.bf16.msra.mxu1 %v7809_v56  ;;  %v7769_v55 = vcombine.low %v1316_v37, %v1320_v38  ;;  %v7380_v56 = vcombine.high %v925_v61, %v929_v47  ;;  %v889_v41 = vld [vmem:[#allocation10 + $0xa8] sm:$0xff] }
 0x1bd   :  { %4086 = vmatprep.subr.bf16.mxu0 %v7674_v57  ;;  %4127 = vmatprep.subr.bf16.mxu1 %v7802_v63  ;;  %v858_v57 = vmax.f32 %v796_v32, %v850_v45  ;;  %v7508_v63 = vcombine.high %v1053_v49, %v1057_v20  ;;  %v897_v32 = vld [vmem:[#allocation10 + $0xe8] sm:$0xff] }
 0x1be   :  { %v989_v14 = vld [vmem:[#allocation10 + $0x3c8] sm:$0xff] }
 0x1bf   :  { %v981_v15 = vld [vmem:[#allocation10 + $0x388] sm:$0xff] }
 0x1c0   :  { %4087 = vmatpush2.bf16.msra.mxu0 %v7673_v5  ;;  %4128 = vmatpush2.bf16.msra.mxu1 %v7801_v6  ;;  %v1049_v5 = vld [vmem:[#allocation10 + $0x5a8] sm:$0xff]  ;;  %v9254_v6 = vpack.c.bf16 %v856_v53, %v856_v53 }
 0x1c1   :  { %4088 = vmatprep.subr.bf16.mxu0 %v7666_v8  ;;  %4129 = vmatprep.subr.bf16.mxu1 %v7794_v9  ;;  %v7507_v8 = vcombine.low %v1053_v49, %v1057_v20  ;;  %v9256_v9 = vpack.c.bf16 %v858_v57, %v858_v57  ;;  %v7500_v42 = vcombine.high %v1045_v4, %v1049_v5  ;;  %v877_v49 = vld [vmem:[#allocation10 + $0x48] sm:$0xff] }
 0x1c2   :  { %v881_v20 = vld [vmem:[#allocation10 + $0x68] sm:$0xff] }
 0x1c3   :  { %v1009_v53 = vld [vmem:[#allocation10 + $0x468] sm:$0xff]  ;;  %v7332_v57 = vcombine.high %v877_v49, %v881_v20 }
 0x1c4   :  { %4089 = vmatpush2.bf16.msra.mxu0 %v7665_v1  ;;  %4130 = vmatpush2.bf16.msra.mxu1 %v7793_v22  ;;  %v1037_v1 = vld [vmem:[#allocation10 + $0x548] sm:$0xff]  ;;  %v7371_v22 = vcombine.low %v917_v0, %v921_v2 }
 0x1c5   :  { %4090 = vmatprep.subr.bf16.mxu0 %v7658_v43  ;;  %4131 = vmatprep.subr.bf16.mxu1 %v7786_v51  ;;  %v7499_v43 = vcombine.low %v1045_v4, %v1049_v5  ;;  %v7492_v51 = vcombine.high %v1037_v1, %v1041_v50  ;;  %v869_v0 = vld [vmem:[#allocation10 + $0x8] sm:$0xff]  ;;  %v7331_v5 = vcombine.low %v877_v49, %v881_v20 }
 0x1c6   :  { %v873_v2 = vld [vmem:[#allocation10 + $0x28] sm:$0xff] }
 0x1c7   :  { %v1001_v4 = vld [vmem:[#allocation10 + $0x428] sm:$0xff] }
 0x1c8   :  { %4091 = vmatpush2.bf16.msra.mxu0 %v7657_v27  ;;  %4132 = vmatpush2.bf16.msra.mxu1 %v7785_v29  ;;  %v7491_v27 = vcombine.low %v1037_v1, %v1041_v50  ;;  %v7484_v29 = vcombine.high %v1029_v24, %v1033_v25  ;;  %v1117_v1 = vld [vmem:[#allocation10 + $0x7c8] sm:$0xff] }
 0x1c9   :  { %4092 = vmatprep.subr.bf16.mxu0 %v7650_v30  ;;  %4133 = vmatprep.subr.bf16.mxu1 %v7778_v33  ;;  %v893_v30 = vld [vmem:[#allocation10 + $0xc8] sm:$0xff] }
 0x1ca   :  { %v1025_v33 = vld [vmem:[#allocation10 + $0x4e8] sm:$0xff]  ;;  %v7348_v37 = vcombine.high %v893_v30, %v897_v32  ;;  %v7347_v45 = vcombine.low %v893_v30, %v897_v32 }
 0x1cb   :  { %v7476_v38 = vcombine.high %v1021_v17, %v1025_v33  ;;  %v1121_v50 = vld [vmem:[#allocation10 + $0x7e8] sm:$0xff] }
 0x1cc   :  { %4093 = vmatpush2.bf16.msra.mxu0 %v7649_v40  ;;  %4134 = vmatpush2.bf16.msra.mxu1 %v7777_v54  ;;  %v885_v40 = vld [vmem:[#allocation10 + $0x88] sm:$0xff] }
 0x1cd   :  { %4094 = vmatprep.subr.bf16.mxu0 %v7642_v44  ;;  %4135 = vmatprep.subr.bf16.mxu1 %v7770_v46  ;;  %v1013_v54 = vld [vmem:[#allocation10 + $0x488] sm:$0xff]  ;;  %v7475_v46 = vcombine.low %v1021_v17, %v1025_v33  ;;  %v7340_v61 = vcombine.high %v885_v40, %v889_v41 }
 0x1ce   :  { %v1017_v44 = vld [vmem:[#allocation10 + $0x4a8] sm:$0xff] }
 0x1cf   :  { %v7468_v47 = vcombine.high %v1013_v54, %v1017_v44  ;;  %v985_v23 = vld [vmem:[#allocation10 + $0x3a8] sm:$0xff] }
 0x1d0   :  { %4095 = vmatpush2.bf16.msra.mxu0 %v7641_v52  ;;  %4136 = vmatpush2.bf16.msra.mxu1 %v7769_v55  ;;  %v1005_v52 = vld [vmem:[#allocation10 + $0x448] sm:$0xff]  ;;  %v7339_v55 = vcombine.low %v885_v40, %v889_v41 }
 0x1d1   :  { %4146 = vmatprep.subr.bf16.mxu0 %v7380_v56  ;;  %4187 = vmatprep.subr.bf16.mxu1 %v7508_v63  ;;  %v7467_v56 = vcombine.low %v1013_v54, %v1017_v44  ;;  %v7460_v63 = vcombine.high %v1005_v52, %v1009_v53  ;;  %v1109_v24 = vld [vmem:[#allocation10 + $0x788] sm:$0xff] }
 0x1d2   :  { %v1113_v25 = vld [vmem:[#allocation10 + $0x7a8] sm:$0xff] }
 0x1d3   :  { %4097 = vmatmul.mubr.bf16.vlgmr.msra.gmra.mxu0 %v9254_v6  ;;  %4138 = vmatmul.mubr.bf16.vlgmr.msra.gmra.mxu1 %v9256_v9  ;;  %v973_v30 = vld [vmem:[#allocation10 + $0x348] sm:$0xff] }
 0x1d4   :  { %4147 = vmatpush1.bf16.msra.mxu0 %v7379_v3  ;;  %4178 = vmatprep.mubr.bf16.mxu0 %v9196_v58  ;;  %v997_v3 = vld [vmem:[#allocation10 + $0x408] sm:$0xff] }
 0x1d5   :  { %4188 = vmatpush1.bf16.msra.mxu1 %v7507_v8  ;;  %4219 = vmatprep.mubr.bf16.mxu1 %v9200_v60  ;;  %v7459_v8 = vcombine.low %v1005_v52, %v1009_v53  ;;  %v7452_v13 = vcombine.high %v997_v3, %v1001_v4  ;;  %v977_v32 = vld [vmem:[#allocation10 + $0x368] sm:$0xff] }
 0x1d6   :  { %4148 = vmatprep.subr.bf16.mxu0 %v7372_v11  ;;  %4189 = vmatprep.subr.bf16.mxu1 %v7500_v42  ;;  %v7324_v11 = vcombine.high %v869_v0, %v873_v2  ;;  %v993_v42 = vld [vmem:[#allocation10 + $0x3e8] sm:$0xff] }
 0x1d7   :  { %v1101_v17 = vld [vmem:[#allocation10 + $0x748] sm:$0xff] }
 0x1d8   :  { %4149 = vmatpush1.bf16.msra.mxu0 %v7371_v22  ;;  %v7323_v22 = vcombine.low %v869_v0, %v873_v2  ;;  %v1105_v33 = vld [vmem:[#allocation10 + $0x768] sm:$0xff] }
 0x1d9   :  { %4190 = vmatpush1.bf16.msra.mxu1 %v7499_v43  ;;  %4150 = vmatprep.subr.bf16.mxu0 %v7364_v48  ;;  %v7451_v43 = vcombine.low %v997_v3, %v1001_v4  ;;  %v7444_v48 = vcombine.high %v989_v14, %v993_v42  ;;  %v965_v40 = vld [vmem:[#allocation10 + $0x308] sm:$0xff] }
 0x1da   :  { %4191 = vmatprep.subr.bf16.mxu1 %v7492_v51  ;;  %v7572_v51 = vcombine.high %v1117_v1, %v1121_v50  ;;  %v969_v41 = vld [vmem:[#allocation10 + $0x328] sm:$0xff] }
 0x1db   :  { %v1093_v54 = vld [vmem:[#allocation10 + $0x708] sm:$0xff] }
 0x1dc   :  { %4151 = vmatpush1.bf16.msra.mxu0 %v7363_v26  ;;  %v7443_v26 = vcombine.low %v989_v14, %v993_v42  ;;  %v1097_v44 = vld [vmem:[#allocation10 + $0x728] sm:$0xff] }
 0x1dd   :  { %4192 = vmatpush1.bf16.msra.mxu1 %v7491_v27  ;;  %4152 = vmatprep.subr.bf16.mxu0 %v7356_v28  ;;  %v7571_v27 = vcombine.low %v1117_v1, %v1121_v50  ;;  %v7436_v28 = vcombine.high %v981_v15, %v985_v23  ;;  %v957_v49 = vld [vmem:[#allocation10 + $0x2c8] sm:$0xff] }
 0x1de   :  { %4193 = vmatprep.subr.bf16.mxu1 %v7484_v29  ;;  %v7564_v29 = vcombine.high %v1109_v24, %v1113_v25  ;;  %v961_v20 = vld [vmem:[#allocation10 + $0x2e8] sm:$0xff] }
 0x1df   :  { %v1085_v52 = vld [vmem:[#allocation10 + $0x6c8] sm:$0xff] }
 0x1e0   :  { %4153 = vmatpush1.bf16.msra.mxu0 %v7355_v35  ;;  %v7435_v35 = vcombine.low %v981_v15, %v985_v23  ;;  %v1089_v53 = vld [vmem:[#allocation10 + $0x6e8] sm:$0xff] }
 0x1e1   :  { %4194 = vmatpush1.bf16.msra.mxu1 %v7483_v12  ;;  %4154 = vmatprep.subr.bf16.mxu0 %v7348_v37  ;;  %v7563_v12 = vcombine.low %v1109_v24, %v1113_v25  ;;  %v7428_v37 = vcombine.high %v973_v30, %v977_v32  ;;  %v949_v0 = vld [vmem:[#allocation10 + $0x288] sm:$0xff] }
 0x1e2   :  { %4195 = vmatprep.subr.bf16.mxu1 %v7476_v38  ;;  %v7556_v38 = vcombine.high %v1101_v17, %v1105_v33  ;;  %v953_v2 = vld [vmem:[#allocation10 + $0x2a8] sm:$0xff] }
 0x1e3   :  { %v1077_v3 = vld [vmem:[#allocation10 + $0x688] sm:$0xff] }
 0x1e4   :  { %4155 = vmatpush1.bf16.msra.mxu0 %v7347_v45  ;;  %v7427_v45 = vcombine.low %v973_v30, %v977_v32  ;;  %v1081_v4 = vld [vmem:[#allocation10 + $0x6a8] sm:$0xff] }
 0x1e5   :  { %4196 = vmatpush1.bf16.msra.mxu1 %v7475_v46  ;;  %4156 = vmatprep.subr.bf16.mxu0 %v7340_v61  ;;  %v7555_v46 = vcombine.low %v1101_v17, %v1105_v33  ;;  %v7420_v61 = vcombine.high %v965_v40, %v969_v41  ;;  %v941_v14 = vld [vmem:[#allocation10 + $0x248] sm:$0xff] }
 0x1e6   :  { %4197 = vmatprep.subr.bf16.mxu1 %v7468_v47  ;;  %v7548_v47 = vcombine.high %v1093_v54, %v1097_v44  ;;  %v945_v42 = vld [vmem:[#allocation10 + $0x268] sm:$0xff] }
 0x1e7   :  { %v1069_v1 = vld [vmem:[#allocation10 + $0x648] sm:$0xff] }
 0x1e8   :  { %4157 = vmatpush1.bf16.msra.mxu0 %v7339_v55  ;;  %v7419_v55 = vcombine.low %v965_v40, %v969_v41  ;;  %v1073_v50 = vld [vmem:[#allocation10 + $0x668] sm:$0xff] }
 0x1e9   :  { %4198 = vmatpush1.bf16.msra.mxu1 %v7467_v56  ;;  %4158 = vmatprep.subr.bf16.mxu0 %v7332_v57  ;;  %v7547_v56 = vcombine.low %v1093_v54, %v1097_v44  ;;  %v7412_v57 = vcombine.high %v957_v49, %v961_v20  ;;  %v933_v15 = vld [vmem:[#allocation10 + $0x208] sm:$0xff] }
 0x1ea   :  { %4199 = vmatprep.subr.bf16.mxu1 %v7460_v63  ;;  %v7540_v63 = vcombine.high %v1085_v52, %v1089_v53  ;;  %v937_v23 = vld [vmem:[#allocation10 + $0x228] sm:$0xff] }
 0x1eb   :  { %v1061_v24 = vld [vmem:[#allocation10 + $0x608] sm:$0xff] }
 0x1ec   :  { %4159 = vmatpush1.bf16.msra.mxu0 %v7331_v5  ;;  %v7411_v5 = vcombine.low %v957_v49, %v961_v20  ;;  %v1065_v25 = vld [vmem:[#allocation10 + $0x628] sm:$0xff] }
 0x1ed   :  { %4200 = vmatpush1.bf16.msra.mxu1 %v7459_v8  ;;  %4160 = vmatprep.subr.bf16.mxu0 %v7324_v11  ;;  %v7539_v8 = vcombine.low %v1085_v52, %v1089_v53  ;;  %v7404_v11 = vcombine.high %v949_v0, %v953_v2  ;;  %v1181_v30 = vld [vmem:[#allocation10 + $0x9c8] sm:$0xff] }
 0x1ee   :  { %4201 = vmatprep.subr.bf16.mxu1 %v7452_v13  ;;  %v7532_v13 = vcombine.high %v1077_v3, %v1081_v4  ;;  %v1185_v32 = vld [vmem:[#allocation10 + $0x9e8] sm:$0xff] }
 0x1ef   :  { %v1309_v17 = vld [vmem:[#allocation10 + $0xdc8] sm:$0xff]  ;;  %v7635_v54 = vcombine.low %v1181_v30, %v1185_v32 }
 0x1f0   :  { %4161 = vmatpush1.bf16.msra.mxu0 %v7323_v22  ;;  %v7403_v22 = vcombine.low %v949_v0, %v953_v2  ;;  %v1313_v33 = vld [vmem:[#allocation10 + $0xde8] sm:$0xff] }
 0x1f1   :  { %4202 = vmatpush1.bf16.msra.mxu1 %v7451_v43  ;;  %4162 = vmatprep.subr.bf16.mxu0 %v7444_v48  ;;  %v7531_v43 = vcombine.low %v1077_v3, %v1081_v4  ;;  %v7396_v48 = vcombine.high %v941_v14, %v945_v42  ;;  %v1173_v40 = vld [vmem:[#allocation10 + $0x988] sm:$0xff] }
 0x1f2   :  { %4203 = vmatprep.subr.bf16.mxu1 %v7572_v51  ;;  %v7524_v51 = vcombine.high %v1069_v1, %v1073_v50  ;;  %v1177_v41 = vld [vmem:[#allocation10 + $0x9a8] sm:$0xff] }
 0x1f3   :  { %v1301_v44 = vld [vmem:[#allocation10 + $0xd88] sm:$0xff] }
 0x1f4   :  { %4163 = vmatpush2.bf16.msra.mxu0 %v7443_v26  ;;  %v7395_v26 = vcombine.low %v941_v14, %v945_v42  ;;  %v1169_v49 = vld [vmem:[#allocation10 + $0x968] sm:$0xff] }
 0x1f5   :  { %4204 = vmatpush2.bf16.msra.mxu1 %v7571_v27  ;;  %4164 = vmatprep.subr.bf16.mxu0 %v7436_v28  ;;  %v7523_v27 = vcombine.low %v1069_v1, %v1073_v50  ;;  %v7388_v28 = vcombine.high %v933_v15, %v937_v23  ;;  %v1293_v52 = vld [vmem:[#allocation10 + $0xd48] sm:$0xff] }
 0x1f6   :  { %4205 = vmatprep.subr.bf16.mxu1 %v7564_v29  ;;  %v7516_v29 = vcombine.high %v1061_v24, %v1065_v25  ;;  %v1297_v53 = vld [vmem:[#allocation10 + $0xd68] sm:$0xff] }
 0x1f7   :  { %v1157_v0 = vld [vmem:[#allocation10 + $0x908] sm:$0xff] }
 0x1f8   :  { %4165 = vmatpush2.bf16.msra.mxu0 %v7435_v35  ;;  %v7387_v35 = vcombine.low %v933_v15, %v937_v23  ;;  %v1161_v2 = vld [vmem:[#allocation10 + $0x928] sm:$0xff] }
 0x1f9   :  { %4206 = vmatpush2.bf16.msra.mxu1 %v7563_v12  ;;  %4166 = vmatprep.subr.bf16.mxu0 %v7428_v37  ;;  %v7515_v12 = vcombine.low %v1061_v24, %v1065_v25  ;;  %v7636_v37 = vcombine.high %v1181_v30, %v1185_v32  ;;  %v1285_v3 = vld [vmem:[#allocation10 + $0xd08] sm:$0xff] }
 0x1fa   :  { %4207 = vmatprep.subr.bf16.mxu1 %v7556_v38  ;;  %v7764_v38 = vcombine.high %v1309_v17, %v1313_v33  ;;  %v1289_v4 = vld [vmem:[#allocation10 + $0xd28] sm:$0xff] }
 0x1fb   :  { %v1149_v14 = vld [vmem:[#allocation10 + $0x8c8] sm:$0xff] }
 0x1fc   :  { %4167 = vmatpush2.bf16.msra.mxu0 %v7427_v45  ;;  %v1305_v45 = vld [vmem:[#allocation10 + $0xda8] sm:$0xff] }
 0x1fd   :  { %4208 = vmatpush2.bf16.msra.mxu1 %v7555_v46  ;;  %4168 = vmatprep.subr.bf16.mxu0 %v7420_v61  ;;  %v7763_v46 = vcombine.low %v1309_v17, %v1313_v33  ;;  %v7628_v61 = vcombine.high %v1173_v40, %v1177_v41  ;;  %v7756_v20 = vcombine.high %v1301_v44, %v1305_v45  ;;  %v1153_v42 = vld [vmem:[#allocation10 + $0x8e8] sm:$0xff] }
 0x1fe   :  { %4209 = vmatprep.subr.bf16.mxu1 %v7548_v47  ;;  %v1165_v47 = vld [vmem:[#allocation10 + $0x948] sm:$0xff] }
 0x1ff   :  { %v1277_v1 = vld [vmem:[#allocation10 + $0xcc8] sm:$0xff] }
 0x200   :  { %4169 = vmatpush2.bf16.msra.mxu0 %v7419_v55  ;;  %v7627_v55 = vcombine.low %v1173_v40, %v1177_v41  ;;  %v1281_v50 = vld [vmem:[#allocation10 + $0xce8] sm:$0xff] }
 0x201   :  { %4210 = vmatpush2.bf16.msra.mxu1 %v7547_v56  ;;  %4170 = vmatprep.subr.bf16.mxu0 %v7412_v57  ;;  %v7755_v56 = vcombine.low %v1301_v44, %v1305_v45  ;;  %v7620_v57 = vcombine.high %v1165_v47, %v1169_v49  ;;  %v1141_v15 = vld [vmem:[#allocation10 + $0x888] sm:$0xff] }
 0x202   :  { %4211 = vmatprep.subr.bf16.mxu1 %v7540_v63  ;;  %v7748_v63 = vcombine.high %v1293_v52, %v1297_v53  ;;  %v1145_v23 = vld [vmem:[#allocation10 + $0x8a8] sm:$0xff] }
 0x203   :  { %v1269_v24 = vld [vmem:[#allocation10 + $0xc88] sm:$0xff] }
 0x204   :  { %4171 = vmatpush2.bf16.msra.mxu0 %v7411_v5  ;;  %v7619_v5 = vcombine.low %v1165_v47, %v1169_v49  ;;  %v1273_v25 = vld [vmem:[#allocation10 + $0xca8] sm:$0xff] }
 0x205   :  { %4212 = vmatpush2.bf16.msra.mxu1 %v7539_v8  ;;  %4172 = vmatprep.subr.bf16.mxu0 %v7404_v11  ;;  %v7747_v8 = vcombine.low %v1293_v52, %v1297_v53  ;;  %v7612_v11 = vcombine.high %v1157_v0, %v1161_v2  ;;  %v1133_v30 = vld [vmem:[#allocation10 + $0x848] sm:$0xff] }
 0x206   :  { %4213 = vmatprep.subr.bf16.mxu1 %v7532_v13  ;;  %v7740_v13 = vcombine.high %v1285_v3, %v1289_v4  ;;  %v1137_v32 = vld [vmem:[#allocation10 + $0x868] sm:$0xff] }
 0x207   :  { %v1261_v17 = vld [vmem:[#allocation10 + $0xc48] sm:$0xff]  ;;  %v7587_v45 = vcombine.low %v1133_v30, %v1137_v32 }
 0x208   :  { %4173 = vmatpush2.bf16.msra.mxu0 %v7403_v22  ;;  %v7611_v22 = vcombine.low %v1157_v0, %v1161_v2  ;;  %v1265_v33 = vld [vmem:[#allocation10 + $0xc68] sm:$0xff] }
 0x209   :  { %4214 = vmatpush2.bf16.msra.mxu1 %v7531_v43  ;;  %4174 = vmatprep.subr.bf16.mxu0 %v7396_v48  ;;  %v7739_v43 = vcombine.low %v1285_v3, %v1289_v4  ;;  %v7604_v48 = vcombine.high %v1149_v14, %v1153_v42  ;;  %v1125_v40 = vld [vmem:[#allocation10 + $0x808] sm:$0xff] }
 0x20a   :  { %4215 = vmatprep.subr.bf16.mxu1 %v7524_v51  ;;  %v7732_v51 = vcombine.high %v1277_v1, %v1281_v50  ;;  %v1129_v41 = vld [vmem:[#allocation10 + $0x828] sm:$0xff] }
 0x20b   :  { %v1257_v44 = vld [vmem:[#allocation10 + $0xc28] sm:$0xff] }
 0x20c   :  { %4175 = vmatpush2.bf16.msra.mxu0 %v7395_v26  ;;  %v7603_v26 = vcombine.low %v1149_v14, %v1153_v42  ;;  %v1245_v49 = vld [vmem:[#allocation10 + $0xbc8] sm:$0xff] }
 0x20d   :  { %4216 = vmatpush2.bf16.msra.mxu1 %v7523_v27  ;;  %4176 = vmatprep.subr.bf16.mxu0 %v7388_v28  ;;  %v7731_v27 = vcombine.low %v1277_v1, %v1281_v50  ;;  %v7596_v28 = vcombine.high %v1141_v15, %v1145_v23  ;;  %v1373_v52 = vld [vmem:[#allocation10 + $0xfc8] sm:$0xff] }
 0x20e   :  { %4217 = vmatprep.subr.bf16.mxu1 %v7516_v29  ;;  %v7724_v29 = vcombine.high %v1269_v24, %v1273_v25  ;;  %v1377_v53 = vld [vmem:[#allocation10 + $0xfe8] sm:$0xff] }
 0x20f   :  { %v1237_v0 = vld [vmem:[#allocation10 + $0xb88] sm:$0xff] }
 0x210   :  { %4177 = vmatpush2.bf16.msra.mxu0 %v7387_v35  ;;  %v7595_v35 = vcombine.low %v1141_v15, %v1145_v23  ;;  %v1241_v2 = vld [vmem:[#allocation10 + $0xba8] sm:$0xff] }
 0x211   :  { %4218 = vmatpush2.bf16.msra.mxu1 %v7515_v12  ;;  %4228 = vmatprep.subr.bf16.mxu0 %v7636_v37  ;;  %v7723_v12 = vcombine.low %v1269_v24, %v1273_v25  ;;  %v7588_v37 = vcombine.high %v1133_v30, %v1137_v32  ;;  %v1365_v3 = vld [vmem:[#allocation10 + $0xf88] sm:$0xff] }
 0x212   :  { %4269 = vmatprep.subr.bf16.mxu1 %v7764_v38  ;;  %v7716_v38 = vcombine.high %v1261_v17, %v1265_v33  ;;  %v1369_v4 = vld [vmem:[#allocation10 + $0xfa8] sm:$0xff] }
 0x213   :  { %4179 = vmatmul.mubr.bf16.vlgmr.msra.gmra.mxu0 %v9198_v59  ;;  %v1229_v14 = vld [vmem:[#allocation10 + $0xb48] sm:$0xff] }
 0x214   :  { %4220 = vmatmul.mubr.bf16.vlgmr.msra.gmra.mxu1 %v9202_v62  ;;  %4229 = vmatpush1.bf16.msra.mxu0 %v7635_v54  ;;  %v1253_v54 = vld [vmem:[#allocation10 + $0xc08] sm:$0xff] }
 0x215   :  { %4260 = vmatprep.mubr.bf16.mxu0 %v9232_v31  ;;  %4270 = vmatpush1.bf16.msra.mxu1 %v7763_v46  ;;  %v7715_v46 = vcombine.low %v1261_v17, %v1265_v33  ;;  %v7708_v47 = vcombine.high %v1253_v54, %v1257_v44  ;;  %v1233_v42 = vld [vmem:[#allocation10 + $0xb68] sm:$0xff] }
 0x216   :  { %4301 = vmatprep.mubr.bf16.mxu1 %v9234_v34  ;;  %4230 = vmatprep.subr.bf16.mxu0 %v7628_v61  ;;  %v7580_v61 = vcombine.high %v1125_v40, %v1129_v41  ;;  %v1357_v1 = vld [vmem:[#allocation10 + $0xf48] sm:$0xff] }
 0x217   :  { %4271 = vmatprep.subr.bf16.mxu1 %v7756_v20  ;;  %v1249_v20 = vld [vmem:[#allocation10 + $0xbe8] sm:$0xff] }
 0x218   :  { %4231 = vmatpush1.bf16.msra.mxu0 %v7627_v55  ;;  %v7579_v55 = vcombine.low %v1125_v40, %v1129_v41  ;;  %v1361_v50 = vld [vmem:[#allocation10 + $0xf68] sm:$0xff] }
 0x219   :  { %4272 = vmatpush1.bf16.msra.mxu1 %v7755_v56  ;;  %4232 = vmatprep.subr.bf16.mxu0 %v7620_v57  ;;  %v7707_v56 = vcombine.low %v1253_v54, %v1257_v44  ;;  %v7700_v57 = vcombine.high %v1245_v49, %v1249_v20  ;;  %v1221_v15 = vld [vmem:[#allocation10 + $0xb08] sm:$0xff] }
 0x21a   :  { %4273 = vmatprep.subr.bf16.mxu1 %v7748_v63  ;;  %v7828_v63 = vcombine.high %v1373_v52, %v1377_v53  ;;  %v1225_v23 = vld [vmem:[#allocation10 + $0xb28] sm:$0xff] }
 0x21b   :  { %v1349_v24 = vld [vmem:[#allocation10 + $0xf08] sm:$0xff] }
 0x21c   :  { %4233 = vmatpush1.bf16.msra.mxu0 %v7619_v5  ;;  %v7699_v5 = vcombine.low %v1245_v49, %v1249_v20  ;;  %v1353_v25 = vld [vmem:[#allocation10 + $0xf28] sm:$0xff] }
 0x21d   :  { %4274 = vmatpush1.bf16.msra.mxu1 %v7747_v8  ;;  %4234 = vmatprep.subr.bf16.mxu0 %v7612_v11  ;;  %v7827_v8 = vcombine.low %v1373_v52, %v1377_v53  ;;  %v7692_v11 = vcombine.high %v1237_v0, %v1241_v2  ;;  %v1213_v30 = vld [vmem:[#allocation10 + $0xac8] sm:$0xff] }
 0x21e   :  { %4275 = vmatprep.subr.bf16.mxu1 %v7740_v13  ;;  %v7820_v13 = vcombine.high %v1365_v3, %v1369_v4  ;;  %v1217_v32 = vld [vmem:[#allocation10 + $0xae8] sm:$0xff] }
 0x21f   :  { %v1341_v17 = vld [vmem:[#allocation10 + $0xec8] sm:$0xff] }
 0x220   :  { %4235 = vmatpush1.bf16.msra.mxu0 %v7611_v22  ;;  %v7691_v22 = vcombine.low %v1237_v0, %v1241_v2  ;;  %v1345_v33 = vld [vmem:[#allocation10 + $0xee8] sm:$0xff] }
 0x221   :  { %4276 = vmatpush1.bf16.msra.mxu1 %v7739_v43  ;;  %4236 = vmatprep.subr.bf16.mxu0 %v7604_v48  ;;  %v7819_v43 = vcombine.low %v1365_v3, %v1369_v4  ;;  %v7684_v48 = vcombine.high %v1229_v14, %v1233_v42  ;;  %v1205_v40 = vld [vmem:[#allocation10 + $0xa88] sm:$0xff] }
 0x222   :  { %4277 = vmatprep.subr.bf16.mxu1 %v7732_v51  ;;  %v7812_v51 = vcombine.high %v1357_v1, %v1361_v50  ;;  %v1209_v41 = vld [vmem:[#allocation10 + $0xaa8] sm:$0xff] }
 0x223   :  { %v1333_v54 = vld [vmem:[#allocation10 + $0xe88] sm:$0xff] }
 0x224   :  { %4237 = vmatpush1.bf16.msra.mxu0 %v7603_v26  ;;  %v7683_v26 = vcombine.low %v1229_v14, %v1233_v42  ;;  %v1337_v44 = vld [vmem:[#allocation10 + $0xea8] sm:$0xff]  ;;  %v926_v14 = vld [vmem:[#allocation10 + $0x1d0] sm:$0xff] }
 0x225   :  { %4278 = vmatpush1.bf16.msra.mxu1 %v7731_v27  ;;  %4238 = vmatprep.subr.bf16.mxu0 %v7596_v28  ;;  %v7811_v27 = vcombine.low %v1357_v1, %v1361_v50  ;;  %v7676_v28 = vcombine.high %v1221_v15, %v1225_v23  ;;  %v1197_v49 = vld [vmem:[#allocation10 + $0xa48] sm:$0xff]  ;;  %v930_v42 = vld [vmem:[#allocation10 + $0x1f0] sm:$0xff] }
 0x226   :  { %4279 = vmatprep.subr.bf16.mxu1 %v7724_v29  ;;  %v7804_v29 = vcombine.high %v1349_v24, %v1353_v25  ;;  %v1201_v20 = vld [vmem:[#allocation10 + $0xa68] sm:$0xff]  ;;  %v1054_v1 = vld [vmem:[#allocation10 + $0x5d0] sm:$0xff] }
 0x227   :  { %v1325_v52 = vld [vmem:[#allocation10 + $0xe48] sm:$0xff]  ;;  %v1058_v50 = vld [vmem:[#allocation10 + $0x5f0] sm:$0xff] }
 0x228   :  { %4239 = vmatpush1.bf16.msra.mxu0 %v7595_v35  ;;  %v7675_v35 = vcombine.low %v1221_v15, %v1225_v23  ;;  %v1329_v53 = vld [vmem:[#allocation10 + $0xe68] sm:$0xff]  ;;  %v7510_v15 = vcombine.high %v1054_v1, %v1058_v50  ;;  %v918_v23 = vld [vmem:[#allocation10 + $0x190] sm:$0xff] }
 0x229   :  { %4280 = vmatpush1.bf16.msra.mxu1 %v7723_v12  ;;  %4240 = vmatprep.subr.bf16.mxu0 %v7588_v37  ;;  %v7803_v12 = vcombine.low %v1349_v24, %v1353_v25  ;;  %v7668_v37 = vcombine.high %v1213_v30, %v1217_v32  ;;  %v1189_v0 = vld [vmem:[#allocation10 + $0xa08] sm:$0xff]  ;;  %v922_v24 = vld [vmem:[#allocation10 + $0x1b0] sm:$0xff]  ;;  %v7381_v25 = vcombine.low %v926_v14, %v930_v42 }
 0x22a   :  { %4281 = vmatprep.subr.bf16.mxu1 %v7716_v38  ;;  %v7796_v38 = vcombine.high %v1341_v17, %v1345_v33  ;;  %v1193_v2 = vld [vmem:[#allocation10 + $0xa28] sm:$0xff] }
 0x22b   :  { %v1317_v3 = vld [vmem:[#allocation10 + $0xe08] sm:$0xff] }
 0x22c   :  { %4241 = vmatpush1.bf16.msra.mxu0 %v7587_v45  ;;  %v7667_v45 = vcombine.low %v1213_v30, %v1217_v32  ;;  %v1321_v4 = vld [vmem:[#allocation10 + $0xe28] sm:$0xff]  ;;  %v7374_v32 = vcombine.high %v918_v23, %v922_v24 }
 0x22d   :  { %4282 = vmatpush1.bf16.msra.mxu1 %v7715_v46  ;;  %4242 = vmatprep.subr.bf16.mxu0 %v7580_v61  ;;  %v7795_v46 = vcombine.low %v1341_v17, %v1345_v33  ;;  %v7660_v61 = vcombine.high %v1205_v40, %v1209_v41  ;;  %v910_v17 = vld [vmem:[#allocation10 + $0x150] sm:$0xff] }
 0x22e   :  { %4283 = vmatprep.subr.bf16.mxu1 %v7708_v47  ;;  %v7788_v47 = vcombine.high %v1333_v54, %v1337_v44  ;;  %v914_v33 = vld [vmem:[#allocation10 + $0x170] sm:$0xff] }
 0x230   :  { %4243 = vmatpush1.bf16.msra.mxu0 %v7579_v55  ;;  %v7659_v55 = vcombine.low %v1205_v40, %v1209_v41 }
 0x231   :  { %4284 = vmatpush1.bf16.msra.mxu1 %v7707_v56  ;;  %4244 = vmatprep.subr.bf16.mxu0 %v7700_v57  ;;  %v7787_v56 = vcombine.low %v1333_v54, %v1337_v44  ;;  %v7652_v57 = vcombine.high %v1197_v49, %v1201_v20  ;;  %v7373_v54 = vcombine.low %v918_v23, %v922_v24  ;;  %v890_v23 = vld [vmem:[#allocation10 + $0xb0] sm:$0xff] }
 0x232   :  { %4285 = vmatprep.subr.bf16.mxu1 %v7828_v63  ;;  %v7780_v63 = vcombine.high %v1325_v52, %v1329_v53  ;;  %v1014_v24 = vld [vmem:[#allocation10 + $0x490] sm:$0xff] }
 0x234   :  { %4245 = vmatpush2.bf16.msra.mxu0 %v7699_v5  ;;  %v7651_v5 = vcombine.low %v1197_v49, %v1201_v20 }
 0x235   :  { %4286 = vmatpush2.bf16.msra.mxu1 %v7827_v8  ;;  %4246 = vmatprep.subr.bf16.mxu0 %v7692_v11  ;;  %v7779_v8 = vcombine.low %v1325_v52, %v1329_v53  ;;  %v7644_v11 = vcombine.high %v1189_v0, %v1193_v2  ;;  %v902_v52 = vld [vmem:[#allocation10 + $0x110] sm:$0xff] }
 0x236   :  { %4287 = vmatprep.subr.bf16.mxu1 %v7820_v13  ;;  %v7772_v13 = vcombine.high %v1317_v3, %v1321_v4  ;;  %v906_v53 = vld [vmem:[#allocation10 + $0x130] sm:$0xff] }
 0x238   :  { %4247 = vmatpush2.bf16.msra.mxu0 %v7691_v22  ;;  %v7643_v22 = vcombine.low %v1189_v0, %v1193_v2  ;;  %v7365_v2 = vcombine.low %v910_v17, %v914_v33 }
 0x239   :  { %4288 = vmatpush2.bf16.msra.mxu1 %v7819_v43  ;;  %4248 = vmatprep.subr.bf16.mxu0 %v7684_v48  ;;  %v7771_v43 = vcombine.low %v1317_v3, %v1321_v4  ;;  %v7382_v48 = vcombine.high %v926_v14, %v930_v42  ;;  %v898_v14 = vld [vmem:[#allocation10 + $0xf0] sm:$0xff] }
 0x23a   :  { %4289 = vmatprep.subr.bf16.mxu1 %v7812_v51  ;;  %v9266_v51 = vld [vmem:[#allocation11] sm:$0xff]  ;;  %v1022_v42 = vld [vmem:[#allocation10 + $0x4d0] sm:$0xff] }
 0x23b   :  { %v1389_v30 = vrot.slane %v9266_v51, %v9173_v19 }
 0x23c   :  { %4249 = vmatpush2.bf16.msra.mxu0 %v7683_v26  ;;  %v1385_v26 = vrot.slane %v9266_v51, %v9165_v16 }
 0x23d   :  { %4290 = vmatpush2.bf16.msra.mxu1 %v7811_v27  ;;  %4250 = vmatprep.subr.bf16.mxu0 %v7676_v28  ;;  %v1046_v27 = vld [vmem:[#allocation10 + $0x590] sm:$0xff] }
 0x23e   :  { %4291 = vmatprep.subr.bf16.mxu1 %v7804_v29  ;;  %v1050_v28 = vld [vmem:[#allocation10 + $0x5b0] sm:$0xff]  ;;  %v7509_v29 = vcombine.low %v1054_v1, %v1058_v50  ;;  %v7357_v50 = vcombine.low %v902_v52, %v906_v53 }
 0x23f   :  { %v1026_v1 = vld [vmem:[#allocation10 + $0x4f0] sm:$0xff] }
 0x240   :  { %4251 = vmatpush2.bf16.msra.mxu0 %v7675_v35 }
 0x241   :  { %4292 = vmatpush2.bf16.msra.mxu1 %v7803_v12  ;;  %4252 = vmatprep.subr.bf16.mxu0 %v7668_v37  ;;  %v7502_v12 = vcombine.high %v1046_v27, %v1050_v28  ;;  %v1038_v37 = vld [vmem:[#allocation10 + $0x550] sm:$0xff] }
 0x242   :  { %4293 = vmatprep.subr.bf16.mxu1 %v7796_v38  ;;  %v1042_v38 = vld [vmem:[#allocation10 + $0x570] sm:$0xff] }
 0x243   :  { %v7494_v20 = vcombine.high %v1038_v37, %v1042_v38  ;;  %v7493_v4 = vcombine.low %v1038_v37, %v1042_v38 }
 0x244   :  { %4253 = vmatpush2.bf16.msra.mxu0 %v7667_v45  ;;  %v7501_v45 = vcombine.low %v1046_v27, %v1050_v28  ;;  %v7477_v27 = vcombine.low %v1022_v42, %v1026_v1 }
 0x245   :  { %4294 = vmatpush2.bf16.msra.mxu1 %v7795_v46  ;;  %4254 = vmatprep.subr.bf16.mxu0 %v7660_v61  ;;  %v7366_v46 = vcombine.high %v910_v17, %v914_v33  ;;  %v1006_v17 = vld [vmem:[#allocation10 + $0x450] sm:$0xff] }
 0x246   :  { %4295 = vmatprep.subr.bf16.mxu1 %v7788_v47  ;;  %v1010_v33 = vld [vmem:[#allocation10 + $0x470] sm:$0xff] }
 0x247   :  { %v7462_v38 = vcombine.high %v1006_v17, %v1010_v33 }
 0x248   :  { %4255 = vmatpush2.bf16.msra.mxu0 %v7659_v55 }
 0x249   :  { %4296 = vmatpush2.bf16.msra.mxu1 %v7787_v56  ;;  %4256 = vmatprep.subr.bf16.mxu0 %v7652_v57  ;;  %v1030_v56 = vld [vmem:[#allocation10 + $0x510] sm:$0xff] }
 0x24a   :  { %4297 = vmatprep.subr.bf16.mxu1 %v7780_v63  ;;  %v1034_v57 = vld [vmem:[#allocation10 + $0x530] sm:$0xff] }
 0x24c   :  { %4257 = vmatpush2.bf16.msra.mxu0 %v7651_v5  ;;  %v7358_v5 = vcombine.high %v902_v52, %v906_v53  ;;  %v994_v52 = vld [vmem:[#allocation10 + $0x3f0] sm:$0xff] }
 0x24d   :  { %4298 = vmatpush2.bf16.msra.mxu1 %v7779_v8  ;;  %4258 = vmatprep.subr.bf16.mxu0 %v7644_v11  ;;  %v7486_v11 = vcombine.high %v1030_v56, %v1034_v57  ;;  %v1118_v53 = vld [vmem:[#allocation10 + $0x7d0] sm:$0xff] }
 0x24e   :  { %4299 = vmatprep.subr.bf16.mxu1 %v7772_v13  ;;  %v894_v13 = vld [vmem:[#allocation10 + $0xd0] sm:$0xff] }
 0x250   :  { %4259 = vmatpush2.bf16.msra.mxu0 %v7643_v22  ;;  %v7485_v22 = vcombine.low %v1030_v56, %v1034_v57 }
 0x251   :  { %4300 = vmatpush2.bf16.msra.mxu1 %v7771_v43  ;;  %4310 = vmatprep.subr.bf16.mxu0 %v7382_v48  ;;  %v7350_v43 = vcombine.high %v894_v13, %v898_v14  ;;  %v7478_v48 = vcombine.high %v1022_v42, %v1026_v1  ;;  %v974_v1 = vld [vmem:[#allocation10 + $0x350] sm:$0xff] }
 0x252   :  { %4351 = vmatprep.subr.bf16.mxu1 %v7510_v15  ;;  %v886_v15 = vld [vmem:[#allocation10 + $0x90] sm:$0xff] }
 0x253   :  { %4261 = vmatmul.mubr.bf16.vlgmr.msra.gmra.mxu0 %v9254_v6  ;;  %v4016_v35 = vpop.f32.mrf.mxu0  ;;  %v4057_v41 = vpop.f32.mrf.mxu1  ;;  %v7342_v28 = vcombine.high %v886_v15, %v890_v23 }
 0x254   :  { %4302 = vmatmul.mubr.bf16.vlgmr.msra.gmra.mxu1 %v9256_v9  ;;  %v4017_v40 = vadd.f32 %v4016_v35, %v1385_v26  ;;  %4311 = vmatpush1.bf16.msra.mxu0 %v7381_v25  ;;  %v1018_v25 = vld [vmem:[#allocation10 + $0x4b0] sm:$0xff]  ;;  %v7349_v26 = vcombine.low %v894_v13, %v898_v14  ;;  %v7341_v35 = vcombine.low %v886_v15, %v890_v23 }
 0x255   :  { %4342 = vmatprep.mubr.bf16.mxu0 %v9196_v58  ;;  %4352 = vmatpush1.bf16.msra.mxu1 %v7509_v29  ;;  %v4018_v44 = vpop.f32.mrf.mxu0  ;;  %v4059_v49 = vpop.f32.mrf.mxu1  ;;  %v7470_v29 = vcombine.high %v1014_v24, %v1018_v25 }
 0x256   :  { %v9275_v61 = vadd.f32 %v4057_v41, %v4017_v40  ;;  %4383 = vmatprep.mubr.bf16.mxu1 %v9200_v60  ;;  %v4019_v47 = vadd.f32 %v4018_v44, %v1389_v30  ;;  %4312 = vmatprep.subr.bf16.mxu0 %v7374_v32  ;;  %v878_v30 = vld [vmem:[#allocation10 + $0x50] sm:$0xff] }
 0x257   :  { %4353 = vmatprep.subr.bf16.mxu1 %v7502_v12  ;;  %v4020_v55 = vpop.f32.mrf.mxu0  ;;  %v4061_v0 = vpop.f32.mrf.mxu1  ;;  %v882_v32 = vld [vmem:[#allocation10 + $0x70] sm:$0xff]  ;;  %v7469_v12 = vcombine.low %v1014_v24, %v1018_v25 }
 0x258   :  { %v9278_v63 = vadd.f32 %v4059_v49, %v4019_v47  ;;  %4313 = vmatpush1.bf16.msra.mxu0 %v7373_v54  ;;  %v7334_v37 = vcombine.high %v878_v30, %v882_v32  ;;  %v870_v40 = vld [vmem:[#allocation10 + $0x10] sm:$0xff] }
 0x259   :  { %4354 = vmatpush1.bf16.msra.mxu1 %v7501_v45  ;;  %v4021_v3 = vpop.f32.mrf.mxu0  ;;  %4314 = vmatprep.subr.bf16.mxu0 %v7366_v46  ;;  %v4062_v8 = vpop.f32.mrf.mxu1  ;;  %v874_v41 = vld [vmem:[#allocation10 + $0x30] sm:$0xff]  ;;  %v7333_v45 = vcombine.low %v878_v30, %v882_v32  ;;  %v7461_v46 = vcombine.low %v1006_v17, %v1010_v33 }
 0x25a   :  { %4355 = vmatprep.subr.bf16.mxu1 %v7494_v20  ;;  %v998_v54 = vld [vmem:[#allocation10 + $0x410] sm:$0xff]  ;;  %v7326_v47 = vcombine.high %v870_v40, %v874_v41  ;;  %v7325_v56 = vcombine.low %v870_v40, %v874_v41 }
 0x25b   :  { %v1002_v44 = vld [vmem:[#allocation10 + $0x430] sm:$0xff] }
 0x25c   :  { %4315 = vmatpush1.bf16.msra.mxu0 %v7365_v2  ;;  %v7454_v49 = vcombine.high %v998_v54, %v1002_v44  ;;  %v990_v20 = vld [vmem:[#allocation10 + $0x3d0] sm:$0xff]  ;;  %v7453_v57 = vcombine.low %v998_v54, %v1002_v44 }
 0x25d   :  { %4356 = vmatpush1.bf16.msra.mxu1 %v7493_v4  ;;  %4316 = vmatprep.subr.bf16.mxu0 %v7358_v5  ;;  %v1122_v55 = vld [vmem:[#allocation10 + $0x7f0] sm:$0xff]  ;;  %v7446_v0 = vcombine.high %v990_v20, %v994_v52 }
 0x25e   :  { %4357 = vmatprep.subr.bf16.mxu1 %v7486_v11  ;;  %v7574_v2 = vcombine.high %v1118_v53, %v1122_v55  ;;  %v982_v3 = vld [vmem:[#allocation10 + $0x390] sm:$0xff]  ;;  %v7445_v11 = vcombine.low %v990_v20, %v994_v52  ;;  %v7573_v13 = vcombine.low %v1118_v53, %v1122_v55 }
 0x25f   :  { %v986_v4 = vld [vmem:[#allocation10 + $0x3b0] sm:$0xff] }
 0x260   :  { %4317 = vmatpush1.bf16.msra.mxu0 %v7357_v50  ;;  %v1110_v5 = vld [vmem:[#allocation10 + $0x790] sm:$0xff]  ;;  %v7438_v14 = vcombine.high %v982_v3, %v986_v4 }
 0x261   :  { %4358 = vmatpush1.bf16.msra.mxu1 %v7485_v22  ;;  %4318 = vmatprep.subr.bf16.mxu0 %v7350_v43  ;;  %v1114_v8 = vld [vmem:[#allocation10 + $0x7b0] sm:$0xff] }
 0x262   :  { %4359 = vmatprep.subr.bf16.mxu1 %v7478_v48  ;;  %v7566_v42 = vcombine.high %v1110_v5, %v1114_v8  ;;  %v978_v50 = vld [vmem:[#allocation10 + $0x370] sm:$0xff]  ;;  %v7437_v48 = vcombine.low %v982_v3, %v986_v4  ;;  %v7565_v15 = vcombine.low %v1110_v5, %v1114_v8 }
 0x263   :  { %v1102_v22 = vld [vmem:[#allocation10 + $0x750] sm:$0xff]  ;;  %v7430_v23 = vcombine.high %v974_v1, %v978_v50 }
 0x264   :  { %4319 = vmatpush1.bf16.msra.mxu0 %v7349_v26  ;;  %v1106_v43 = vld [vmem:[#allocation10 + $0x770] sm:$0xff] }
 0x265   :  { %4360 = vmatpush1.bf16.msra.mxu1 %v7477_v27  ;;  %4320 = vmatprep.subr.bf16.mxu0 %v7342_v28  ;;  %v7558_v24 = vcombine.high %v1102_v22, %v1106_v43  ;;  %v966_v25 = vld [vmem:[#allocation10 + $0x310] sm:$0xff]  ;;  %v7557_v30 = vcombine.low %v1102_v22, %v1106_v43 }
 0x266   :  { %4361 = vmatprep.subr.bf16.mxu1 %v7470_v29  ;;  %v970_v26 = vld [vmem:[#allocation10 + $0x330] sm:$0xff]  ;;  %v7429_v29 = vcombine.low %v974_v1, %v978_v50 }
 0x267   :  { %v1094_v27 = vld [vmem:[#allocation10 + $0x710] sm:$0xff]  ;;  %v7422_v32 = vcombine.high %v966_v25, %v970_v26 }
 0x268   :  { %4321 = vmatpush1.bf16.msra.mxu0 %v7341_v35  ;;  %v1098_v28 = vld [vmem:[#allocation10 + $0x730] sm:$0xff] }
 0x269   :  { %4362 = vmatpush1.bf16.msra.mxu1 %v7469_v12  ;;  %4322 = vmatprep.subr.bf16.mxu0 %v7334_v37  ;;  %v7550_v17 = vcombine.high %v1094_v27, %v1098_v28  ;;  %v958_v33 = vld [vmem:[#allocation10 + $0x2d0] sm:$0xff]  ;;  %v7549_v40 = vcombine.low %v1094_v27, %v1098_v28 }
 0x26a   :  { %4363 = vmatprep.subr.bf16.mxu1 %v7462_v38  ;;  %v962_v35 = vld [vmem:[#allocation10 + $0x2f0] sm:$0xff]  ;;  %v7421_v38 = vcombine.low %v966_v25, %v970_v26 }
 0x26b   :  { %v1086_v12 = vld [vmem:[#allocation10 + $0x6d0] sm:$0xff]  ;;  %v7414_v41 = vcombine.high %v958_v33, %v962_v35 }
 0x26c   :  { %4323 = vmatpush1.bf16.msra.mxu0 %v7333_v45  ;;  %v1090_v37 = vld [vmem:[#allocation10 + $0x6f0] sm:$0xff] }
 0x26d   :  { %4364 = vmatpush1.bf16.msra.mxu1 %v7461_v46  ;;  %4324 = vmatprep.subr.bf16.mxu0 %v7326_v47  ;;  %v7542_v54 = vcombine.high %v1086_v12, %v1090_v37  ;;  %v950_v44 = vld [vmem:[#allocation10 + $0x290] sm:$0xff]  ;;  %v7541_v20 = vcombine.low %v1086_v12, %v1090_v37 }
 0x26e   :  { %4365 = vmatprep.subr.bf16.mxu1 %v7454_v49  ;;  %v954_v45 = vld [vmem:[#allocation10 + $0x2b0] sm:$0xff]  ;;  %v7413_v49 = vcombine.low %v958_v33, %v962_v35 }
 0x26f   :  { %v1078_v46 = vld [vmem:[#allocation10 + $0x690] sm:$0xff]  ;;  %v7406_v52 = vcombine.high %v950_v44, %v954_v45 }
 0x270   :  { %4325 = vmatpush1.bf16.msra.mxu0 %v7325_v56  ;;  %v1082_v47 = vld [vmem:[#allocation10 + $0x6b0] sm:$0xff] }
 0x271   :  { %4366 = vmatpush1.bf16.msra.mxu1 %v7453_v57  ;;  %4326 = vmatprep.subr.bf16.mxu0 %v7446_v0  ;;  %v7534_v53 = vcombine.high %v1078_v46, %v1082_v47  ;;  %v942_v55 = vld [vmem:[#allocation10 + $0x250] sm:$0xff]  ;;  %v7533_v3 = vcombine.low %v1078_v46, %v1082_v47 }
 0x272   :  { %4367 = vmatprep.subr.bf16.mxu1 %v7574_v2  ;;  %v946_v56 = vld [vmem:[#allocation10 + $0x270] sm:$0xff]  ;;  %v7405_v2 = vcombine.low %v950_v44, %v954_v45 }
 0x273   :  { %v1070_v57 = vld [vmem:[#allocation10 + $0x650] sm:$0xff]  ;;  %v7398_v4 = vcombine.high %v942_v55, %v946_v56 }
 0x274   :  { %4327 = vmatpush2.bf16.msra.mxu0 %v7445_v11  ;;  %v1074_v0 = vld [vmem:[#allocation10 + $0x670] sm:$0xff] }
 0x275   :  { %4368 = vmatpush2.bf16.msra.mxu1 %v7573_v13  ;;  %4328 = vmatprep.subr.bf16.mxu0 %v7438_v14  ;;  %v7526_v5 = vcombine.high %v1070_v57, %v1074_v0  ;;  %v934_v8 = vld [vmem:[#allocation10 + $0x210] sm:$0xff]  ;;  %v7525_v1 = vcombine.low %v1070_v57, %v1074_v0 }
 0x276   :  { %4369 = vmatprep.subr.bf16.mxu1 %v7566_v42  ;;  %v938_v11 = vld [vmem:[#allocation10 + $0x230] sm:$0xff]  ;;  %v7397_v42 = vcombine.low %v942_v55, %v946_v56 }
 0x277   :  { %v1062_v13 = vld [vmem:[#allocation10 + $0x610] sm:$0xff]  ;;  %v7390_v50 = vcombine.high %v934_v8, %v938_v11 }
 0x278   :  { %4329 = vmatpush2.bf16.msra.mxu0 %v7437_v48  ;;  %v1066_v14 = vld [vmem:[#allocation10 + $0x630] sm:$0xff] }
 0x279   :  { %4370 = vmatpush2.bf16.msra.mxu1 %v7565_v15  ;;  %4330 = vmatprep.subr.bf16.mxu0 %v7430_v23  ;;  %v7518_v22 = vcombine.high %v1062_v13, %v1066_v14  ;;  %v1182_v43 = vld [vmem:[#allocation10 + $0x9d0] sm:$0xff]  ;;  %v7517_v25 = vcombine.low %v1062_v13, %v1066_v14 }
 0x27a   :  { %4371 = vmatprep.subr.bf16.mxu1 %v7558_v24  ;;  %v1186_v48 = vld [vmem:[#allocation10 + $0x9f0] sm:$0xff]  ;;  %v7389_v24 = vcombine.low %v934_v8, %v938_v11 }
 0x27b   :  { %v1310_v15 = vld [vmem:[#allocation10 + $0xdd0] sm:$0xff]  ;;  %v7638_v26 = vcombine.high %v1182_v43, %v1186_v48 }
 0x27c   :  { %4331 = vmatpush2.bf16.msra.mxu0 %v7429_v29  ;;  %v1314_v23 = vld [vmem:[#allocation10 + $0xdf0] sm:$0xff] }
 0x27d   :  { %4372 = vmatpush2.bf16.msra.mxu1 %v7557_v30  ;;  %4332 = vmatprep.subr.bf16.mxu0 %v7422_v32  ;;  %v7766_v27 = vcombine.high %v1310_v15, %v1314_v23  ;;  %v1174_v28 = vld [vmem:[#allocation10 + $0x990] sm:$0xff]  ;;  %v7637_v30 = vcombine.low %v1182_v43, %v1186_v48  ;;  %v7765_v33 = vcombine.low %v1310_v15, %v1314_v23 }
 0x27e   :  { %4373 = vmatprep.subr.bf16.mxu1 %v7550_v17  ;;  %v1178_v29 = vld [vmem:[#allocation10 + $0x9b0] sm:$0xff] }
 0x27f   :  { %v1302_v32 = vld [vmem:[#allocation10 + $0xd90] sm:$0xff]  ;;  %v7630_v35 = vcombine.high %v1174_v28, %v1178_v29  ;;  %v7629_v46 = vcombine.low %v1174_v28, %v1178_v29 }
 0x280   :  { %4333 = vmatpush2.bf16.msra.mxu0 %v7421_v38  ;;  %v1306_v17 = vld [vmem:[#allocation10 + $0xdb0] sm:$0xff] }
 0x281   :  { %4374 = vmatpush2.bf16.msra.mxu1 %v7549_v40  ;;  %4334 = vmatprep.subr.bf16.mxu0 %v7414_v41  ;;  %v1166_v12 = vld [vmem:[#allocation10 + $0x950] sm:$0xff]  ;;  %v7758_v40 = vcombine.high %v1302_v32, %v1306_v17 }
 0x282   :  { %4375 = vmatprep.subr.bf16.mxu1 %v7542_v54  ;;  %v1170_v37 = vld [vmem:[#allocation10 + $0x970] sm:$0xff] }
 0x283   :  { %v1294_v41 = vld [vmem:[#allocation10 + $0xd50] sm:$0xff]  ;;  %v7621_v8 = vcombine.low %v1166_v12, %v1170_v37 }
 0x284   :  { %4335 = vmatpush2.bf16.msra.mxu0 %v7413_v49  ;;  %v1298_v54 = vld [vmem:[#allocation10 + $0xd70] sm:$0xff]  ;;  %v7757_v49 = vcombine.low %v1302_v32, %v1306_v17 }
 0x285   :  { %4376 = vmatpush2.bf16.msra.mxu1 %v7541_v20  ;;  %4336 = vmatprep.subr.bf16.mxu0 %v7406_v52  ;;  %v7622_v20 = vcombine.high %v1166_v12, %v1170_v37  ;;  %v1158_v56 = vld [vmem:[#allocation10 + $0x910] sm:$0xff]  ;;  %v7749_v13 = vcombine.low %v1294_v41, %v1298_v54 }
 0x286   :  { %4377 = vmatprep.subr.bf16.mxu1 %v7534_v53  ;;  %v1162_v57 = vld [vmem:[#allocation10 + $0x930] sm:$0xff] }
 0x287   :  { %v7614_v14 = vcombine.high %v1158_v56, %v1162_v57  ;;  %v1282_v43 = vld [vmem:[#allocation10 + $0xcf0] sm:$0xff]  ;;  %v7613_v48 = vcombine.low %v1158_v56, %v1162_v57 }
 0x288   :  { %4337 = vmatpush2.bf16.msra.mxu0 %v7405_v2  ;;  %v1286_v2 = vld [vmem:[#allocation10 + $0xd10] sm:$0xff] }
 0x289   :  { %4378 = vmatpush2.bf16.msra.mxu1 %v7533_v3  ;;  %4338 = vmatprep.subr.bf16.mxu0 %v7398_v4  ;;  %v1290_v3 = vld [vmem:[#allocation10 + $0xd30] sm:$0xff] }
 0x28a   :  { %4379 = vmatprep.subr.bf16.mxu1 %v7526_v5  ;;  %v7741_v15 = vcombine.low %v1286_v2, %v1290_v3  ;;  %v1274_v28 = vld [vmem:[#allocation10 + $0xcb0] sm:$0xff] }
 0x28b   :  { %v1262_v12 = vld [vmem:[#allocation10 + $0xc50] sm:$0xff] }
 0x28c   :  { %4339 = vmatpush2.bf16.msra.mxu0 %v7397_v42  ;;  %v7742_v42 = vcombine.high %v1286_v2, %v1290_v3  ;;  %v1266_v37 = vld [vmem:[#allocation10 + $0xc70] sm:$0xff] }
 0x28d   :  { %4380 = vmatpush2.bf16.msra.mxu1 %v7525_v1  ;;  %4340 = vmatprep.subr.bf16.mxu0 %v7390_v50  ;;  %v1150_v1 = vld [vmem:[#allocation10 + $0x8d0] sm:$0xff] }
 0x28e   :  { %4381 = vmatprep.subr.bf16.mxu1 %v7518_v22  ;;  %v1154_v50 = vld [vmem:[#allocation10 + $0x8f0] sm:$0xff] }
 0x28f   :  { %v1278_v22 = vld [vmem:[#allocation10 + $0xcd0] sm:$0xff]  ;;  %v7606_v23 = vcombine.high %v1150_v1, %v1154_v50  ;;  %v7605_v29 = vcombine.low %v1150_v1, %v1154_v50 }
 0x290   :  { %4341 = vmatpush2.bf16.msra.mxu0 %v7389_v24  ;;  %v7734_v24 = vcombine.high %v1278_v22, %v1282_v43  ;;  %v1250_v56 = vld [vmem:[#allocation10 + $0xbf0] sm:$0xff] }
 0x291   :  { %4382 = vmatpush2.bf16.msra.mxu1 %v7517_v25  ;;  %4392 = vmatprep.subr.bf16.mxu0 %v7638_v26  ;;  %v1142_v25 = vld [vmem:[#allocation10 + $0x890] sm:$0xff] }
 0x292   :  { %4433 = vmatprep.subr.bf16.mxu1 %v7766_v27  ;;  %v1146_v26 = vld [vmem:[#allocation10 + $0x8b0] sm:$0xff] }
 0x293   :  { %v4098_v38 = vpop.f32.mrf.mxu0  ;;  %4343 = vmatmul.mubr.bf16.vlgmr.msra.gmra.mxu0 %v9198_v59  ;;  %v4139_v45 = vpop.f32.mrf.mxu1  ;;  %v1270_v27 = vld [vmem:[#allocation10 + $0xc90] sm:$0xff]  ;;  %v7598_v32 = vcombine.high %v1142_v25, %v1146_v26 }
 0x294   :  { %v4099_v44 = vadd.f32 %v4098_v38, %v9275_v61  ;;  %4384 = vmatmul.mubr.bf16.vlgmr.msra.gmra.mxu1 %v9202_v62  ;;  %4393 = vmatpush1.bf16.msra.mxu0 %v7637_v30  ;;  %v7750_v61 = vcombine.high %v1294_v41, %v1298_v54  ;;  %v7733_v30 = vcombine.low %v1278_v22, %v1282_v43  ;;  %v1374_v57 = vld [vmem:[#allocation10 + $0xfd0] sm:$0xff] }
 0x295   :  { %4424 = vmatprep.mubr.bf16.mxu0 %v9232_v31  ;;  %4434 = vmatpush1.bf16.msra.mxu1 %v7765_v33  ;;  %v4100_v47 = vpop.f32.mrf.mxu0  ;;  %v4141_v55 = vpop.f32.mrf.mxu1  ;;  %v7726_v17 = vcombine.high %v1270_v27, %v1274_v28  ;;  %v1134_v33 = vld [vmem:[#allocation10 + $0x850] sm:$0xff]  ;;  %v7597_v38 = vcombine.low %v1142_v25, %v1146_v26  ;;  %v7718_v54 = vcombine.high %v1262_v12, %v1266_v37 }
 0x296   :  { %v9284_v52 = vadd.f32 %v4139_v45, %v4099_v44  ;;  %4465 = vmatprep.mubr.bf16.mxu1 %v9234_v34  ;;  %v4101_v53 = vadd.f32 %v4100_v47, %v9278_v63  ;;  %4394 = vmatprep.subr.bf16.mxu0 %v7630_v35  ;;  %v1138_v35 = vld [vmem:[#allocation10 + $0x870] sm:$0xff] }
 0x297   :  { %v4102_v0 = vpop.f32.mrf.mxu0  ;;  %4435 = vmatprep.subr.bf16.mxu1 %v7758_v40  ;;  %v4143_v5 = vpop.f32.mrf.mxu1  ;;  %v7725_v40 = vcombine.low %v1270_v27, %v1274_v28  ;;  %v7590_v41 = vcombine.high %v1134_v33, %v1138_v35  ;;  %v1126_v44 = vld [vmem:[#allocation10 + $0x810] sm:$0xff] }
 0x298   :  { %v9288_v4 = vadd.f32 %v4141_v55, %v4101_v53  ;;  %4395 = vmatpush1.bf16.msra.mxu0 %v7629_v46  ;;  %v1130_v45 = vld [vmem:[#allocation10 + $0x830] sm:$0xff] }
 0x299   :  { %4436 = vmatpush1.bf16.msra.mxu1 %v7757_v49  ;;  %v4103_v11 = vpop.f32.mrf.mxu0  ;;  %4396 = vmatprep.subr.bf16.mxu0 %v7622_v20  ;;  %v4144_v63 = vpop.f32.mrf.mxu1  ;;  %v1254_v46 = vld [vmem:[#allocation10 + $0xc10] sm:$0xff]  ;;  %v7589_v49 = vcombine.low %v1134_v33, %v1138_v35  ;;  %v7717_v20 = vcombine.low %v1262_v12, %v1266_v37  ;;  %v7582_v53 = vcombine.high %v1126_v44, %v1130_v45 }
 0x29a   :  { %4437 = vmatprep.subr.bf16.mxu1 %v7750_v61  ;;  %v1258_v47 = vld [vmem:[#allocation10 + $0xc30] sm:$0xff]  ;;  %v7581_v2 = vcombine.low %v1126_v44, %v1130_v45 }
 0x29b   :  { %v7710_v55 = vcombine.high %v1254_v46, %v1258_v47  ;;  %v1246_v61 = vld [vmem:[#allocation10 + $0xbd0] sm:$0xff]  ;;  %v7709_v3 = vcombine.low %v1254_v46, %v1258_v47 }
 0x29c   :  { %4397 = vmatpush1.bf16.msra.mxu0 %v7621_v8  ;;  %v1378_v0 = vld [vmem:[#allocation10 + $0xff0] sm:$0xff]  ;;  %v7702_v5 = vcombine.high %v1246_v61, %v1250_v56 }
 0x29d   :  { %4438 = vmatpush1.bf16.msra.mxu1 %v7749_v13  ;;  %4398 = vmatprep.subr.bf16.mxu0 %v7614_v14  ;;  %v7830_v8 = vcombine.high %v1374_v57, %v1378_v0  ;;  %v1238_v11 = vld [vmem:[#allocation10 + $0xb90] sm:$0xff]  ;;  %v7829_v1 = vcombine.low %v1374_v57, %v1378_v0 }
 0x29e   :  { %4439 = vmatprep.subr.bf16.mxu1 %v7742_v42  ;;  %v1242_v13 = vld [vmem:[#allocation10 + $0xbb0] sm:$0xff]  ;;  %v7701_v42 = vcombine.low %v1246_v61, %v1250_v56 }
 0x29f   :  { %v1366_v14 = vld [vmem:[#allocation10 + $0xf90] sm:$0xff]  ;;  %v7694_v50 = vcombine.high %v1238_v11, %v1242_v13 }
 0x2a0   :  { %4399 = vmatpush1.bf16.msra.mxu0 %v7613_v48  ;;  %v1370_v63 = vld [vmem:[#allocation10 + $0xfb0] sm:$0xff] }
 0x2a1   :  { %4440 = vmatpush1.bf16.msra.mxu1 %v7741_v15  ;;  %4400 = vmatprep.subr.bf16.mxu0 %v7606_v23  ;;  %v7822_v22 = vcombine.high %v1366_v14, %v1370_v63  ;;  %v1230_v43 = vld [vmem:[#allocation10 + $0xb50] sm:$0xff]  ;;  %v7821_v25 = vcombine.low %v1366_v14, %v1370_v63 }
 0x2a2   :  { %4441 = vmatprep.subr.bf16.mxu1 %v7734_v24  ;;  %v1234_v48 = vld [vmem:[#allocation10 + $0xb70] sm:$0xff]  ;;  %v7693_v24 = vcombine.low %v1238_v11, %v1242_v13 }
 0x2a3   :  { %v1358_v15 = vld [vmem:[#allocation10 + $0xf50] sm:$0xff]  ;;  %v7686_v26 = vcombine.high %v1230_v43, %v1234_v48 }
 0x2a4   :  { %4401 = vmatpush1.bf16.msra.mxu0 %v7605_v29  ;;  %v1362_v23 = vld [vmem:[#allocation10 + $0xf70] sm:$0xff] }
 0x2a5   :  { %4442 = vmatpush1.bf16.msra.mxu1 %v7733_v30  ;;  %4402 = vmatprep.subr.bf16.mxu0 %v7598_v32  ;;  %v7814_v27 = vcombine.high %v1358_v15, %v1362_v23  ;;  %v1222_v28 = vld [vmem:[#allocation10 + $0xb10] sm:$0xff]  ;;  %v7813_v33 = vcombine.low %v1358_v15, %v1362_v23  ;;  %v927_v23 = vld [vmem:[#allocation10 + $0x1d8] sm:$0xff] }
 0x2a6   :  { %4443 = vmatprep.subr.bf16.mxu1 %v7726_v17  ;;  %v1226_v29 = vld [vmem:[#allocation10 + $0xb30] sm:$0xff]  ;;  %v7685_v17 = vcombine.low %v1230_v43, %v1234_v48 }
 0x2a7   :  { %v1350_v30 = vld [vmem:[#allocation10 + $0xf10] sm:$0xff]  ;;  %v7678_v35 = vcombine.high %v1222_v28, %v1226_v29 }
 0x2a8   :  { %4403 = vmatpush1.bf16.msra.mxu0 %v7597_v38  ;;  %v1354_v32 = vld [vmem:[#allocation10 + $0xf30] sm:$0xff] }
 0x2a9   :  { %4444 = vmatpush1.bf16.msra.mxu1 %v7725_v40  ;;  %4404 = vmatprep.subr.bf16.mxu0 %v7590_v41  ;;  %v7806_v12 = vcombine.high %v1350_v30, %v1354_v32  ;;  %v1214_v37 = vld [vmem:[#allocation10 + $0xad0] sm:$0xff]  ;;  %v7805_v44 = vcombine.low %v1350_v30, %v1354_v32  ;;  %v919_v32 = vld [vmem:[#allocation10 + $0x198] sm:$0xff] }
 0x2aa   :  { %4445 = vmatprep.subr.bf16.mxu1 %v7718_v54  ;;  %v1218_v38 = vld [vmem:[#allocation10 + $0xaf0] sm:$0xff]  ;;  %v7677_v54 = vcombine.low %v1222_v28, %v1226_v29 }
 0x2ab   :  { %v1342_v40 = vld [vmem:[#allocation10 + $0xed0] sm:$0xff]  ;;  %v7670_v45 = vcombine.high %v1214_v37, %v1218_v38 }
 0x2ac   :  { %4405 = vmatpush1.bf16.msra.mxu0 %v7589_v49  ;;  %v1346_v41 = vld [vmem:[#allocation10 + $0xef0] sm:$0xff] }
 0x2ad   :  { %4446 = vmatpush1.bf16.msra.mxu1 %v7717_v20  ;;  %4406 = vmatprep.subr.bf16.mxu0 %v7582_v53  ;;  %v7798_v46 = vcombine.high %v1342_v40, %v1346_v41  ;;  %v1206_v47 = vld [vmem:[#allocation10 + $0xa90] sm:$0xff]  ;;  %v7797_v61 = vcombine.low %v1342_v40, %v1346_v41  ;;  %v1397_v40 = vrot.slane %v9266_v51, %v9178_v21 }
 0x2ae   :  { %4447 = vmatprep.subr.bf16.mxu1 %v7710_v55  ;;  %v1210_v49 = vld [vmem:[#allocation10 + $0xab0] sm:$0xff]  ;;  %v7669_v55 = vcombine.low %v1214_v37, %v1218_v38  ;;  %v1051_v37 = vld [vmem:[#allocation10 + $0x5b8] sm:$0xff] }
 0x2af   :  { %v1334_v20 = vld [vmem:[#allocation10 + $0xe90] sm:$0xff]  ;;  %v7662_v56 = vcombine.high %v1206_v47, %v1210_v49 }
 0x2b0   :  { %4407 = vmatpush1.bf16.msra.mxu0 %v7581_v2  ;;  %v1338_v53 = vld [vmem:[#allocation10 + $0xeb0] sm:$0xff] }
 0x2b1   :  { %4448 = vmatpush1.bf16.msra.mxu1 %v7709_v3  ;;  %4408 = vmatprep.subr.bf16.mxu0 %v7702_v5  ;;  %v7790_v57 = vcombine.high %v1334_v20, %v1338_v53  ;;  %v1198_v0 = vld [vmem:[#allocation10 + $0xa50] sm:$0xff]  ;;  %v7789_v11 = vcombine.low %v1334_v20, %v1338_v53 }
 0x2b2   :  { %4449 = vmatprep.subr.bf16.mxu1 %v7830_v8  ;;  %v1202_v2 = vld [vmem:[#allocation10 + $0xa70] sm:$0xff]  ;;  %v7661_v8 = vcombine.low %v1206_v47, %v1210_v49  ;;  %v1039_v47 = vld [vmem:[#allocation10 + $0x558] sm:$0xff] }
 0x2b3   :  { %v1326_v3 = vld [vmem:[#allocation10 + $0xe50] sm:$0xff]  ;;  %v7654_v13 = vcombine.high %v1198_v0, %v1202_v2  ;;  %v1043_v49 = vld [vmem:[#allocation10 + $0x578] sm:$0xff] }
 0x2b4   :  { %4409 = vmatpush2.bf16.msra.mxu0 %v7701_v42  ;;  %v1330_v5 = vld [vmem:[#allocation10 + $0xe70] sm:$0xff] }
 0x2b5   :  { %4450 = vmatpush2.bf16.msra.mxu1 %v7829_v1  ;;  %4410 = vmatprep.subr.bf16.mxu0 %v7694_v50  ;;  %v7782_v14 = vcombine.high %v1326_v3, %v1330_v5  ;;  %v1190_v63 = vld [vmem:[#allocation10 + $0xa10] sm:$0xff]  ;;  %v7781_v43 = vcombine.low %v1326_v3, %v1330_v5  ;;  %v7496_v3 = vcombine.high %v1039_v47, %v1043_v49  ;;  %v903_v5 = vld [vmem:[#allocation10 + $0x118] sm:$0xff] }
 0x2b6   :  { %4451 = vmatprep.subr.bf16.mxu1 %v7822_v22  ;;  %v1194_v42 = vld [vmem:[#allocation10 + $0xa30] sm:$0xff]  ;;  %v7653_v22 = vcombine.low %v1198_v0, %v1202_v2 }
 0x2b7   :  { %v1318_v1 = vld [vmem:[#allocation10 + $0xe10] sm:$0xff]  ;;  %v7646_v48 = vcombine.high %v1190_v63, %v1194_v42 }
 0x2b8   :  { %4411 = vmatpush2.bf16.msra.mxu0 %v7693_v24  ;;  %v1322_v50 = vld [vmem:[#allocation10 + $0xe30] sm:$0xff]  ;;  %v931_v24 = vld [vmem:[#allocation10 + $0x1f8] sm:$0xff] }
 0x2b9   :  { %4452 = vmatpush2.bf16.msra.mxu1 %v7821_v25  ;;  %4412 = vmatprep.subr.bf16.mxu0 %v7686_v26  ;;  %v7774_v15 = vcombine.high %v1318_v1, %v1322_v50  ;;  %v1055_v25 = vld [vmem:[#allocation10 + $0x5d8] sm:$0xff]  ;;  %v7773_v28 = vcombine.low %v1318_v1, %v1322_v50  ;;  %v7384_v29 = vcombine.high %v927_v23, %v931_v24 }
 0x2ba   :  { %4453 = vmatprep.subr.bf16.mxu1 %v7814_v27  ;;  %v1059_v26 = vld [vmem:[#allocation10 + $0x5f8] sm:$0xff]  ;;  %v7645_v27 = vcombine.low %v1190_v63, %v1194_v42  ;;  %v7495_v50 = vcombine.low %v1039_v47, %v1043_v49 }
 0x2bb   :  { %v7512_v30 = vcombine.high %v1055_v25, %v1059_v26  ;;  %v7511_v38 = vcombine.low %v1055_v25, %v1059_v26  ;;  %v871_v49 = vld [vmem:[#allocation10 + $0x18] sm:$0xff] }
 0x2bc   :  { %4413 = vmatpush2.bf16.msra.mxu0 %v7685_v17  ;;  %v923_v17 = vld [vmem:[#allocation10 + $0x1b8] sm:$0xff] }
 0x2bd   :  { %4454 = vmatpush2.bf16.msra.mxu1 %v7813_v33  ;;  %4414 = vmatprep.subr.bf16.mxu0 %v7678_v35  ;;  %v1393_v33 = vrot.slane %v9266_v51, %v9170_v18  ;;  %v7383_v35 = vcombine.low %v927_v23, %v931_v24  ;;  %v7376_v41 = vcombine.high %v919_v32, %v923_v17  ;;  %v1023_v23 = vld [vmem:[#allocation10 + $0x4d8] sm:$0xff] }
 0x2be   :  { %4455 = vmatprep.subr.bf16.mxu1 %v7806_v12  ;;  %v1047_v12 = vld [vmem:[#allocation10 + $0x598] sm:$0xff] }
 0x2bf   :  { %v7503_v51 = vcombine.low %v1047_v12, %v1051_v37  ;;  %v1027_v24 = vld [vmem:[#allocation10 + $0x4f8] sm:$0xff] }
 0x2c0   :  { %4415 = vmatpush2.bf16.msra.mxu0 %v7677_v54  ;;  %v911_v54 = vld [vmem:[#allocation10 + $0x158] sm:$0xff] }
 0x2c1   :  { %4456 = vmatpush2.bf16.msra.mxu1 %v7805_v44  ;;  %4416 = vmatprep.subr.bf16.mxu0 %v7670_v45  ;;  %v915_v44 = vld [vmem:[#allocation10 + $0x178] sm:$0xff] }
 0x2c2   :  { %4457 = vmatprep.subr.bf16.mxu1 %v7798_v46  ;;  %v7504_v46 = vcombine.high %v1047_v12, %v1051_v37  ;;  %v7367_v42 = vcombine.low %v911_v54, %v915_v44 }
 0x2c4   :  { %4417 = vmatpush2.bf16.msra.mxu0 %v7669_v55  ;;  %v7375_v55 = vcombine.low %v919_v32, %v923_v17  ;;  %v1015_v32 = vld [vmem:[#allocation10 + $0x498] sm:$0xff] }
 0x2c5   :  { %4458 = vmatpush2.bf16.msra.mxu1 %v7797_v61  ;;  %4418 = vmatprep.subr.bf16.mxu0 %v7662_v56  ;;  %v7368_v56 = vcombine.high %v911_v54, %v915_v44  ;;  %v1019_v17 = vld [vmem:[#allocation10 + $0x4b8] sm:$0xff] }
 0x2c6   :  { %4459 = vmatprep.subr.bf16.mxu1 %v7790_v57  ;;  %v7472_v37 = vcombine.high %v1015_v32, %v1019_v17  ;;  %v1011_v54 = vld [vmem:[#allocation10 + $0x478] sm:$0xff] }
 0x2c8   :  { %4419 = vmatpush2.bf16.msra.mxu0 %v7661_v8  ;;  %v907_v8 = vld [vmem:[#allocation10 + $0x138] sm:$0xff] }
 0x2c9   :  { %4460 = vmatpush2.bf16.msra.mxu1 %v7789_v11  ;;  %4420 = vmatprep.subr.bf16.mxu0 %v7654_v13  ;;  %v1031_v13 = vld [vmem:[#allocation10 + $0x518] sm:$0xff]  ;;  %v7359_v25 = vcombine.low %v903_v5, %v907_v8 }
 0x2ca   :  { %4461 = vmatprep.subr.bf16.mxu1 %v7782_v14  ;;  %v1035_v14 = vld [vmem:[#allocation10 + $0x538] sm:$0xff] }
 0x2cb   :  { %v7487_v26 = vcombine.low %v1031_v13, %v1035_v14 }
 0x2cc   :  { %4421 = vmatpush2.bf16.msra.mxu0 %v7653_v22 }
 0x2cd   :  { %4462 = vmatpush2.bf16.msra.mxu1 %v7781_v43  ;;  %4422 = vmatprep.subr.bf16.mxu0 %v7646_v48  ;;  %v7488_v43 = vcombine.high %v1031_v13, %v1035_v14  ;;  %v895_v48 = vld [vmem:[#allocation10 + $0xd8] sm:$0xff] }
 0x2ce   :  { %4463 = vmatprep.subr.bf16.mxu1 %v7774_v15  ;;  %v899_v15 = vld [vmem:[#allocation10 + $0xf8] sm:$0xff] }
 0x2d0   :  { %4423 = vmatpush2.bf16.msra.mxu0 %v7645_v27  ;;  %v7352_v27 = vcombine.high %v895_v48, %v899_v15 }
 0x2d1   :  { %4464 = vmatpush2.bf16.msra.mxu1 %v7773_v28  ;;  %4474 = vmatprep.subr.bf16.mxu0 %v7384_v29  ;;  %v7480_v28 = vcombine.high %v1023_v23, %v1027_v24  ;;  %v887_v29 = vld [vmem:[#allocation10 + $0x98] sm:$0xff] }
 0x2d2   :  { %4515 = vmatprep.subr.bf16.mxu1 %v7512_v30  ;;  %v891_v30 = vld [vmem:[#allocation10 + $0xb8] sm:$0xff] }
 0x2d3   :  { %v4180_v45 = vpop.f32.mrf.mxu0  ;;  %4425 = vmatmul.mubr.bf16.vlgmr.msra.gmra.mxu0 %v9254_v6  ;;  %v7344_v12 = vcombine.high %v887_v29, %v891_v30  ;;  %v7343_v44 = vcombine.low %v887_v29, %v891_v30 }
 0x2d4   :  { %v4181_v20 = vadd.f32 %v4180_v45, %v1393_v33  ;;  %v4221_v53 = vpop.f32.mrf.mxu1  ;;  %4466 = vmatmul.mubr.bf16.vlgmr.msra.gmra.mxu1 %v9256_v9  ;;  %4475 = vmatpush1.bf16.msra.mxu0 %v7383_v35  ;;  %v7351_v33 = vcombine.low %v895_v48, %v899_v15  ;;  %v7479_v35 = vcombine.low %v1023_v23, %v1027_v24  ;;  %v975_v23 = vld [vmem:[#allocation10 + $0x358] sm:$0xff] }
 0x2d5   :  { %4506 = vmatprep.mubr.bf16.mxu0 %v9196_v58  ;;  %4516 = vmatpush1.bf16.msra.mxu1 %v7511_v38  ;;  %v4182_v61 = vpop.f32.mrf.mxu0  ;;  %v879_v38 = vld [vmem:[#allocation10 + $0x58] sm:$0xff]  ;;  %v7471_v45 = vcombine.low %v1015_v32, %v1019_v17 }
 0x2d6   :  { %v9297_v57 = vadd.f32 %v4221_v53, %v4181_v20  ;;  %4547 = vmatprep.mubr.bf16.mxu1 %v9200_v60  ;;  %v4183_v0 = vadd.f32 %v4182_v61, %v1397_v40  ;;  %v4223_v2 = vpop.f32.mrf.mxu1  ;;  %4476 = vmatprep.subr.bf16.mxu0 %v7376_v41  ;;  %v7360_v60 = vcombine.high %v903_v5, %v907_v8  ;;  %v883_v40 = vld [vmem:[#allocation10 + $0x78] sm:$0xff] }
 0x2d7   :  { %v4184_v11 = vpop.f32.mrf.mxu0  ;;  %4517 = vmatprep.subr.bf16.mxu1 %v7504_v46  ;;  %v1007_v41 = vld [vmem:[#allocation10 + $0x458] sm:$0xff]  ;;  %v7336_v46 = vcombine.high %v879_v38, %v883_v40  ;;  %v7335_v61 = vcombine.low %v879_v38, %v883_v40 }
 0x2d8   :  { %v9300_v63 = vadd.f32 %v4223_v2, %v4183_v0  ;;  %v4225_v58 = vpop.f32.mrf.mxu1  ;;  %4477 = vmatpush1.bf16.msra.mxu0 %v7375_v55  ;;  %v7464_v47 = vcombine.high %v1007_v41, %v1011_v54  ;;  %v875_v20 = vld [vmem:[#allocation10 + $0x38] sm:$0xff] }
 0x2d9   :  { %4518 = vmatpush1.bf16.msra.mxu1 %v7503_v51  ;;  %v4185_v1 = vpop.f32.mrf.mxu0  ;;  %4478 = vmatprep.subr.bf16.mxu0 %v7368_v56  ;;  %v999_v53 = vld [vmem:[#allocation10 + $0x418] sm:$0xff]  ;;  %v7463_v51 = vcombine.low %v1007_v41, %v1011_v54  ;;  %v7328_v56 = vcombine.high %v871_v49, %v875_v20  ;;  %v7327_v11 = vcombine.low %v871_v49, %v875_v20 }
 0x2da   :  { %v4226_v22 = vpop.f32.mrf.mxu1  ;;  %4519 = vmatprep.subr.bf16.mxu1 %v7496_v3  ;;  %v1003_v55 = vld [vmem:[#allocation10 + $0x438] sm:$0xff] }
 0x2db   :  { %v7456_v0 = vcombine.high %v999_v53, %v1003_v55  ;;  %v991_v2 = vld [vmem:[#allocation10 + $0x3d8] sm:$0xff]  ;;  %v7455_v13 = vcombine.low %v999_v53, %v1003_v55 }
 0x2dc   :  { %4479 = vmatpush1.bf16.msra.mxu0 %v7367_v42  ;;  %v995_v3 = vld [vmem:[#allocation10 + $0x3f8] sm:$0xff] }
 0x2dd   :  { %4520 = vmatpush1.bf16.msra.mxu1 %v7495_v50  ;;  %4480 = vmatprep.subr.bf16.mxu0 %v7360_v60  ;;  %v1119_v5 = vld [vmem:[#allocation10 + $0x7d8] sm:$0xff]  ;;  %v7448_v14 = vcombine.high %v991_v2, %v995_v3  ;;  %v7447_v22 = vcombine.low %v991_v2, %v995_v3 }
 0x2de   :  { %4521 = vmatprep.subr.bf16.mxu1 %v7488_v43  ;;  %v1123_v8 = vld [vmem:[#allocation10 + $0x7f8] sm:$0xff] }
 0x2df   :  { %v7576_v58 = vcombine.high %v1119_v5, %v1123_v8  ;;  %v983_v42 = vld [vmem:[#allocation10 + $0x398] sm:$0xff]  ;;  %v7575_v43 = vcombine.low %v1119_v5, %v1123_v8 }
 0x2e0   :  { %4481 = vmatpush1.bf16.msra.mxu0 %v7359_v25  ;;  %v987_v1 = vld [vmem:[#allocation10 + $0x3b8] sm:$0xff] }
 0x2e1   :  { %4522 = vmatpush1.bf16.msra.mxu1 %v7487_v26  ;;  %4482 = vmatprep.subr.bf16.mxu0 %v7352_v27  ;;  %v1111_v50 = vld [vmem:[#allocation10 + $0x798] sm:$0xff]  ;;  %v7440_v48 = vcombine.high %v983_v42, %v987_v1  ;;  %v7439_v27 = vcombine.low %v983_v42, %v987_v1 }
 0x2e2   :  { %4523 = vmatprep.subr.bf16.mxu1 %v7480_v28  ;;  %v1115_v60 = vld [vmem:[#allocation10 + $0x7b8] sm:$0xff] }
 0x2e3   :  { %v7568_v15 = vcombine.high %v1111_v50, %v1115_v60  ;;  %v979_v24 = vld [vmem:[#allocation10 + $0x378] sm:$0xff]  ;;  %v7567_v28 = vcombine.low %v1111_v50, %v1115_v60 }
 0x2e4   :  { %4483 = vmatpush1.bf16.msra.mxu0 %v7351_v33  ;;  %v1103_v25 = vld [vmem:[#allocation10 + $0x758] sm:$0xff]  ;;  %v7432_v29 = vcombine.high %v975_v23, %v979_v24 }
 0x2e5   :  { %4524 = vmatpush1.bf16.msra.mxu1 %v7479_v35  ;;  %4484 = vmatprep.subr.bf16.mxu0 %v7344_v12  ;;  %v1107_v26 = vld [vmem:[#allocation10 + $0x778] sm:$0xff]  ;;  %v7431_v12 = vcombine.low %v975_v23, %v979_v24 }
 0x2e6   :  { %4525 = vmatprep.subr.bf16.mxu1 %v7472_v37  ;;  %v7560_v30 = vcombine.high %v1103_v25, %v1107_v26  ;;  %v967_v32 = vld [vmem:[#allocation10 + $0x318] sm:$0xff]  ;;  %v7559_v37 = vcombine.low %v1103_v25, %v1107_v26 }
 0x2e7   :  { %v971_v17 = vld [vmem:[#allocation10 + $0x338] sm:$0xff] }
 0x2e8   :  { %4485 = vmatpush1.bf16.msra.mxu0 %v7343_v44  ;;  %v1095_v33 = vld [vmem:[#allocation10 + $0x718] sm:$0xff]  ;;  %v7424_v38 = vcombine.high %v967_v32, %v971_v17 }
 0x2e9   :  { %4526 = vmatpush1.bf16.msra.mxu1 %v7471_v45  ;;  %4486 = vmatprep.subr.bf16.mxu0 %v7336_v46  ;;  %v1099_v35 = vld [vmem:[#allocation10 + $0x738] sm:$0xff]  ;;  %v7423_v46 = vcombine.low %v967_v32, %v971_v17 }
 0x2ea   :  { %4527 = vmatprep.subr.bf16.mxu1 %v7464_v47  ;;  %v7552_v40 = vcombine.high %v1095_v33, %v1099_v35  ;;  %v959_v41 = vld [vmem:[#allocation10 + $0x2d8] sm:$0xff]  ;;  %v7551_v47 = vcombine.low %v1095_v33, %v1099_v35 }
 0x2eb   :  { %v963_v54 = vld [vmem:[#allocation10 + $0x2f8] sm:$0xff] }
 0x2ec   :  { %4487 = vmatpush1.bf16.msra.mxu0 %v7335_v61  ;;  %v1087_v44 = vld [vmem:[#allocation10 + $0x6d8] sm:$0xff]  ;;  %v7416_v49 = vcombine.high %v959_v41, %v963_v54 }
 0x2ed   :  { %4528 = vmatpush1.bf16.msra.mxu1 %v7463_v51  ;;  %4488 = vmatprep.subr.bf16.mxu0 %v7328_v56  ;;  %v1091_v45 = vld [vmem:[#allocation10 + $0x6f8] sm:$0xff]  ;;  %v7415_v56 = vcombine.low %v959_v41, %v963_v54 }
 0x2ee   :  { %4529 = vmatprep.subr.bf16.mxu1 %v7456_v0  ;;  %v7544_v20 = vcombine.high %v1087_v44, %v1091_v45  ;;  %v951_v53 = vld [vmem:[#allocation10 + $0x298] sm:$0xff]  ;;  %v7543_v0 = vcombine.low %v1087_v44, %v1091_v45 }
 0x2ef   :  { %v955_v55 = vld [vmem:[#allocation10 + $0x2b8] sm:$0xff] }
 0x2f0   :  { %4489 = vmatpush1.bf16.msra.mxu0 %v7327_v11  ;;  %v1079_v61 = vld [vmem:[#allocation10 + $0x698] sm:$0xff]  ;;  %v7408_v2 = vcombine.high %v951_v53, %v955_v55 }
 0x2f1   :  { %4530 = vmatpush1.bf16.msra.mxu1 %v7455_v13  ;;  %4490 = vmatprep.subr.bf16.mxu0 %v7448_v14  ;;  %v1083_v51 = vld [vmem:[#allocation10 + $0x6b8] sm:$0xff]  ;;  %v7407_v14 = vcombine.low %v951_v53, %v955_v55 }
 0x2f2   :  { %4531 = vmatprep.subr.bf16.mxu1 %v7576_v58  ;;  %v7536_v3 = vcombine.high %v1079_v61, %v1083_v51  ;;  %v943_v5 = vld [vmem:[#allocation10 + $0x258] sm:$0xff]  ;;  %v7535_v58 = vcombine.low %v1079_v61, %v1083_v51 }
 0x2f3   :  { %v947_v8 = vld [vmem:[#allocation10 + $0x278] sm:$0xff] }
 0x2f4   :  { %4491 = vmatpush2.bf16.msra.mxu0 %v7447_v22  ;;  %v1071_v11 = vld [vmem:[#allocation10 + $0x658] sm:$0xff]  ;;  %v7400_v42 = vcombine.high %v943_v5, %v947_v8 }
 0x2f5   :  { %4532 = vmatpush2.bf16.msra.mxu1 %v7575_v43  ;;  %4492 = vmatprep.subr.bf16.mxu0 %v7440_v48  ;;  %v1075_v13 = vld [vmem:[#allocation10 + $0x678] sm:$0xff]  ;;  %v7399_v48 = vcombine.low %v943_v5, %v947_v8 }
 0x2f6   :  { %4533 = vmatprep.subr.bf16.mxu1 %v7568_v15  ;;  %v7528_v1 = vcombine.high %v1071_v11, %v1075_v13  ;;  %v935_v50 = vld [vmem:[#allocation10 + $0x218] sm:$0xff]  ;;  %v7527_v15 = vcombine.low %v1071_v11, %v1075_v13 }
 0x2f7   :  { %v939_v60 = vld [vmem:[#allocation10 + $0x238] sm:$0xff] }
 0x2f8   :  { %4493 = vmatpush2.bf16.msra.mxu0 %v7439_v27  ;;  %v1063_v22 = vld [vmem:[#allocation10 + $0x618] sm:$0xff]  ;;  %v7392_v23 = vcombine.high %v935_v50, %v939_v60 }
 0x2f9   :  { %4534 = vmatpush2.bf16.msra.mxu1 %v7567_v28  ;;  %4494 = vmatprep.subr.bf16.mxu0 %v7432_v29  ;;  %v1067_v43 = vld [vmem:[#allocation10 + $0x638] sm:$0xff]  ;;  %v7391_v29 = vcombine.low %v935_v50, %v939_v60 }
 0x2fa   :  { %4535 = vmatprep.subr.bf16.mxu1 %v7560_v30  ;;  %v7520_v24 = vcombine.high %v1063_v22, %v1067_v43  ;;  %v1183_v25 = vld [vmem:[#allocation10 + $0x9d8] sm:$0xff]  ;;  %v7519_v30 = vcombine.low %v1063_v22, %v1067_v43 }
 0x2fb   :  { %v1187_v26 = vld [vmem:[#allocation10 + $0x9f8] sm:$0xff] }
 0x2fc   :  { %4495 = vmatpush2.bf16.msra.mxu0 %v7431_v12  ;;  %v1311_v27 = vld [vmem:[#allocation10 + $0xdd8] sm:$0xff]  ;;  %v7640_v32 = vcombine.high %v1183_v25, %v1187_v26  ;;  %v7639_v12 = vcombine.low %v1183_v25, %v1187_v26 }
 0x2fd   :  { %4536 = vmatpush2.bf16.msra.mxu1 %v7559_v37  ;;  %4496 = vmatprep.subr.bf16.mxu0 %v7424_v38  ;;  %v1315_v28 = vld [vmem:[#allocation10 + $0xdf8] sm:$0xff] }
 0x2fe   :  { %4537 = vmatprep.subr.bf16.mxu1 %v7552_v40  ;;  %v7768_v17 = vcombine.high %v1311_v27, %v1315_v28  ;;  %v1175_v33 = vld [vmem:[#allocation10 + $0x998] sm:$0xff]  ;;  %v7767_v40 = vcombine.low %v1311_v27, %v1315_v28 }
 0x2ff   :  { %v1179_v35 = vld [vmem:[#allocation10 + $0x9b8] sm:$0xff] }
 0x300   :  { %4497 = vmatpush2.bf16.msra.mxu0 %v7423_v46  ;;  %v1303_v37 = vld [vmem:[#allocation10 + $0xd98] sm:$0xff]  ;;  %v7632_v41 = vcombine.high %v1175_v33, %v1179_v35  ;;  %v7631_v55 = vcombine.low %v1175_v33, %v1179_v35 }
 0x301   :  { %4538 = vmatpush2.bf16.msra.mxu1 %v7551_v47  ;;  %4498 = vmatprep.subr.bf16.mxu0 %v7416_v49  ;;  %v1307_v38 = vld [vmem:[#allocation10 + $0xdb8] sm:$0xff] }
 0x302   :  { %4539 = vmatprep.subr.bf16.mxu1 %v7544_v20  ;;  %v1167_v54 = vld [vmem:[#allocation10 + $0x958] sm:$0xff]  ;;  %v7760_v46 = vcombine.high %v1303_v37, %v1307_v38  ;;  %v7759_v51 = vcombine.low %v1303_v37, %v1307_v38 }
 0x303   :  { %v1171_v44 = vld [vmem:[#allocation10 + $0x978] sm:$0xff] }
 0x304   :  { %4499 = vmatpush2.bf16.msra.mxu0 %v7415_v56  ;;  %v1295_v47 = vld [vmem:[#allocation10 + $0xd58] sm:$0xff]  ;;  %v7624_v56 = vcombine.high %v1167_v54, %v1171_v44  ;;  %v7623_v11 = vcombine.low %v1167_v54, %v1171_v44 }
 0x305   :  { %4540 = vmatpush2.bf16.msra.mxu1 %v7543_v0  ;;  %4500 = vmatprep.subr.bf16.mxu0 %v7408_v2  ;;  %v1299_v49 = vld [vmem:[#allocation10 + $0xd78] sm:$0xff] }
 0x306   :  { %4541 = vmatprep.subr.bf16.mxu1 %v7536_v3  ;;  %v1159_v2 = vld [vmem:[#allocation10 + $0x918] sm:$0xff] }
 0x307   :  { %v1163_v3 = vld [vmem:[#allocation10 + $0x938] sm:$0xff] }
 0x308   :  { %4501 = vmatpush2.bf16.msra.mxu0 %v7407_v14  ;;  %v1287_v5 = vld [vmem:[#allocation10 + $0xd18] sm:$0xff]  ;;  %v7751_v14 = vcombine.low %v1295_v47, %v1299_v49  ;;  %v7615_v43 = vcombine.low %v1159_v2, %v1163_v3 }
 0x309   :  { %4542 = vmatpush2.bf16.msra.mxu1 %v7535_v58  ;;  %4502 = vmatprep.subr.bf16.mxu0 %v7400_v42  ;;  %v1291_v8 = vld [vmem:[#allocation10 + $0xd38] sm:$0xff]  ;;  %v7616_v58 = vcombine.high %v1159_v2, %v1163_v3 }
 0x30a   :  { %4543 = vmatprep.subr.bf16.mxu1 %v7528_v1  ;;  %v1151_v1 = vld [vmem:[#allocation10 + $0x8d8] sm:$0xff] }
 0x30b   :  { %v1155_v50 = vld [vmem:[#allocation10 + $0x8f8] sm:$0xff] }
 0x30c   :  { %4503 = vmatpush2.bf16.msra.mxu0 %v7399_v48  ;;  %v1279_v60 = vld [vmem:[#allocation10 + $0xcd8] sm:$0xff]  ;;  %v7743_v48 = vcombine.low %v1287_v5, %v1291_v8  ;;  %v7607_v28 = vcombine.low %v1151_v1, %v1155_v50 }
 0x30d   :  { %4544 = vmatpush2.bf16.msra.mxu1 %v7527_v15  ;;  %4504 = vmatprep.subr.bf16.mxu0 %v7392_v23  ;;  %v1283_v22 = vld [vmem:[#allocation10 + $0xcf8] sm:$0xff]  ;;  %v7608_v15 = vcombine.high %v1151_v1, %v1155_v50 }
 0x30e   :  { %4545 = vmatprep.subr.bf16.mxu1 %v7520_v24  ;;  %v7736_v23 = vcombine.high %v1279_v60, %v1283_v22  ;;  %v1143_v24 = vld [vmem:[#allocation10 + $0x898] sm:$0xff] }
 0x30f   :  { %v1147_v25 = vld [vmem:[#allocation10 + $0x8b8] sm:$0xff] }
 0x310   :  { %4505 = vmatpush2.bf16.msra.mxu0 %v7391_v29  ;;  %v1271_v26 = vld [vmem:[#allocation10 + $0xc98] sm:$0xff]  ;;  %v7735_v29 = vcombine.low %v1279_v60, %v1283_v22  ;;  %v7599_v37 = vcombine.low %v1143_v24, %v1147_v25 }
 0x311   :  { %4546 = vmatpush2.bf16.msra.mxu1 %v7519_v30  ;;  %4556 = vmatprep.subr.bf16.mxu0 %v7640_v32  ;;  %v1275_v27 = vld [vmem:[#allocation10 + $0xcb8] sm:$0xff]  ;;  %v7600_v30 = vcombine.high %v1143_v24, %v1147_v25 }
 0x312   :  { %4597 = vmatprep.subr.bf16.mxu1 %v7768_v17  ;;  %v7728_v32 = vcombine.high %v1271_v26, %v1275_v27  ;;  %v1135_v17 = vld [vmem:[#allocation10 + $0x858] sm:$0xff]  ;;  %v7727_v38 = vcombine.low %v1271_v26, %v1275_v27 }
 0x313   :  { %v4262_v45 = vpop.f32.mrf.mxu0  ;;  %4507 = vmatmul.mubr.bf16.vlgmr.msra.gmra.mxu0 %v9198_v59  ;;  %v1139_v33 = vld [vmem:[#allocation10 + $0x878] sm:$0xff] }
 0x314   :  { %v4263_v20 = vadd.f32 %v4262_v45, %v9297_v57  ;;  %v4303_v53 = vpop.f32.mrf.mxu1  ;;  %4548 = vmatmul.mubr.bf16.vlgmr.msra.gmra.mxu1 %v9202_v62  ;;  %4557 = vmatpush1.bf16.msra.mxu0 %v7639_v12  ;;  %v7752_v57 = vcombine.high %v1295_v47, %v1299_v49  ;;  %v1263_v35 = vld [vmem:[#allocation10 + $0xc58] sm:$0xff]  ;;  %v7591_v47 = vcombine.low %v1135_v17, %v1139_v33 }
 0x315   :  { %4588 = vmatprep.mubr.bf16.mxu0 %v9232_v31  ;;  %4598 = vmatpush1.bf16.msra.mxu1 %v7767_v40  ;;  %v9306_v61 = vpop.f32.mrf.mxu0  ;;  %v1267_v12 = vld [vmem:[#allocation10 + $0xc78] sm:$0xff]  ;;  %v7592_v40 = vcombine.high %v1135_v17, %v1139_v33 }
 0x316   :  { %v9308_v0 = vadd.f32 %v4303_v53, %v4263_v20  ;;  %4629 = vmatprep.mubr.bf16.mxu1 %v9234_v34  ;;  %v9311_v59 = vpop.f32.mrf.mxu1  ;;  %4558 = vmatprep.subr.bf16.mxu0 %v7632_v41  ;;  %v7744_v34 = vcombine.high %v1287_v5, %v1291_v8  ;;  %v7720_v41 = vcombine.high %v1263_v35, %v1267_v12  ;;  %v1127_v54 = vld [vmem:[#allocation10 + $0x818] sm:$0xff] }
 0x317   :  { %v4266_v62 = vpop.f32.mrf.mxu0  ;;  %4599 = vmatprep.subr.bf16.mxu1 %v7760_v46  ;;  %v1131_v44 = vld [vmem:[#allocation10 + $0x838] sm:$0xff]  ;;  %v7719_v49 = vcombine.low %v1263_v35, %v1267_v12 }
 0x318   :  { %v4307_v31 = vpop.f32.mrf.mxu1  ;;  %4559 = vmatpush1.bf16.msra.mxu0 %v7631_v55  ;;  %v1255_v45 = vld [vmem:[#allocation10 + $0xc18] sm:$0xff]  ;;  %v7584_v20 = vcombine.high %v1127_v54, %v1131_v44  ;;  %v7583_v2 = vcombine.low %v1127_v54, %v1131_v44 }
 0x319   :  { %4600 = vmatpush1.bf16.msra.mxu1 %v7759_v51  ;;  %v4267_v13 = vpop.f32.mrf.mxu0  ;;  %4560 = vmatprep.subr.bf16.mxu0 %v7624_v56  ;;  %v1259_v46 = vld [vmem:[#allocation10 + $0xc38] sm:$0xff] }
 0x31a   :  { %v4308_v42 = vpop.f32.mrf.mxu1  ;;  %4601 = vmatprep.subr.bf16.mxu1 %v7752_v57  ;;  %v7712_v53 = vcombine.high %v1255_v45, %v1259_v46  ;;  %v1247_v55 = vld [vmem:[#allocation10 + $0xbd8] sm:$0xff]  ;;  %v7711_v3 = vcombine.low %v1255_v45, %v1259_v46 }
 0x31b   :  { %v1251_v51 = vld [vmem:[#allocation10 + $0xbf8] sm:$0xff] }
 0x31c   :  { %4561 = vmatpush1.bf16.msra.mxu0 %v7623_v11  ;;  %v1375_v56 = vld [vmem:[#allocation10 + $0xfd8] sm:$0xff]  ;;  %v7704_v62 = vcombine.high %v1247_v55, %v1251_v51 }
 0x31d   :  { %4602 = vmatpush1.bf16.msra.mxu1 %v7751_v14  ;;  %4562 = vmatprep.subr.bf16.mxu0 %v7616_v58  ;;  %v1379_v57 = vld [vmem:[#allocation10 + $0xff8] sm:$0xff]  ;;  %v7703_v14 = vcombine.low %v1247_v55, %v1251_v51 }
 0x31e   :  { %4603 = vmatprep.subr.bf16.mxu1 %v7744_v34  ;;  %v7832_v5 = vcombine.high %v1375_v56, %v1379_v57  ;;  %v1239_v8 = vld [vmem:[#allocation10 + $0xb98] sm:$0xff]  ;;  %v7831_v58 = vcombine.low %v1375_v56, %v1379_v57 }
 0x31f   :  { %v1243_v31 = vld [vmem:[#allocation10 + $0xbb8] sm:$0xff] }
 0x320   :  { %4563 = vmatpush1.bf16.msra.mxu0 %v7615_v43  ;;  %v1367_v11 = vld [vmem:[#allocation10 + $0xf98] sm:$0xff]  ;;  %v7696_v42 = vcombine.high %v1239_v8, %v1243_v31  ;;  %v7695_v43 = vcombine.low %v1239_v8, %v1243_v31 }
 0x321   :  { %4604 = vmatpush1.bf16.msra.mxu1 %v7743_v48  ;;  %4564 = vmatprep.subr.bf16.mxu0 %v7608_v15  ;;  %v1371_v13 = vld [vmem:[#allocation10 + $0xfb8] sm:$0xff] }
 0x322   :  { %4605 = vmatprep.subr.bf16.mxu1 %v7736_v23  ;;  %v7824_v34 = vcombine.high %v1367_v11, %v1371_v13  ;;  %v1231_v1 = vld [vmem:[#allocation10 + $0xb58] sm:$0xff]  ;;  %v7823_v48 = vcombine.low %v1367_v11, %v1371_v13 }
 0x323   :  { %v1235_v50 = vld [vmem:[#allocation10 + $0xb78] sm:$0xff] }
 0x324   :  { %4565 = vmatpush1.bf16.msra.mxu0 %v7607_v28  ;;  %v1359_v60 = vld [vmem:[#allocation10 + $0xf58] sm:$0xff]  ;;  %v7688_v15 = vcombine.high %v1231_v1, %v1235_v50  ;;  %v7687_v28 = vcombine.low %v1231_v1, %v1235_v50  ;;  %v4639_v1 = vmul.f32 0.01, %v9288_v4 }
 0x325   :  { %4606 = vmatpush1.bf16.msra.mxu1 %v7735_v29  ;;  %4566 = vmatprep.subr.bf16.mxu0 %v7600_v30  ;;  %v1363_v22 = vld [vmem:[#allocation10 + $0xf78] sm:$0xff] }
 0x326   :  { %4607 = vmatprep.subr.bf16.mxu1 %v7728_v32  ;;  %v7816_v23 = vcombine.high %v1359_v60, %v1363_v22  ;;  %v1223_v24 = vld [vmem:[#allocation10 + $0xb18] sm:$0xff]  ;;  %v7815_v29 = vcombine.low %v1359_v60, %v1363_v22 }
 0x327   :  { %v1227_v25 = vld [vmem:[#allocation10 + $0xb38] sm:$0xff] }
 0x328   :  { %4567 = vmatpush1.bf16.msra.mxu0 %v7599_v37  ;;  %v1351_v26 = vld [vmem:[#allocation10 + $0xf18] sm:$0xff]  ;;  %v7680_v30 = vcombine.high %v1223_v24, %v1227_v25  ;;  %v7679_v37 = vcombine.low %v1223_v24, %v1227_v25 }
 0x329   :  { %4608 = vmatpush1.bf16.msra.mxu1 %v7727_v38  ;;  %4568 = vmatprep.subr.bf16.mxu0 %v7592_v40  ;;  %v1355_v27 = vld [vmem:[#allocation10 + $0xf38] sm:$0xff] }
 0x32a   :  { %4609 = vmatprep.subr.bf16.mxu1 %v7720_v41  ;;  %v7808_v32 = vcombine.high %v1351_v26, %v1355_v27  ;;  %v1215_v17 = vld [vmem:[#allocation10 + $0xad8] sm:$0xff]  ;;  %v7807_v38 = vcombine.low %v1351_v26, %v1355_v27 }
 0x32b   :  { %v1219_v33 = vld [vmem:[#allocation10 + $0xaf8] sm:$0xff] }
 0x32c   :  { %4569 = vmatpush1.bf16.msra.mxu0 %v7591_v47  ;;  %v1343_v35 = vld [vmem:[#allocation10 + $0xed8] sm:$0xff]  ;;  %v7672_v40 = vcombine.high %v1215_v17, %v1219_v33  ;;  %v7671_v47 = vcombine.low %v1215_v17, %v1219_v33 }
 0x32d   :  { %4610 = vmatpush1.bf16.msra.mxu1 %v7719_v49  ;;  %4570 = vmatprep.subr.bf16.mxu0 %v7584_v20  ;;  %v1347_v12 = vld [vmem:[#allocation10 + $0xef8] sm:$0xff] }
 0x32e   :  { %4611 = vmatprep.subr.bf16.mxu1 %v7712_v53  ;;  %v7800_v41 = vcombine.high %v1343_v35, %v1347_v12  ;;  %v1207_v54 = vld [vmem:[#allocation10 + $0xa98] sm:$0xff]  ;;  %v7799_v49 = vcombine.low %v1343_v35, %v1347_v12 }
 0x32f   :  { %v1211_v44 = vld [vmem:[#allocation10 + $0xab8] sm:$0xff] }
 0x330   :  { %4571 = vmatpush1.bf16.msra.mxu0 %v7583_v2  ;;  %v1335_v45 = vld [vmem:[#allocation10 + $0xe98] sm:$0xff]  ;;  %v7664_v20 = vcombine.high %v1207_v54, %v1211_v44  ;;  %v4265_v2 = vadd.f32 %v9306_v61, %v9300_v63 }
 0x331   :  { %4612 = vmatpush1.bf16.msra.mxu1 %v7711_v3  ;;  %4572 = vmatprep.subr.bf16.mxu0 %v7704_v62  ;;  %v1339_v46 = vld [vmem:[#allocation10 + $0xeb8] sm:$0xff]  ;;  %v7663_v3 = vcombine.low %v1207_v54, %v1211_v44 }
 0x332   :  { %4613 = vmatprep.subr.bf16.mxu1 %v7832_v5  ;;  %v7792_v53 = vcombine.high %v1335_v45, %v1339_v46  ;;  %v1199_v55 = vld [vmem:[#allocation10 + $0xa58] sm:$0xff]  ;;  %v7791_v62 = vcombine.low %v1335_v45, %v1339_v46 }
 0x333   :  { %v1203_v51 = vld [vmem:[#allocation10 + $0xa78] sm:$0xff] }
 0x334   :  { %4573 = vmatpush2.bf16.msra.mxu0 %v7703_v14  ;;  %v1327_v56 = vld [vmem:[#allocation10 + $0xe58] sm:$0xff]  ;;  %v7656_v5 = vcombine.high %v1199_v55, %v1203_v51 }
 0x335   :  { %4614 = vmatpush2.bf16.msra.mxu1 %v7831_v58  ;;  %4574 = vmatprep.subr.bf16.mxu0 %v7696_v42  ;;  %v1331_v57 = vld [vmem:[#allocation10 + $0xe78] sm:$0xff]  ;;  %v4306_v58 = vadd.f32 %v9311_v59, %v4265_v2  ;;  %v7655_v42 = vcombine.low %v1199_v55, %v1203_v51  ;;  %v4647_v59 = vmax.f32 %v9288_v4, %v4639_v1 }
 0x336   :  { %4615 = vmatprep.subr.bf16.mxu1 %v7824_v34  ;;  %v7784_v8 = vcombine.high %v1327_v56, %v1331_v57  ;;  %v1191_v31 = vld [vmem:[#allocation10 + $0xa18] sm:$0xff]  ;;  %v7783_v34 = vcombine.low %v1327_v56, %v1331_v57 }
 0x337   :  { %v1195_v11 = vld [vmem:[#allocation10 + $0xa38] sm:$0xff]  ;;  %v4641_v50 = vmul.f32 0.01, %v4306_v58 }
 0x338   :  { %4575 = vmatpush2.bf16.msra.mxu0 %v7695_v43  ;;  %v1319_v13 = vld [vmem:[#allocation10 + $0xe18] sm:$0xff]  ;;  %v7648_v63 = vcombine.high %v1191_v31, %v1195_v11  ;;  %v7647_v60 = vcombine.low %v1191_v31, %v1195_v11 }
 0x339   :  { %4616 = vmatpush2.bf16.msra.mxu1 %v7823_v48  ;;  %4576 = vmatprep.subr.bf16.mxu0 %v7688_v15  ;;  %v1323_v14 = vld [vmem:[#allocation10 + $0xe38] sm:$0xff]  ;;  %v4649_v15 = vmax.f32 %v4306_v58, %v4641_v50 }
 0x33a   :  { %4617 = vmatprep.subr.bf16.mxu1 %v7816_v23  ;;  %v7776_v61 = vcombine.high %v1319_v13, %v1323_v14  ;;  %v7775_v22 = vcombine.low %v1319_v13, %v1323_v14  ;;  %v8218_v43 = vld [vmem:[#allocation13 + $0xe4] ss:$16 sps:$4 sm:$0xff]   ;;  %v9318_v23 = vld [vmem:[#allocation11] sm:$0xff]  ;;  %v8216_v25 = vld [vmem:[#allocation13 + $0xe0] ss:$16 sps:$4 sm:$0xff]  }
 0x33b   :  { %v8221_v48 = vld [vmem:[#allocation13 + $0x2e4] ss:$16 sps:$4 sm:$0xff]   ;;  %v1401_v24 = vrot.slane %v9318_v23, %v9239_v7  ;;  %v8219_v26 = vld [vmem:[#allocation13 + $0x2e0] ss:$16 sps:$4 sm:$0xff]   ;;  %v9325_v4 = vpack.c.bf16 %v4649_v15, %v4649_v15 }
 0x33c   :  { %4577 = vmatpush2.bf16.msra.mxu0 %v7687_v28  ;;  %v8224_v27 = vld [vmem:[#allocation13 + $0xc4] ss:$16 sps:$4 sm:$0xff]   ;;  %v9322_v28 = vpack.c.bf16 %v4647_v59, %v4647_v59  ;;  %v8222_v7 = vld [vmem:[#allocation13 + $0xc0] ss:$16 sps:$4 sm:$0xff]  }
 0x33d   :  { %4618 = vmatpush2.bf16.msra.mxu1 %v7815_v29  ;;  %4578 = vmatprep.subr.bf16.mxu0 %v7680_v30  ;;  %v8227_v30 = vld [vmem:[#allocation13 + $0x2c4] ss:$16 sps:$4 sm:$0xff]   ;;  %v8225_v35 = vld [vmem:[#allocation13 + $0x2c0] ss:$16 sps:$4 sm:$0xff]  }
 0x33e   :  { %4619 = vmatprep.subr.bf16.mxu1 %v7808_v32  ;;  %v8230_v12 = vld [vmem:[#allocation13 + $0xa4] ss:$16 sps:$4 sm:$0xff]   ;;  %v8231_v44 = vld [vmem:[#allocation13 + $0x2a0] ss:$16 sps:$4 sm:$0xff]  }
 0x33f   :  { %v8236_v45 = vld [vmem:[#allocation13 + $0x84] ss:$16 sps:$4 sm:$0xff]   ;;  %v8240_v51 = vld [vmem:[#allocation13 + $0x60] ss:$16 sps:$4 sm:$0xff]  }
 0x340   :  { %4579 = vmatpush2.bf16.msra.mxu0 %v7679_v37  ;;  %v8245_v55 = vld [vmem:[#allocation13 + $0x264] ss:$16 sps:$4 sm:$0xff]   ;;  %v8243_v56 = vld [vmem:[#allocation13 + $0x260] ss:$16 sps:$4 sm:$0xff]  }
 0x341   :  { %4620 = vmatpush2.bf16.msra.mxu1 %v7807_v38  ;;  %4580 = vmatprep.subr.bf16.mxu0 %v7672_v40  ;;  %v8233_v38 = vld [vmem:[#allocation13 + $0x2a4] ss:$16 sps:$4 sm:$0xff]   ;;  %v8252_v31 = vld [vmem:[#allocation13 + $0x20] ss:$16 sps:$4 sm:$0xff]  }
 0x342   :  { %4621 = vmatprep.subr.bf16.mxu1 %v7800_v41  ;;  %v8228_v41 = vld [vmem:[#allocation13 + $0xa0] ss:$16 sps:$4 sm:$0xff]   ;;  %v8248_v57 = vld [vmem:[#allocation13 + $0x44] ss:$16 sps:$4 sm:$0xff]  }
 0x343   :  { %v8251_v2 = vld [vmem:[#allocation13 + $0x244] ss:$16 sps:$4 sm:$0xff]   ;;  %v8255_v11 = vld [vmem:[#allocation13 + $0x220] ss:$16 sps:$4 sm:$0xff]  }
 0x344   :  { %4581 = vmatpush2.bf16.msra.mxu0 %v7671_v47  ;;  %v8239_v47 = vld [vmem:[#allocation13 + $0x284] ss:$16 sps:$4 sm:$0xff]   ;;  %v8258_v58 = vld [vmem:[#allocation13] ss:$16 sps:$4 sm:$0xff]  }
 0x345   :  { %4622 = vmatpush2.bf16.msra.mxu1 %v7799_v49  ;;  %4582 = vmatprep.subr.bf16.mxu0 %v7664_v20  ;;  %v8234_v49 = vld [vmem:[#allocation13 + $0x80] ss:$16 sps:$4 sm:$0xff]   ;;  %v8260_v13 = vld [vmem:[#allocation13 + $0x4] ss:$16 sps:$4 sm:$0xff]  }
 0x346   :  { %4623 = vmatprep.subr.bf16.mxu1 %v7792_v53  ;;  %v8237_v20 = vld [vmem:[#allocation13 + $0x280] ss:$16 sps:$4 sm:$0xff]   ;;  %v8242_v53 = vld [vmem:[#allocation13 + $0x64] ss:$16 sps:$4 sm:$0xff]  }
 0x347   :  { %v8263_v14 = vld [vmem:[#allocation13 + $0x204] ss:$16 sps:$4 sm:$0xff]   ;;  %v8267_v1 = vld [vmem:[#allocation13 + $0x3e0] ss:$16 sps:$4 sm:$0xff]  }
 0x348   :  { %4583 = vmatpush2.bf16.msra.mxu0 %v7663_v3  ;;  %v8246_v3 = vld [vmem:[#allocation13 + $0x40] ss:$16 sps:$4 sm:$0xff]   ;;  %v8272_v50 = vld [vmem:[#allocation13 + $0x1c4] ss:$16 sps:$4 sm:$0xff]  }
 0x349   :  { %4624 = vmatpush2.bf16.msra.mxu1 %v7791_v62  ;;  %4584 = vmatprep.subr.bf16.mxu0 %v7656_v5  ;;  %v8249_v62 = vld [vmem:[#allocation13 + $0x240] ss:$16 sps:$4 sm:$0xff]   ;;  %v8254_v5 = vld [vmem:[#allocation13 + $0x24] ss:$16 sps:$4 sm:$0xff]  }
 0x34a   :  { %4625 = vmatprep.subr.bf16.mxu1 %v7784_v8  ;;  %v8257_v8 = vld [vmem:[#allocation13 + $0x224] ss:$16 sps:$4 sm:$0xff]   ;;  %v8276_v15 = vld [vmem:[#allocation13 + $0x1a0] ss:$16 sps:$4 sm:$0xff]  }
 0x34b   :  { %v8281_v59 = vld [vmem:[#allocation13 + $0x3a4] ss:$16 sps:$4 sm:$0xff]  }
 0x34c   :  { %4585 = vmatpush2.bf16.msra.mxu0 %v7655_v42  ;;  %v8261_v42 = vld [vmem:[#allocation13 + $0x200] ss:$16 sps:$4 sm:$0xff]  }
 0x34d   :  { %4626 = vmatpush2.bf16.msra.mxu1 %v7783_v34  ;;  %4586 = vmatprep.subr.bf16.mxu0 %v7648_v63  ;;  %v8266_v34 = vld [vmem:[#allocation13 + $0x1e4] ss:$16 sps:$4 sm:$0xff]  }
 0x34e   :  { %4627 = vmatprep.subr.bf16.mxu1 %v7776_v61  ;;  %v8269_v63 = vld [vmem:[#allocation13 + $0x3e4] ss:$16 sps:$4 sm:$0xff]   ;;  %v8264_v61 = vld [vmem:[#allocation13 + $0x1e0] ss:$16 sps:$4 sm:$0xff]  }
 0x350   :  { %4587 = vmatpush2.bf16.msra.mxu0 %v7647_v60  ;;  %v8275_v60 = vld [vmem:[#allocation13 + $0x3c4] ss:$16 sps:$4 sm:$0xff]  }
 0x351   :  { %4628 = vmatpush2.bf16.msra.mxu1 %v7775_v22  ;;  %6220 = vmatprep.subr.bf16.mxu0 %v8218_v43  ;;  %v8270_v22 = vld [vmem:[#allocation13 + $0x1c0] ss:$16 sps:$4 sm:$0xff]  }
 0x352   :  { %6261 = vmatprep.subr.bf16.mxu1 %v8221_v48  ;;  %v8273_v43 = vld [vmem:[#allocation13 + $0x3c0] ss:$16 sps:$4 sm:$0xff]   ;;  %v8278_v48 = vld [vmem:[#allocation13 + $0x1a4] ss:$16 sps:$4 sm:$0xff]  }
 0x353   :  { %v4344_v29 = vpop.f32.mrf.mxu0  ;;  %4589 = vmatmul.mubr.bf16.vlgmr.msra.gmra.mxu0 %v9254_v6 }
 0x354   :  { %v4345_v32 = vadd.f32 %v4344_v29, %v1401_v24  ;;  %v4385_v17 = vpop.f32.mrf.mxu1  ;;  %4630 = vmatmul.mubr.bf16.vlgmr.msra.gmra.mxu1 %v9256_v9  ;;  %6221 = vmatpush1.bf16.msra.mxu0 %v8216_v25  ;;  %v8279_v24 = vld [vmem:[#allocation13 + $0x3a0] ss:$16 sps:$4 sm:$0xff]   ;;  %v8284_v25 = vld [vmem:[#allocation13 + $0x184] ss:$16 sps:$4 sm:$0xff]  }
 0x355   :  { %6252 = vmatprep.mubr.bf16.mxu0 %v9322_v28  ;;  %6262 = vmatpush1.bf16.msra.mxu1 %v8219_v26  ;;  %v9329_v33 = vpop.f32.mrf.mxu0  ;;  %v8287_v26 = vld [vmem:[#allocation13 + $0x384] ss:$16 sps:$4 sm:$0xff]   ;;  %v8285_v29 = vld [vmem:[#allocation13 + $0x380] ss:$16 sps:$4 sm:$0xff]  }
 0x356   :  { %v9331_v37 = vadd.f32 %v4385_v17, %v4345_v32  ;;  %6293 = vmatprep.mubr.bf16.mxu1 %v9325_v4  ;;  %v9334_v6 = vpop.f32.mrf.mxu1  ;;  %6222 = vmatprep.subr.bf16.mxu0 %v8224_v27  ;;  %v8282_v27 = vld [vmem:[#allocation13 + $0x180] ss:$16 sps:$4 sm:$0xff]   ;;  %v8293_v32 = vld [vmem:[#allocation13 + $0x364] ss:$16 sps:$4 sm:$0xff]  }
 0x357   :  { %v4348_v40 = vpop.f32.mrf.mxu0  ;;  %6263 = vmatprep.subr.bf16.mxu1 %v8227_v30  ;;  %v8290_v30 = vld [vmem:[#allocation13 + $0x164] ss:$16 sps:$4 sm:$0xff]   ;;  %v8288_v17 = vld [vmem:[#allocation13 + $0x160] ss:$16 sps:$4 sm:$0xff]  }
 0x358   :  { %v4389_v9 = vpop.f32.mrf.mxu1  ;;  %6223 = vmatpush1.bf16.msra.mxu0 %v8222_v7  ;;  %v8291_v7 = vld [vmem:[#allocation13 + $0x360] ss:$16 sps:$4 sm:$0xff]  }
 0x359   :  { %6264 = vmatpush1.bf16.msra.mxu1 %v8225_v35  ;;  %v4349_v54 = vpop.f32.mrf.mxu0  ;;  %6224 = vmatprep.subr.bf16.mxu0 %v8230_v12  ;;  %v8296_v35 = vld [vmem:[#allocation13 + $0x144] ss:$16 sps:$4 sm:$0xff]   ;;  %v8297_v40 = vld [vmem:[#allocation13 + $0x340] ss:$16 sps:$4 sm:$0xff]  }
 0x35a   :  { %v4390_v46 = vpop.f32.mrf.mxu1  ;;  %6265 = vmatprep.subr.bf16.mxu1 %v8233_v38  ;;  %v8299_v12 = vld [vmem:[#allocation13 + $0x344] ss:$16 sps:$4 sm:$0xff]   ;;  %v8294_v38 = vld [vmem:[#allocation13 + $0x140] ss:$16 sps:$4 sm:$0xff]  }
 0x35b   :  { %v8302_v9 = vld [vmem:[#allocation13 + $0x124] ss:$16 sps:$4 sm:$0xff]   ;;  %v8300_v54 = vld [vmem:[#allocation13 + $0x120] ss:$16 sps:$4 sm:$0xff]  }
 0x35c   :  { %6225 = vmatpush1.bf16.msra.mxu0 %v8228_v41  ;;  %v8305_v41 = vld [vmem:[#allocation13 + $0x324] ss:$16 sps:$4 sm:$0xff]  }
 0x35d   :  { %6266 = vmatpush1.bf16.msra.mxu1 %v8231_v44  ;;  %6226 = vmatprep.subr.bf16.mxu0 %v8236_v45  ;;  %v4638_v44 = vmul.f32 0.01, %v9284_v52  ;;  %v8303_v45 = vld [vmem:[#allocation13 + $0x320] ss:$16 sps:$4 sm:$0xff]   ;;  %v8308_v46 = vld [vmem:[#allocation13 + $0x104] ss:$16 sps:$4 sm:$0xff]  }
 0x35e   :  { %6267 = vmatprep.subr.bf16.mxu1 %v8239_v47  ;;  %v4640_v47 = vmul.f32 0.01, %v9308_v0 }
 0x360   :  { %6227 = vmatpush1.bf16.msra.mxu0 %v8234_v49  ;;  %v8311_v49 = vld [vmem:[#allocation13 + $0x304] ss:$16 sps:$4 sm:$0xff]  }
 0x361   :  { %6268 = vmatpush1.bf16.msra.mxu1 %v8237_v20  ;;  %6228 = vmatprep.subr.bf16.mxu0 %v8242_v53  ;;  %v1405_v20 = vrot.slane %v9318_v23, %v9215_v36  ;;  %v8306_v53 = vld [vmem:[#allocation13 + $0x100] ss:$16 sps:$4 sm:$0xff]   ;;  %v8317_v36 = vld [vmem:[#allocation13 + $0x4c4] ss:$16 sps:$4 sm:$0xff]  }
 0x362   :  { %6269 = vmatprep.subr.bf16.mxu1 %v8245_v55  ;;  %v4646_v55 = vmax.f32 %v9284_v52, %v4638_v44  ;;  %v8380_v52 = vld [vmem:[#allocation13 + $0x6c4] ss:$16 sps:$4 sm:$0xff]  }
 0x363   :  { %v8335_v44 = vld [vmem:[#allocation13 + $0x404] ss:$16 sps:$4 sm:$0xff]  }
 0x364   :  { %6229 = vmatpush1.bf16.msra.mxu0 %v8240_v51  ;;  %v8309_v51 = vld [vmem:[#allocation13 + $0x300] ss:$16 sps:$4 sm:$0xff]  }
 0x365   :  { %6270 = vmatpush1.bf16.msra.mxu1 %v8243_v56  ;;  %6230 = vmatprep.subr.bf16.mxu0 %v8248_v57  ;;  %v8314_v56 = vld [vmem:[#allocation13 + $0x4e4] ss:$16 sps:$4 sm:$0xff]   ;;  %v4648_v57 = vmax.f32 %v9308_v0, %v4640_v47  ;;  %v8333_v47 = vld [vmem:[#allocation13 + $0x400] ss:$16 sps:$4 sm:$0xff]  }
 0x366   :  { %6271 = vmatprep.subr.bf16.mxu1 %v8251_v2  ;;  %v8374_v2 = vld [vmem:[#allocation13 + $0x6e4] ss:$16 sps:$4 sm:$0xff]  }
 0x368   :  { %6231 = vmatpush1.bf16.msra.mxu0 %v8246_v3  ;;  %v4347_v3 = vadd.f32 %v9329_v33, %v1405_v20  ;;  %v8315_v33 = vld [vmem:[#allocation13 + $0x4c0] ss:$16 sps:$4 sm:$0xff]  }
 0x369   :  { %6272 = vmatpush1.bf16.msra.mxu1 %v8249_v62  ;;  %6232 = vmatprep.subr.bf16.mxu0 %v8254_v5  ;;  %v8312_v62 = vld [vmem:[#allocation13 + $0x4e0] ss:$16 sps:$4 sm:$0xff]   ;;  %v9343_v5 = vpack.c.bf16 %v4646_v55, %v4646_v55 }
 0x36a   :  { %6273 = vmatprep.subr.bf16.mxu1 %v8257_v8  ;;  %v8372_v8 = vld [vmem:[#allocation13 + $0x6e0] ss:$16 sps:$4 sm:$0xff]   ;;  %v4388_v0 = vadd.f32 %v9334_v6, %v4347_v3  ;;  %v8344_v3 = vld [vmem:[#allocation13 + $0x5a4] ss:$16 sps:$4 sm:$0xff]  }
 0x36b   :  { %v8318_v6 = vld [vmem:[#allocation13 + $0x4a0] ss:$16 sps:$4 sm:$0xff]  }
 0x36c   :  { %6233 = vmatpush1.bf16.msra.mxu0 %v8252_v31  ;;  %v9345_v31 = vpack.c.bf16 %v4648_v57, %v4648_v57  ;;  %v8414_v20 = vld [vmem:[#allocation13 + $0x600] ss:$16 sps:$4 sm:$0xff]   ;;  %v8428_v57 = vld [vmem:[#allocation13 + $0x7c4] ss:$16 sps:$4 sm:$0xff]  }
 0x36d   :  { %6274 = vmatpush1.bf16.msra.mxu1 %v8255_v11  ;;  %6234 = vmatprep.subr.bf16.mxu0 %v8260_v13  ;;  %v8336_v55 = vld [vmem:[#allocation13 + $0x5e0] ss:$16 sps:$4 sm:$0xff]  }
 0x36e   :  { %6275 = vmatprep.subr.bf16.mxu1 %v8263_v14 }
 0x370   :  { %6235 = vmatpush1.bf16.msra.mxu0 %v8258_v58  ;;  %v8320_v58 = vld [vmem:[#allocation13 + $0x4a4] ss:$16 sps:$4 sm:$0xff]  }
 0x371   :  { %6276 = vmatpush1.bf16.msra.mxu1 %v8261_v42  ;;  %6236 = vmatprep.subr.bf16.mxu0 %v8266_v34  ;;  %v8378_v42 = vld [vmem:[#allocation13 + $0x6c0] ss:$16 sps:$4 sm:$0xff]  }
 0x372   :  { %6277 = vmatprep.subr.bf16.mxu1 %v8269_v63 }
 0x374   :  { %6237 = vmatpush2.bf16.msra.mxu0 %v8264_v61  ;;  %v8386_v61 = vld [vmem:[#allocation13 + $0x6a4] ss:$16 sps:$4 sm:$0xff]  }
 0x375   :  { %6278 = vmatpush2.bf16.msra.mxu1 %v8267_v1  ;;  %6238 = vmatprep.subr.bf16.mxu0 %v8272_v50 }
 0x376   :  { %6279 = vmatprep.subr.bf16.mxu1 %v8275_v60 }
 0x378   :  { %6239 = vmatpush2.bf16.msra.mxu0 %v8270_v22 }
 0x379   :  { %6280 = vmatpush2.bf16.msra.mxu1 %v8273_v43  ;;  %6240 = vmatprep.subr.bf16.mxu0 %v8278_v48  ;;  %v8323_v43 = vld [vmem:[#allocation13 + $0x484] ss:$16 sps:$4 sm:$0xff]   ;;  %v8384_v48 = vld [vmem:[#allocation13 + $0x6a0] ss:$16 sps:$4 sm:$0xff]  }
 0x37a   :  { %6281 = vmatprep.subr.bf16.mxu1 %v8281_v59 }
 0x37c   :  { %6241 = vmatpush2.bf16.msra.mxu0 %v8276_v15 }
 0x37d   :  { %6282 = vmatpush2.bf16.msra.mxu1 %v8279_v24  ;;  %6242 = vmatprep.subr.bf16.mxu0 %v8284_v25  ;;  %v8392_v24 = vld [vmem:[#allocation13 + $0x684] ss:$16 sps:$4 sm:$0xff]  }
 0x37e   :  { %6283 = vmatprep.subr.bf16.mxu1 %v8287_v26  ;;  %v8321_v26 = vld [vmem:[#allocation13 + $0x480] ss:$16 sps:$4 sm:$0xff]  }
 0x380   :  { %6243 = vmatpush2.bf16.msra.mxu0 %v8282_v27  ;;  %v8326_v27 = vld [vmem:[#allocation13 + $0x464] ss:$16 sps:$4 sm:$0xff]  }
 0x381   :  { %6284 = vmatpush2.bf16.msra.mxu1 %v8285_v29  ;;  %6244 = vmatprep.subr.bf16.mxu0 %v8290_v30  ;;  %v8390_v29 = vld [vmem:[#allocation13 + $0x680] ss:$16 sps:$4 sm:$0xff]  }
 0x382   :  { %6285 = vmatprep.subr.bf16.mxu1 %v8293_v32  ;;  %v8398_v32 = vld [vmem:[#allocation13 + $0x664] ss:$16 sps:$4 sm:$0xff]  }
 0x384   :  { %6245 = vmatpush2.bf16.msra.mxu0 %v8288_v17  ;;  %v8324_v17 = vld [vmem:[#allocation13 + $0x460] ss:$16 sps:$4 sm:$0xff]  }
 0x385   :  { %6286 = vmatpush2.bf16.msra.mxu1 %v8291_v7  ;;  %6246 = vmatprep.subr.bf16.mxu0 %v8296_v35  ;;  %v8329_v7 = vld [vmem:[#allocation13 + $0x444] ss:$16 sps:$4 sm:$0xff]   ;;  %v8396_v35 = vld [vmem:[#allocation13 + $0x660] ss:$16 sps:$4 sm:$0xff]  }
 0x386   :  { %6287 = vmatprep.subr.bf16.mxu1 %v8299_v12  ;;  %v8404_v12 = vld [vmem:[#allocation13 + $0x644] ss:$16 sps:$4 sm:$0xff]  }
 0x388   :  { %6247 = vmatpush2.bf16.msra.mxu0 %v8294_v38  ;;  %v8327_v38 = vld [vmem:[#allocation13 + $0x440] ss:$16 sps:$4 sm:$0xff]  }
 0x389   :  { %6288 = vmatpush2.bf16.msra.mxu1 %v8297_v40  ;;  %6248 = vmatprep.subr.bf16.mxu0 %v8302_v9  ;;  %v8332_v40 = vld [vmem:[#allocation13 + $0x424] ss:$16 sps:$4 sm:$0xff]   ;;  %v8402_v9 = vld [vmem:[#allocation13 + $0x640] ss:$16 sps:$4 sm:$0xff]  }
 0x38a   :  { %6289 = vmatprep.subr.bf16.mxu1 %v8305_v41  ;;  %v8410_v41 = vld [vmem:[#allocation13 + $0x624] ss:$16 sps:$4 sm:$0xff]  }
 0x38c   :  { %6249 = vmatpush2.bf16.msra.mxu0 %v8300_v54  ;;  %v8330_v54 = vld [vmem:[#allocation13 + $0x420] ss:$16 sps:$4 sm:$0xff]  }
 0x38d   :  { %6290 = vmatpush2.bf16.msra.mxu1 %v8303_v45  ;;  %6250 = vmatprep.subr.bf16.mxu0 %v8308_v46  ;;  %v8408_v45 = vld [vmem:[#allocation13 + $0x620] ss:$16 sps:$4 sm:$0xff]   ;;  %v8416_v46 = vld [vmem:[#allocation13 + $0x604] ss:$16 sps:$4 sm:$0xff]  }
 0x38e   :  { %6291 = vmatprep.subr.bf16.mxu1 %v8311_v49  ;;  %v8338_v49 = vld [vmem:[#allocation13 + $0x5e4] ss:$16 sps:$4 sm:$0xff]  }
 0x390   :  { %6251 = vmatpush2.bf16.msra.mxu0 %v8306_v53  ;;  %v8422_v53 = vld [vmem:[#allocation13 + $0x7e4] ss:$16 sps:$4 sm:$0xff]  }
 0x391   :  { %6292 = vmatpush2.bf16.msra.mxu1 %v8309_v51  ;;  %6302 = vmatprep.subr.bf16.mxu0 %v8314_v56  ;;  %v8341_v51 = vld [vmem:[#allocation13 + $0x5c4] ss:$16 sps:$4 sm:$0xff]   ;;  %v8420_v56 = vld [vmem:[#allocation13 + $0x7e0] ss:$16 sps:$4 sm:$0xff]  }
 0x392   :  { %6343 = vmatprep.subr.bf16.mxu1 %v8374_v2  ;;  %v8339_v2 = vld [vmem:[#allocation13 + $0x5c0] ss:$16 sps:$4 sm:$0xff]  }
 0x393   :  { %v9347_v11 = vpop.f32.mrf.mxu0  ;;  %6253 = vmatmul.mubr.bf16.vlgmr.msra.gmra.mxu0 %v9343_v5 }
 0x394   :  { %v9351_v13 = vpop.f32.mrf.mxu1  ;;  %6294 = vmatmul.mubr.bf16.vlgmr.msra.gmra.mxu1 %v9345_v31  ;;  %6303 = vmatpush1.bf16.msra.mxu0 %v8312_v62  ;;  %v8426_v62 = vld [vmem:[#allocation13 + $0x7c0] ss:$16 sps:$4 sm:$0xff]  }
 0x395   :  { %v4428_v14 = vpop.f32.mrf.mxu0  ;;  %6304 = vmatprep.subr.bf16.mxu0 %v8317_v36  ;;  %6344 = vmatpush1.bf16.msra.mxu1 %v8372_v8  ;;  %v8434_v36 = vld [vmem:[#allocation13 + $0x7a4] ss:$16 sps:$4 sm:$0xff]   ;;  %v8342_v8 = vld [vmem:[#allocation13 + $0x5a0] ss:$16 sps:$4 sm:$0xff]  }
 0x396   :  { %v4429_v34 = vadd.f32 %v4428_v14, %v4388_v0  ;;  %v4469_v63 = vpop.f32.mrf.mxu1  ;;  %6345 = vmatprep.subr.bf16.mxu1 %v8380_v52  ;;  %v8347_v52 = vld [vmem:[#allocation13 + $0x584] ss:$16 sps:$4 sm:$0xff]   ;;  %v8432_v0 = vld [vmem:[#allocation13 + $0x7a0] ss:$16 sps:$4 sm:$0xff]  }
 0x397   :  { %v4430_v1 = vpop.f32.mrf.mxu0  ;;  %v8345_v14 = vld [vmem:[#allocation13 + $0x580] ss:$16 sps:$4 sm:$0xff]  }
 0x398   :  { %v4470_v50 = vadd.f32 %v4469_v63, %v4429_v34  ;;  %v4471_v60 = vpop.f32.mrf.mxu1  ;;  %6305 = vmatpush1.bf16.msra.mxu0 %v8315_v33  ;;  %v8440_v33 = vld [vmem:[#allocation13 + $0x784] ss:$16 sps:$4 sm:$0xff]   ;;  %v8348_v63 = vld [vmem:[#allocation13 + $0x560] ss:$16 sps:$4 sm:$0xff]  }
 0x399   :  { %v4431_v22 = vpop.f32.mrf.mxu0  ;;  %6306 = vmatprep.subr.bf16.mxu0 %v8320_v58  ;;  %6346 = vmatpush1.bf16.msra.mxu1 %v8378_v42  ;;  %v8350_v58 = vld [vmem:[#allocation13 + $0x564] ss:$16 sps:$4 sm:$0xff]   ;;  %v8438_v42 = vld [vmem:[#allocation13 + $0x780] ss:$16 sps:$4 sm:$0xff]  }
 0x39a   :  { %v4643_v59 = vmul.f32 0.01, %v4470_v50  ;;  %v4472_v15 = vpop.f32.mrf.mxu1  ;;  %6347 = vmatprep.subr.bf16.mxu1 %v8386_v61  ;;  %v8446_v34 = vld [vmem:[#allocation13 + $0x764] ss:$16 sps:$4 sm:$0xff]   ;;  %v4427_v61 = vadd.f32 %v9347_v11, %v9331_v37  ;;  %v8456_v11 = vld [vmem:[#allocation13 + $0x720] ss:$16 sps:$4 sm:$0xff]  }
 0x39b   :  { %v8353_v1 = vld [vmem:[#allocation13 + $0x544] ss:$16 sps:$4 sm:$0xff]   ;;  %v8354_v15 = vld [vmem:[#allocation13 + $0x520] ss:$16 sps:$4 sm:$0xff]  }
 0x39c   :  { %v4651_v25 = vmax.f32 %v4470_v50, %v4643_v59  ;;  %6307 = vmatpush1.bf16.msra.mxu0 %v8318_v6  ;;  %v8444_v50 = vld [vmem:[#allocation13 + $0x760] ss:$16 sps:$4 sm:$0xff]   ;;  %v8452_v60 = vld [vmem:[#allocation13 + $0x744] ss:$16 sps:$4 sm:$0xff]   ;;  %v4468_v22 = vadd.f32 %v9351_v13, %v4427_v61  ;;  %v8362_v13 = vld [vmem:[#allocation13 + $0xec] ss:$16 sps:$4 sm:$0xff]  }
 0x39d   :  { %6308 = vmatprep.subr.bf16.mxu0 %v8323_v43  ;;  %6348 = vmatpush1.bf16.msra.mxu1 %v8384_v48  ;;  %v8351_v6 = vld [vmem:[#allocation13 + $0x540] ss:$16 sps:$4 sm:$0xff]   ;;  %v8356_v43 = vld [vmem:[#allocation13 + $0x524] ss:$16 sps:$4 sm:$0xff]   ;;  %v8431_v61 = vld [vmem:[#allocation13 + $0x14c] ss:$16 sps:$4 sm:$0xff]  }
 0x39e   :  { %v9354_v30 = vpack.c.bf16 %v4651_v25, %v4651_v25  ;;  %6349 = vmatprep.subr.bf16.mxu1 %v8392_v24  ;;  %v8450_v48 = vld [vmem:[#allocation13 + $0x740] ss:$16 sps:$4 sm:$0xff]   ;;  %v8458_v59 = vld [vmem:[#allocation13 + $0x724] ss:$16 sps:$4 sm:$0xff]   ;;  %v4642_v24 = vmul.f32 0.01, %v4468_v22 }
 0x39f   :  { %v8359_v37 = vld [vmem:[#allocation13 + $0x504] ss:$16 sps:$4 sm:$0xff]  }
 0x3a0   :  { %6309 = vmatpush1.bf16.msra.mxu0 %v8321_v26  ;;  %6334 = vmatprep.mubr.bf16.mxu0 %v9354_v30  ;;  %v8464_v25 = vld [vmem:[#allocation13 + $0x704] ss:$16 sps:$4 sm:$0xff]   ;;  %v8357_v26 = vld [vmem:[#allocation13 + $0x500] ss:$16 sps:$4 sm:$0xff]  }
 0x3a1   :  { %6310 = vmatprep.subr.bf16.mxu0 %v8326_v27  ;;  %6350 = vmatpush1.bf16.msra.mxu1 %v8390_v29  ;;  %v4650_v27 = vmax.f32 %v4468_v22, %v4642_v24  ;;  %v8462_v29 = vld [vmem:[#allocation13 + $0x700] ss:$16 sps:$4 sm:$0xff]   ;;  %v1409_v22 = vrot.slane %v9318_v23, %v9242_v10 }
 0x3a2   :  { %6351 = vmatprep.subr.bf16.mxu1 %v8398_v32  ;;  %v8470_v32 = vld [vmem:[#allocation13 + $0x2ec] ss:$16 sps:$4 sm:$0xff]  }
 0x3a4   :  { %6311 = vmatpush1.bf16.msra.mxu0 %v8324_v17  ;;  %v8360_v17 = vld [vmem:[#allocation13 + $0xe8] ss:$16 sps:$4 sm:$0xff]  }
 0x3a5   :  { %6312 = vmatprep.subr.bf16.mxu0 %v8329_v7  ;;  %6352 = vmatpush1.bf16.msra.mxu1 %v8396_v35  ;;  %v9360_v7 = vpack.c.bf16 %v4650_v27, %v4650_v27  ;;  %v8365_v35 = vld [vmem:[#allocation13 + $0xcc] ss:$16 sps:$4 sm:$0xff]   ;;  %v8453_v27 = vld [vmem:[#allocation13 + $0x4c8] ss:$16 sps:$4 sm:$0xff]  }
 0x3a6   :  { %6353 = vmatprep.subr.bf16.mxu1 %v8404_v12 }
 0x3a8   :  { %6313 = vmatpush1.bf16.msra.mxu0 %v8327_v38 }
 0x3a9   :  { %6314 = vmatprep.subr.bf16.mxu0 %v8332_v40  ;;  %6354 = vmatpush1.bf16.msra.mxu1 %v8402_v9  ;;  %v8363_v40 = vld [vmem:[#allocation13 + $0xc8] ss:$16 sps:$4 sm:$0xff]  }
 0x3aa   :  { %6355 = vmatprep.subr.bf16.mxu1 %v8410_v41  ;;  %v8368_v41 = vld [vmem:[#allocation13 + $0xac] ss:$16 sps:$4 sm:$0xff]  }
 0x3ac   :  { %6315 = vmatpush1.bf16.msra.mxu0 %v8330_v54 }
 0x3ad   :  { %6316 = vmatprep.subr.bf16.mxu0 %v8335_v44  ;;  %6356 = vmatpush1.bf16.msra.mxu1 %v8408_v45 }
 0x3ae   :  { %6357 = vmatprep.subr.bf16.mxu1 %v8416_v46  ;;  %v8366_v46 = vld [vmem:[#allocation13 + $0xa8] ss:$16 sps:$4 sm:$0xff]  }
 0x3b0   :  { %6317 = vmatpush1.bf16.msra.mxu0 %v8333_v47 }
 0x3b1   :  { %6318 = vmatprep.subr.bf16.mxu0 %v8338_v49  ;;  %6358 = vmatpush1.bf16.msra.mxu1 %v8414_v20  ;;  %v8371_v49 = vld [vmem:[#allocation13 + $0x8c] ss:$16 sps:$4 sm:$0xff]  }
 0x3b2   :  { %6359 = vmatprep.subr.bf16.mxu1 %v8422_v53  ;;  %v8369_v53 = vld [vmem:[#allocation13 + $0x88] ss:$16 sps:$4 sm:$0xff]  }
 0x3b4   :  { %6319 = vmatpush2.bf16.msra.mxu0 %v8336_v55  ;;  %v8377_v55 = vld [vmem:[#allocation13 + $0x6c] ss:$16 sps:$4 sm:$0xff]  }
 0x3b5   :  { %6320 = vmatprep.subr.bf16.mxu0 %v8341_v51  ;;  %6360 = vmatpush2.bf16.msra.mxu1 %v8420_v56  ;;  %v8383_v51 = vld [vmem:[#allocation13 + $0x4c] ss:$16 sps:$4 sm:$0xff]   ;;  %v8381_v56 = vld [vmem:[#allocation13 + $0x48] ss:$16 sps:$4 sm:$0xff]  }
 0x3b6   :  { %6361 = vmatprep.subr.bf16.mxu1 %v8428_v57  ;;  %v8389_v57 = vld [vmem:[#allocation13 + $0x2c] ss:$16 sps:$4 sm:$0xff]  }
 0x3b8   :  { %6321 = vmatpush2.bf16.msra.mxu0 %v8339_v2  ;;  %v8387_v2 = vld [vmem:[#allocation13 + $0x28] ss:$16 sps:$4 sm:$0xff]  }
 0x3b9   :  { %6322 = vmatprep.subr.bf16.mxu0 %v8344_v3  ;;  %6362 = vmatpush2.bf16.msra.mxu1 %v8426_v62  ;;  %v8395_v3 = vld [vmem:[#allocation13 + $0xc] ss:$16 sps:$4 sm:$0xff]   ;;  %v8393_v62 = vld [vmem:[#allocation13 + $0x8] ss:$16 sps:$4 sm:$0xff]  }
 0x3ba   :  { %6363 = vmatprep.subr.bf16.mxu1 %v8434_v36  ;;  %v8401_v36 = vld [vmem:[#allocation13 + $0x1ec] ss:$16 sps:$4 sm:$0xff]  }
 0x3bc   :  { %6323 = vmatpush2.bf16.msra.mxu0 %v8342_v8  ;;  %v8399_v8 = vld [vmem:[#allocation13 + $0x1e8] ss:$16 sps:$4 sm:$0xff]  }
 0x3bd   :  { %6324 = vmatprep.subr.bf16.mxu0 %v8347_v52  ;;  %6364 = vmatpush2.bf16.msra.mxu1 %v8432_v0  ;;  %v8407_v52 = vld [vmem:[#allocation13 + $0x1cc] ss:$16 sps:$4 sm:$0xff]   ;;  %v8405_v0 = vld [vmem:[#allocation13 + $0x1c8] ss:$16 sps:$4 sm:$0xff]  }
 0x3be   :  { %6365 = vmatprep.subr.bf16.mxu1 %v8440_v33  ;;  %v8413_v33 = vld [vmem:[#allocation13 + $0x1ac] ss:$16 sps:$4 sm:$0xff]  }
 0x3c0   :  { %6325 = vmatpush2.bf16.msra.mxu0 %v8345_v14  ;;  %v8411_v14 = vld [vmem:[#allocation13 + $0x1a8] ss:$16 sps:$4 sm:$0xff]  }
 0x3c1   :  { %6326 = vmatprep.subr.bf16.mxu0 %v8350_v58  ;;  %6366 = vmatpush2.bf16.msra.mxu1 %v8438_v42  ;;  %v8419_v58 = vld [vmem:[#allocation13 + $0x18c] ss:$16 sps:$4 sm:$0xff]   ;;  %v8417_v42 = vld [vmem:[#allocation13 + $0x188] ss:$16 sps:$4 sm:$0xff]  }
 0x3c2   :  { %6367 = vmatprep.subr.bf16.mxu1 %v8446_v34  ;;  %v8425_v34 = vld [vmem:[#allocation13 + $0x16c] ss:$16 sps:$4 sm:$0xff]  }
 0x3c4   :  { %6327 = vmatpush2.bf16.msra.mxu0 %v8348_v63  ;;  %v8423_v63 = vld [vmem:[#allocation13 + $0x168] ss:$16 sps:$4 sm:$0xff]  }
 0x3c5   :  { %6328 = vmatprep.subr.bf16.mxu0 %v8353_v1  ;;  %6368 = vmatpush2.bf16.msra.mxu1 %v8444_v50  ;;  %v8429_v1 = vld [vmem:[#allocation13 + $0x148] ss:$16 sps:$4 sm:$0xff]   ;;  %v8437_v50 = vld [vmem:[#allocation13 + $0x12c] ss:$16 sps:$4 sm:$0xff]  }
 0x3c6   :  { %6369 = vmatprep.subr.bf16.mxu1 %v8452_v60  ;;  %v8435_v60 = vld [vmem:[#allocation13 + $0x128] ss:$16 sps:$4 sm:$0xff]  }
 0x3c8   :  { %6329 = vmatpush2.bf16.msra.mxu0 %v8351_v6  ;;  %v8443_v6 = vld [vmem:[#allocation13 + $0x10c] ss:$16 sps:$4 sm:$0xff]  }
 0x3c9   :  { %6330 = vmatprep.subr.bf16.mxu0 %v8356_v43  ;;  %6370 = vmatpush2.bf16.msra.mxu1 %v8450_v48  ;;  %v1413_v43 = vrot.slane %v9318_v23, %v9218_v39  ;;  %v8441_v48 = vld [vmem:[#allocation13 + $0x108] ss:$16 sps:$4 sm:$0xff]  }
 0x3ca   :  { %6371 = vmatprep.subr.bf16.mxu1 %v8458_v59  ;;  %v8449_v59 = vld [vmem:[#allocation13 + $0x4ec] ss:$16 sps:$4 sm:$0xff]  }
 0x3cc   :  { %6331 = vmatpush2.bf16.msra.mxu0 %v8354_v15 }
 0x3cd   :  { %6332 = vmatprep.subr.bf16.mxu0 %v8359_v37  ;;  %6372 = vmatpush2.bf16.msra.mxu1 %v8456_v11  ;;  %v8447_v37 = vld [vmem:[#allocation13 + $0x4e8] ss:$16 sps:$4 sm:$0xff]   ;;  %v8455_v11 = vld [vmem:[#allocation13 + $0x4cc] ss:$16 sps:$4 sm:$0xff]  }
 0x3ce   :  { %6373 = vmatprep.subr.bf16.mxu1 %v8464_v25 }
 0x3d0   :  { %6333 = vmatpush2.bf16.msra.mxu0 %v8357_v26 }
 0x3d1   :  { %6384 = vmatprep.subr.bf16.mxu0 %v8362_v13  ;;  %6374 = vmatpush2.bf16.msra.mxu1 %v8462_v29  ;;  %v8461_v29 = vld [vmem:[#allocation13 + $0x4ac] ss:$16 sps:$4 sm:$0xff]  }
 0x3d2   :  { %6425 = vmatprep.subr.bf16.mxu1 %v8470_v32 }
 0x3d3   :  { %v9362_v12 = vpop.f32.mrf.mxu0  ;;  %6335 = vmatmul.mubr.bf16.vlgmr.msra.gmra.mxu0 %v9360_v7 }
 0x3d4   :  { %v9365_v38 = vpop.f32.mrf.mxu1  ;;  %6385 = vmatpush1.bf16.msra.mxu0 %v8360_v17  ;;  %6416 = vmatprep.mubr.bf16.mxu0 %v9322_v28  ;;  %v8375_v28 = vld [vmem:[#allocation13 + $0x68] ss:$16 sps:$4 sm:$0xff]   ;;  %v4509_v15 = vadd.f32 %v9362_v12, %v1409_v22 }
 0x3d5   :  { %v9368_v9 = vpop.f32.mrf.mxu0  ;;  %6386 = vmatprep.subr.bf16.mxu0 %v8365_v35  ;;  %v8504_v22 = vld [vmem:[#allocation13 + $0x228] ss:$16 sps:$4 sm:$0xff]  }
 0x3d6   :  { %v9370_v54 = vpop.f32.mrf.mxu1  ;;  %v4511_v24 = vadd.f32 %v9368_v9, %v1413_v43  ;;  %v4550_v25 = vadd.f32 %v9365_v38, %v4509_v15  ;;  %v8512_v43 = vld [vmem:[#allocation13 + $0x20c] ss:$16 sps:$4 sm:$0xff]   ;;  %v8510_v15 = vld [vmem:[#allocation13 + $0x208] ss:$16 sps:$4 sm:$0xff]  }
 0x3d7   :  { %v4512_v44 = vpop.f32.mrf.mxu0 }
 0x3d8   :  { %v4553_v45 = vpop.f32.mrf.mxu1  ;;  %6387 = vmatpush1.bf16.msra.mxu0 %v8363_v40  ;;  %v4552_v10 = vadd.f32 %v9370_v54, %v4511_v24  ;;  %v8467_v54 = vld [vmem:[#allocation13 + $0x48c] ss:$16 sps:$4 sm:$0xff]  }
 0x3d9   :  { %v4513_v47 = vpop.f32.mrf.mxu0  ;;  %6388 = vmatprep.subr.bf16.mxu0 %v8368_v41  ;;  %v8518_v24 = vld [vmem:[#allocation13 + $0x3ec] ss:$16 sps:$4 sm:$0xff]  }
 0x3da   :  { %v4554_v20 = vpop.f32.mrf.mxu1  ;;  %v8465_v47 = vld [vmem:[#allocation13 + $0x488] ss:$16 sps:$4 sm:$0xff]  }
 0x3dc   :  { %6389 = vmatpush1.bf16.msra.mxu0 %v8366_v46 }
 0x3dd   :  { %6390 = vmatprep.subr.bf16.mxu0 %v8371_v49  ;;  %v8473_v49 = vld [vmem:[#allocation13 + $0x46c] ss:$16 sps:$4 sm:$0xff]  }
 0x3e0   :  { %6391 = vmatpush1.bf16.msra.mxu0 %v8369_v53  ;;  %v8468_v53 = vld [vmem:[#allocation13 + $0x2e8] ss:$16 sps:$4 sm:$0xff]  }
 0x3e1   :  { %6392 = vmatprep.subr.bf16.mxu0 %v8377_v55 }
 0x3e4   :  { %6393 = vmatpush1.bf16.msra.mxu0 %v8375_v28  ;;  %v8476_v28 = vld [vmem:[#allocation13 + $0x2cc] ss:$16 sps:$4 sm:$0xff]  }
 0x3e5   :  { %6394 = vmatprep.subr.bf16.mxu0 %v8383_v51  ;;  %v8471_v51 = vld [vmem:[#allocation13 + $0x468] ss:$16 sps:$4 sm:$0xff]  }
 0x3e8   :  { %6395 = vmatpush1.bf16.msra.mxu0 %v8381_v56  ;;  %v8479_v56 = vld [vmem:[#allocation13 + $0x44c] ss:$16 sps:$4 sm:$0xff]  }
 0x3e9   :  { %6396 = vmatprep.subr.bf16.mxu0 %v8389_v57  ;;  %v8474_v57 = vld [vmem:[#allocation13 + $0x2c8] ss:$16 sps:$4 sm:$0xff]  }
 0x3ec   :  { %6397 = vmatpush1.bf16.msra.mxu0 %v8387_v2  ;;  %v8482_v2 = vld [vmem:[#allocation13 + $0x2ac] ss:$16 sps:$4 sm:$0xff]  }
 0x3ed   :  { %6398 = vmatprep.subr.bf16.mxu0 %v8395_v3  ;;  %v8477_v3 = vld [vmem:[#allocation13 + $0x448] ss:$16 sps:$4 sm:$0xff]  }
 0x3f0   :  { %6399 = vmatpush1.bf16.msra.mxu0 %v8393_v62  ;;  %v8485_v62 = vld [vmem:[#allocation13 + $0x42c] ss:$16 sps:$4 sm:$0xff]  }
 0x3f1   :  { %6400 = vmatprep.subr.bf16.mxu0 %v8401_v36  ;;  %v8480_v36 = vld [vmem:[#allocation13 + $0x2a8] ss:$16 sps:$4 sm:$0xff]  }
 0x3f4   :  { %6401 = vmatpush2.bf16.msra.mxu0 %v8399_v8  ;;  %v8488_v8 = vld [vmem:[#allocation13 + $0x28c] ss:$16 sps:$4 sm:$0xff]  }
 0x3f5   :  { %6402 = vmatprep.subr.bf16.mxu0 %v8407_v52  ;;  %v8483_v52 = vld [vmem:[#allocation13 + $0x428] ss:$16 sps:$4 sm:$0xff]  }
 0x3f8   :  { %6403 = vmatpush2.bf16.msra.mxu0 %v8405_v0  ;;  %v8491_v0 = vld [vmem:[#allocation13 + $0x40c] ss:$16 sps:$4 sm:$0xff]  }
 0x3f9   :  { %6404 = vmatprep.subr.bf16.mxu0 %v8413_v33  ;;  %v8486_v33 = vld [vmem:[#allocation13 + $0x288] ss:$16 sps:$4 sm:$0xff]  }
 0x3fc   :  { %6405 = vmatpush2.bf16.msra.mxu0 %v8411_v14  ;;  %v8494_v14 = vld [vmem:[#allocation13 + $0x26c] ss:$16 sps:$4 sm:$0xff]  }
 0x3fd   :  { %6406 = vmatprep.subr.bf16.mxu0 %v8419_v58  ;;  %v8497_v58 = vld [vmem:[#allocation13 + $0x5ec] ss:$16 sps:$4 sm:$0xff]  }
 0x400   :  { %6407 = vmatpush2.bf16.msra.mxu0 %v8417_v42  ;;  %v8492_v42 = vld [vmem:[#allocation13 + $0x268] ss:$16 sps:$4 sm:$0xff]  }
 0x401   :  { %6408 = vmatprep.subr.bf16.mxu0 %v8425_v34  ;;  %v8500_v34 = vld [vmem:[#allocation13 + $0x24c] ss:$16 sps:$4 sm:$0xff]  }
 0x404   :  { %6409 = vmatpush2.bf16.msra.mxu0 %v8423_v63  ;;  %v8495_v63 = vld [vmem:[#allocation13 + $0x5e8] ss:$16 sps:$4 sm:$0xff]  }
 0x405   :  { %6410 = vmatprep.subr.bf16.mxu0 %v8431_v61  ;;  %v8503_v61 = vld [vmem:[#allocation13 + $0x5cc] ss:$16 sps:$4 sm:$0xff]  }
 0x408   :  { %6411 = vmatpush2.bf16.msra.mxu0 %v8429_v1  ;;  %v8498_v1 = vld [vmem:[#allocation13 + $0x248] ss:$16 sps:$4 sm:$0xff]  }
 0x409   :  { %6412 = vmatprep.subr.bf16.mxu0 %v8437_v50  ;;  %v8506_v50 = vld [vmem:[#allocation13 + $0x22c] ss:$16 sps:$4 sm:$0xff]  }
 0x40c   :  { %6413 = vmatpush2.bf16.msra.mxu0 %v8435_v60  ;;  %v8501_v60 = vld [vmem:[#allocation13 + $0x5c8] ss:$16 sps:$4 sm:$0xff]  }
 0x40d   :  { %6414 = vmatprep.subr.bf16.mxu0 %v8443_v6  ;;  %v8509_v6 = vld [vmem:[#allocation13 + $0x5ac] ss:$16 sps:$4 sm:$0xff]  }
 0x410   :  { %6415 = vmatpush2.bf16.msra.mxu0 %v8441_v48  ;;  %v8507_v48 = vld [vmem:[#allocation13 + $0x5a8] ss:$16 sps:$4 sm:$0xff]  }
 0x411   :  { %6466 = vmatprep.subr.bf16.mxu0 %v8449_v59  ;;  %v8515_v59 = vld [vmem:[#allocation13 + $0x58c] ss:$16 sps:$4 sm:$0xff]  }
 0x413   :  { %v4590_v26 = vpop.f32.mrf.mxu0  ;;  %6417 = vmatmul.mubr.bf16.vlgmr.msra.gmra.mxu0 %v9343_v5  ;;  %v8459_v5 = vld [vmem:[#allocation13 + $0x4a8] ss:$16 sps:$4 sm:$0xff]  }
 0x414   :  { %v4591_v39 = vadd.f32 %v4590_v26, %v4550_v25  ;;  %v4631_v23 = vpop.f32.mrf.mxu1  ;;  %6467 = vmatpush1.bf16.msra.mxu0 %v8447_v37  ;;  %6498 = vmatprep.mubr.bf16.mxu0 %v9354_v30  ;;  %v8513_v37 = vld [vmem:[#allocation13 + $0x588] ss:$16 sps:$4 sm:$0xff]   ;;  %v8524_v26 = vld [vmem:[#allocation13 + $0x3cc] ss:$16 sps:$4 sm:$0xff]  }
 0x415   :  { %v4592_v13 = vpop.f32.mrf.mxu0  ;;  %6468 = vmatprep.subr.bf16.mxu0 %v8455_v11  ;;  %v8521_v11 = vld [vmem:[#allocation13 + $0x56c] ss:$16 sps:$4 sm:$0xff]   ;;  %v8516_v25 = vld [vmem:[#allocation13 + $0x3e8] ss:$16 sps:$4 sm:$0xff]  }
 0x416   :  { %v4632_v32 = vadd.f32 %v4631_v23, %v4591_v39  ;;  %v4593_v17 = vadd.f32 %v4592_v13, %v4552_v10  ;;  %v4633_v35 = vpop.f32.mrf.mxu1  ;;  %v8519_v10 = vld [vmem:[#allocation13 + $0x568] ss:$16 sps:$4 sm:$0xff]   ;;  %v8527_v39 = vld [vmem:[#allocation13 + $0x54c] ss:$16 sps:$4 sm:$0xff]  }
 0x417   :  { %v4594_v12 = vpop.f32.mrf.mxu0  ;;  %v8522_v23 = vld [vmem:[#allocation13 + $0x3c8] ss:$16 sps:$4 sm:$0xff]  }
 0x418   :  { %v4644_v40 = vmul.f32 0.01, %v4632_v32  ;;  %v4634_v38 = vadd.f32 %v4633_v35, %v4593_v17  ;;  %v4635_v9 = vpop.f32.mrf.mxu1  ;;  %6469 = vmatpush1.bf16.msra.mxu0 %v8453_v27  ;;  %v8530_v27 = vld [vmem:[#allocation13 + $0x3ac] ss:$16 sps:$4 sm:$0xff]   ;;  %v8525_v13 = vld [vmem:[#allocation13 + $0x548] ss:$16 sps:$4 sm:$0xff]  }
 0x419   :  { %v4595_v41 = vpop.f32.mrf.mxu0  ;;  %6470 = vmatprep.subr.bf16.mxu0 %v8461_v29  ;;  %v8533_v29 = vld [vmem:[#allocation13 + $0x52c] ss:$16 sps:$4 sm:$0xff]   ;;  %v8531_v35 = vld [vmem:[#allocation13 + $0x528] ss:$16 sps:$4 sm:$0xff]  }
 0x41a   :  { %v4645_v44 = vmul.f32 0.01, %v4634_v38  ;;  %v4636_v45 = vpop.f32.mrf.mxu1  ;;  %v4652_v46 = vmax.f32 %v4632_v32, %v4644_v40  ;;  %v8528_v32 = vld [vmem:[#allocation13 + $0x3a8] ss:$16 sps:$4 sm:$0xff]   ;;  %v8536_v17 = vld [vmem:[#allocation13 + $0x38c] ss:$16 sps:$4 sm:$0xff]  }
 0x41b   :  { %v8539_v12 = vld [vmem:[#allocation13 + $0x50c] ss:$16 sps:$4 sm:$0xff]   ;;  %v8534_v40 = vld [vmem:[#allocation13 + $0x388] ss:$16 sps:$4 sm:$0xff]  }
 0x41c   :  { %v4653_v30 = vmax.f32 %v4634_v38, %v4645_v44  ;;  %6471 = vmatpush1.bf16.msra.mxu0 %v8459_v5  ;;  %v9384_v55 = vpack.c.bf16 %v4652_v46, %v4652_v46  ;;  %v8542_v38 = vld [vmem:[#allocation13 + $0x36c] ss:$16 sps:$4 sm:$0xff]   ;;  %v8537_v9 = vld [vmem:[#allocation13 + $0x508] ss:$16 sps:$4 sm:$0xff]   ;;  %v9389_v5 = vld [vmem:[#allocation14] sm:$0xf] }
 0x41d   :  { %6472 = vmatprep.subr.bf16.mxu0 %v8467_v54  ;;  %v8602_v41 = vld [vmem:[#allocation16 + $0x74] ss:$8 sps:$4 sm:$0xff]   ;;  %v8545_v44 = vld [vmem:[#allocation13 + $0x34c] ss:$16 sps:$4 sm:$0xff]   ;;  %v4923_v45 = vrot.slane %v9389_v5, %v9165_v16 }
 0x41e   :  { %v9382_v20 = vpack.c.bf16 %v4653_v30, %v4653_v30  ;;  %v8540_v54 = vld [vmem:[#allocation13 + $0x368] ss:$16 sps:$4 sm:$0xff]   ;;  %v8600_v46 = vld [vmem:[#allocation16 + $0x70] ss:$8 sps:$4 sm:$0xff]  }
 0x41f   :  { %v8605_v30 = vld [vmem:[#allocation16 + $0x64] ss:$8 sps:$4 sm:$0xff]  }
 0x420   :  { %6375 = vmatprep.mubr.bf16.mxu1 %v9382_v20  ;;  %6473 = vmatpush1.bf16.msra.mxu0 %v8465_v47  ;;  %v8543_v47 = vld [vmem:[#allocation13 + $0x348] ss:$16 sps:$4 sm:$0xff]  }
 0x421   :  { %6376 = vmatmul.mubr.bf16.vlgmr.msra.gmra.mxu1 %v9384_v55  ;;  %6474 = vmatprep.subr.bf16.mxu0 %v8473_v49  ;;  %v4927_v49 = vrot.slane %v9389_v5, %v9173_v19 }
 0x422   :  { %6426 = vmatpush1.bf16.msra.mxu1 %v8468_v53  ;;  %6457 = vmatprep.mubr.bf16.mxu1 %v9325_v4  ;;  %v8489_v4 = vld [vmem:[#allocation13 + $0x408] ss:$16 sps:$4 sm:$0xff]  }
 0x423   :  { %6427 = vmatprep.subr.bf16.mxu1 %v8476_v28  ;;  %v8548_v28 = vld [vmem:[#allocation13 + $0x32c] ss:$16 sps:$4 sm:$0xff]  }
 0x424   :  { %6475 = vmatpush1.bf16.msra.mxu0 %v8471_v51 }
 0x425   :  { %6476 = vmatprep.subr.bf16.mxu0 %v8479_v56 }
 0x426   :  { %6428 = vmatpush1.bf16.msra.mxu1 %v8474_v57  ;;  %v8603_v57 = vld [vmem:[#allocation16 + $0x60] ss:$8 sps:$4 sm:$0xff]  }
 0x427   :  { %6429 = vmatprep.subr.bf16.mxu1 %v8482_v2 }
 0x428   :  { %6477 = vmatpush1.bf16.msra.mxu0 %v8477_v3  ;;  %v8608_v3 = vld [vmem:[#allocation16 + $0x54] ss:$8 sps:$4 sm:$0xff]  }
 0x429   :  { %6478 = vmatprep.subr.bf16.mxu0 %v8485_v62 }
 0x42a   :  { %6430 = vmatpush1.bf16.msra.mxu1 %v8480_v36 }
 0x42b   :  { %6431 = vmatprep.subr.bf16.mxu1 %v8488_v8 }
 0x42c   :  { %6479 = vmatpush1.bf16.msra.mxu0 %v8483_v52  ;;  %v8546_v52 = vld [vmem:[#allocation13 + $0x328] ss:$16 sps:$4 sm:$0xff]  }
 0x42d   :  { %6480 = vmatprep.subr.bf16.mxu0 %v8491_v0 }
 0x42e   :  { %6432 = vmatpush1.bf16.msra.mxu1 %v8486_v33  ;;  %v8551_v33 = vld [vmem:[#allocation13 + $0x30c] ss:$16 sps:$4 sm:$0xff]  }
 0x42f   :  { %6433 = vmatprep.subr.bf16.mxu1 %v8494_v14 }
 0x430   :  { %6481 = vmatpush1.bf16.msra.mxu0 %v8489_v4  ;;  %v8606_v4 = vld [vmem:[#allocation16 + $0x50] ss:$8 sps:$4 sm:$0xff]  }
 0x431   :  { %6482 = vmatprep.subr.bf16.mxu0 %v8497_v58 }
 0x432   :  { %6434 = vmatpush1.bf16.msra.mxu1 %v8492_v42  ;;  %v8611_v42 = vld [vmem:[#allocation16 + $0x44] ss:$8 sps:$4 sm:$0xff]  }
 0x433   :  { %6435 = vmatprep.subr.bf16.mxu1 %v8500_v34 }
 0x434   :  { %6483 = vmatpush2.bf16.msra.mxu0 %v8495_v63  ;;  %v8549_v63 = vld [vmem:[#allocation13 + $0x308] ss:$16 sps:$4 sm:$0xff]  }
 0x435   :  { %6484 = vmatprep.subr.bf16.mxu0 %v8503_v61  ;;  %v8554_v61 = vld [vmem:[#allocation13 + $0x6ec] ss:$16 sps:$4 sm:$0xff]  }
 0x436   :  { %6436 = vmatpush1.bf16.msra.mxu1 %v8498_v1  ;;  %v8609_v1 = vld [vmem:[#allocation16 + $0x40] ss:$8 sps:$4 sm:$0xff]  }
 0x437   :  { %6437 = vmatprep.subr.bf16.mxu1 %v8506_v50  ;;  %v8614_v50 = vld [vmem:[#allocation16 + $0x34] ss:$8 sps:$4 sm:$0xff]  }
 0x438   :  { %6485 = vmatpush2.bf16.msra.mxu0 %v8501_v60  ;;  %v8552_v60 = vld [vmem:[#allocation13 + $0x6e8] ss:$16 sps:$4 sm:$0xff]  }
 0x439   :  { %6486 = vmatprep.subr.bf16.mxu0 %v8509_v6  ;;  %v8557_v6 = vld [vmem:[#allocation13 + $0x6cc] ss:$16 sps:$4 sm:$0xff]  }
 0x43a   :  { %6438 = vmatpush1.bf16.msra.mxu1 %v8504_v22  ;;  %v8612_v22 = vld [vmem:[#allocation16 + $0x30] ss:$8 sps:$4 sm:$0xff]  }
 0x43b   :  { %6439 = vmatprep.subr.bf16.mxu1 %v8512_v43  ;;  %v8617_v43 = vld [vmem:[#allocation16 + $0x24] ss:$8 sps:$4 sm:$0xff]  }
 0x43c   :  { %6487 = vmatpush2.bf16.msra.mxu0 %v8507_v48  ;;  %v8555_v48 = vld [vmem:[#allocation13 + $0x6c8] ss:$16 sps:$4 sm:$0xff]  }
 0x43d   :  { %6488 = vmatprep.subr.bf16.mxu0 %v8515_v59  ;;  %v8560_v59 = vld [vmem:[#allocation13 + $0x6ac] ss:$16 sps:$4 sm:$0xff]  }
 0x43e   :  { %6440 = vmatpush1.bf16.msra.mxu1 %v8510_v15  ;;  %v8615_v15 = vld [vmem:[#allocation16 + $0x20] ss:$8 sps:$4 sm:$0xff]  }
 0x43f   :  { %6441 = vmatprep.subr.bf16.mxu1 %v8518_v24  ;;  %v8620_v24 = vld [vmem:[#allocation16 + $0x14] ss:$8 sps:$4 sm:$0xff]  }
 0x440   :  { %6489 = vmatpush2.bf16.msra.mxu0 %v8513_v37  ;;  %v8558_v37 = vld [vmem:[#allocation13 + $0x6a8] ss:$16 sps:$4 sm:$0xff]  }
 0x441   :  { %6490 = vmatprep.subr.bf16.mxu0 %v8521_v11  ;;  %v8563_v11 = vld [vmem:[#allocation13 + $0x68c] ss:$16 sps:$4 sm:$0xff]  }
 0x442   :  { %6442 = vmatpush2.bf16.msra.mxu1 %v8516_v25  ;;  %v8618_v25 = vld [vmem:[#allocation16 + $0x10] ss:$8 sps:$4 sm:$0xff]  }
 0x443   :  { %6443 = vmatprep.subr.bf16.mxu1 %v8524_v26  ;;  %v8561_v26 = vld [vmem:[#allocation13 + $0x688] ss:$16 sps:$4 sm:$0xff]  }
 0x444   :  { %6491 = vmatpush2.bf16.msra.mxu0 %v8519_v10  ;;  %v8566_v10 = vld [vmem:[#allocation13 + $0x66c] ss:$16 sps:$4 sm:$0xff]  }
 0x445   :  { %6492 = vmatprep.subr.bf16.mxu0 %v8527_v39  ;;  %v8626_v39 = vld [vmem:[#allocation16 + $0xf4] ss:$8 sps:$4 sm:$0xff]  }
 0x446   :  { %6444 = vmatpush2.bf16.msra.mxu1 %v8522_v23  ;;  %v8564_v23 = vld [vmem:[#allocation13 + $0x668] ss:$16 sps:$4 sm:$0xff]  }
 0x447   :  { %6445 = vmatprep.subr.bf16.mxu1 %v8530_v27  ;;  %v8569_v27 = vld [vmem:[#allocation13 + $0x64c] ss:$16 sps:$4 sm:$0xff]  }
 0x448   :  { %6493 = vmatpush2.bf16.msra.mxu0 %v8525_v13  ;;  %v8624_v13 = vld [vmem:[#allocation16 + $0xf0] ss:$8 sps:$4 sm:$0xff]  }
 0x449   :  { %6494 = vmatprep.subr.bf16.mxu0 %v8533_v29  ;;  %v8629_v29 = vld [vmem:[#allocation16 + $0xe4] ss:$8 sps:$4 sm:$0xff]  }
 0x44a   :  { %6446 = vmatpush2.bf16.msra.mxu1 %v8528_v32  ;;  %v8567_v32 = vld [vmem:[#allocation13 + $0x648] ss:$16 sps:$4 sm:$0xff]  }
 0x44b   :  { %6447 = vmatprep.subr.bf16.mxu1 %v8536_v17  ;;  %v8572_v17 = vld [vmem:[#allocation13 + $0x62c] ss:$16 sps:$4 sm:$0xff]  }
 0x44c   :  { %6495 = vmatpush2.bf16.msra.mxu0 %v8531_v35  ;;  %v8627_v35 = vld [vmem:[#allocation16 + $0xe0] ss:$8 sps:$4 sm:$0xff]  }
 0x44d   :  { %6496 = vmatprep.subr.bf16.mxu0 %v8539_v12  ;;  %v8632_v12 = vld [vmem:[#allocation16 + $0xd4] ss:$8 sps:$4 sm:$0xff]  }
 0x44e   :  { %6448 = vmatpush2.bf16.msra.mxu1 %v8534_v40  ;;  %v8570_v40 = vld [vmem:[#allocation13 + $0x628] ss:$16 sps:$4 sm:$0xff]  }
 0x44f   :  { %6449 = vmatprep.subr.bf16.mxu1 %v8542_v38  ;;  %v8575_v38 = vld [vmem:[#allocation13 + $0x60c] ss:$16 sps:$4 sm:$0xff]  }
 0x450   :  { %6497 = vmatpush2.bf16.msra.mxu0 %v8537_v9  ;;  %v8630_v9 = vld [vmem:[#allocation16 + $0xd0] ss:$8 sps:$4 sm:$0xff]  }
 0x451   :  { %6956 = vmatprep.subr.bf16.mxu0 %v8602_v41  ;;  %v8635_v41 = vld [vmem:[#allocation16 + $0xc4] ss:$8 sps:$4 sm:$0xff]  }
 0x452   :  { %6450 = vmatpush2.bf16.msra.mxu1 %v8540_v54  ;;  %v8573_v54 = vld [vmem:[#allocation13 + $0x608] ss:$16 sps:$4 sm:$0xff]  }
 0x453   :  { %v6254_v53 = vpop.f32.mrf.mxu0  ;;  %6499 = vmatmul.mubr.bf16.vlgmr.msra.gmra.mxu0 %v9360_v7  ;;  %6451 = vmatprep.subr.bf16.mxu1 %v8545_v44  ;;  %v8578_v44 = vld [vmem:[#allocation13 + $0x7ec] ss:$16 sps:$4 sm:$0xff]  }
 0x454   :  { %v6255_v51 = vadd.f32 %v6254_v53, %v4923_v45  ;;  %v6295_v56 = vpop.f32.mrf.mxu1  ;;  %6957 = vmatpush1.bf16.msra.mxu0 %v8600_v46  ;;  %v8633_v45 = vld [vmem:[#allocation16 + $0xc0] ss:$8 sps:$4 sm:$0xff]   ;;  %v8638_v46 = vld [vmem:[#allocation16 + $0xb4] ss:$8 sps:$4 sm:$0xff]   ;;  %v8641_v53 = vld [vmem:[#allocation16 + $0xa4] ss:$8 sps:$4 sm:$0xff]  }
 0x455   :  { %v6256_v2 = vpop.f32.mrf.mxu0  ;;  %6958 = vmatprep.subr.bf16.mxu0 %v8605_v30  ;;  %v8576_v30 = vld [vmem:[#allocation13 + $0x7e8] ss:$16 sps:$4 sm:$0xff]  }
 0x456   :  { %v9396_v62 = vadd.f32 %v6295_v56, %v6255_v51  ;;  %v6257_v36 = vadd.f32 %v6256_v2, %v4927_v49  ;;  %v6297_v8 = vpop.f32.mrf.mxu1  ;;  %6452 = vmatpush2.bf16.msra.mxu1 %v8543_v47  ;;  %v8581_v47 = vld [vmem:[#allocation13 + $0x7cc] ss:$16 sps:$4 sm:$0xff]   ;;  %v8582_v2 = vld [vmem:[#allocation13 + $0x7a8] ss:$16 sps:$4 sm:$0xff]  }
 0x457   :  { %v6258_v0 = vpop.f32.mrf.mxu0  ;;  %6453 = vmatprep.subr.bf16.mxu1 %v8548_v28  ;;  %v8636_v49 = vld [vmem:[#allocation16 + $0xb0] ss:$8 sps:$4 sm:$0xff]   ;;  %v8579_v28 = vld [vmem:[#allocation13 + $0x7c8] ss:$16 sps:$4 sm:$0xff]   ;;  %v8639_v56 = vld [vmem:[#allocation16 + $0xa0] ss:$8 sps:$4 sm:$0xff]  }
 0x458   :  { %v9398_v14 = vadd.f32 %v6297_v8, %v6257_v36  ;;  %v6299_v7 = vpop.f32.mrf.mxu1  ;;  %6959 = vmatpush1.bf16.msra.mxu0 %v8603_v57  ;;  %v8584_v51 = vld [vmem:[#allocation13 + $0x7ac] ss:$16 sps:$4 sm:$0xff]   ;;  %v8644_v57 = vld [vmem:[#allocation16 + $0x94] ss:$8 sps:$4 sm:$0xff]   ;;  %v8647_v8 = vld [vmem:[#allocation16 + $0x84] ss:$8 sps:$4 sm:$0xff]  }
 0x459   :  { %v6259_v58 = vpop.f32.mrf.mxu0  ;;  %6960 = vmatprep.subr.bf16.mxu0 %v8608_v3  ;;  %v8587_v3 = vld [vmem:[#allocation13 + $0x78c] ss:$16 sps:$4 sm:$0xff]   ;;  %v8588_v7 = vld [vmem:[#allocation13 + $0x768] ss:$16 sps:$4 sm:$0xff]  }
 0x45a   :  { %v6300_v34 = vpop.f32.mrf.mxu1  ;;  %6454 = vmatpush2.bf16.msra.mxu1 %v8546_v52  ;;  %v8642_v36 = vld [vmem:[#allocation16 + $0x90] ss:$8 sps:$4 sm:$0xff]   ;;  %v8585_v52 = vld [vmem:[#allocation13 + $0x788] ss:$16 sps:$4 sm:$0xff]  }
 0x45b   :  { %6455 = vmatprep.subr.bf16.mxu1 %v8551_v33  ;;  %v8590_v0 = vld [vmem:[#allocation13 + $0x76c] ss:$16 sps:$4 sm:$0xff]   ;;  %v8591_v58 = vld [vmem:[#allocation13 + $0x748] ss:$16 sps:$4 sm:$0xff]  }
 0x45c   :  { %6961 = vmatpush1.bf16.msra.mxu0 %v8606_v4  ;;  %v8645_v33 = vld [vmem:[#allocation16 + $0x80] ss:$8 sps:$4 sm:$0xff]  }
 0x45d   :  { %6962 = vmatprep.subr.bf16.mxu0 %v8611_v42  ;;  %v8593_v4 = vld [vmem:[#allocation13 + $0x74c] ss:$16 sps:$4 sm:$0xff]  }
 0x45e   :  { %6456 = vmatpush2.bf16.msra.mxu1 %v8549_v63  ;;  %v8596_v34 = vld [vmem:[#allocation13 + $0x72c] ss:$16 sps:$4 sm:$0xff]  }
 0x45f   :  { %6507 = vmatprep.subr.bf16.mxu1 %v8554_v61 }
 0x460   :  { %6963 = vmatpush1.bf16.msra.mxu0 %v8609_v1 }
 0x461   :  { %6458 = vmatmul.mubr.bf16.vlgmr.msra.gmra.mxu1 %v9345_v31  ;;  %6964 = vmatprep.subr.bf16.mxu0 %v8614_v50  ;;  %v8623_v31 = vld [vmem:[#allocation16 + $0x4] ss:$8 sps:$4 sm:$0xff]  }
 0x462   :  { %6508 = vmatpush1.bf16.msra.mxu1 %v8552_v60  ;;  %6539 = vmatprep.mubr.bf16.mxu1 %v9382_v20  ;;  %v8621_v20 = vld [vmem:[#allocation16] ss:$8 sps:$4 sm:$0xff]   ;;  %v8594_v50 = vld [vmem:[#allocation13 + $0x728] ss:$16 sps:$4 sm:$0xff]  }
 0x463   :  { %6509 = vmatprep.subr.bf16.mxu1 %v8557_v6  ;;  %v8599_v6 = vld [vmem:[#allocation13 + $0x70c] ss:$16 sps:$4 sm:$0xff]  }
 0x464   :  { %6965 = vmatpush1.bf16.msra.mxu0 %v8612_v22 }
 0x465   :  { %6966 = vmatprep.subr.bf16.mxu0 %v8617_v43  ;;  %v8597_v43 = vld [vmem:[#allocation13 + $0x708] ss:$16 sps:$4 sm:$0xff]  }
 0x466   :  { %6510 = vmatpush1.bf16.msra.mxu1 %v8555_v48  ;;  %v8648_v48 = vld [vmem:[#allocation16 + $0x170] ss:$8 sps:$4 sm:$0xff]  }
 0x467   :  { %6511 = vmatprep.subr.bf16.mxu1 %v8560_v59  ;;  %v8650_v59 = vld [vmem:[#allocation16 + $0x174] ss:$8 sps:$4 sm:$0xff]  }
 0x468   :  { %6967 = vmatpush1.bf16.msra.mxu0 %v8615_v15  ;;  %v8651_v15 = vld [vmem:[#allocation16 + $0x160] ss:$8 sps:$4 sm:$0xff]  }
 0x469   :  { %6968 = vmatprep.subr.bf16.mxu0 %v8620_v24  ;;  %v8654_v24 = vld [vmem:[#allocation16 + $0x150] ss:$8 sps:$4 sm:$0xff]  }
 0x46a   :  { %6512 = vmatpush1.bf16.msra.mxu1 %v8558_v37  ;;  %v8659_v37 = vld [vmem:[#allocation16 + $0x144] ss:$8 sps:$4 sm:$0xff]  }
 0x46b   :  { %6513 = vmatprep.subr.bf16.mxu1 %v8563_v11  ;;  %v8657_v11 = vld [vmem:[#allocation16 + $0x140] ss:$8 sps:$4 sm:$0xff]  }
 0x46c   :  { %6969 = vmatpush1.bf16.msra.mxu0 %v8618_v25  ;;  %v8662_v25 = vld [vmem:[#allocation16 + $0x134] ss:$8 sps:$4 sm:$0xff]  }
 0x46d   :  { %6970 = vmatprep.subr.bf16.mxu0 %v8623_v31  ;;  %v8660_v31 = vld [vmem:[#allocation16 + $0x130] ss:$8 sps:$4 sm:$0xff]  }
 0x46e   :  { %6514 = vmatpush1.bf16.msra.mxu1 %v8561_v26  ;;  %v8663_v26 = vld [vmem:[#allocation16 + $0x120] ss:$8 sps:$4 sm:$0xff]  }
 0x46f   :  { %6515 = vmatprep.subr.bf16.mxu1 %v8566_v10  ;;  %v8668_v10 = vld [vmem:[#allocation16 + $0x114] ss:$8 sps:$4 sm:$0xff]  }
 0x470   :  { %6971 = vmatpush1.bf16.msra.mxu0 %v8621_v20  ;;  %v8666_v20 = vld [vmem:[#allocation16 + $0x110] ss:$8 sps:$4 sm:$0xff]  }
 0x471   :  { %6972 = vmatprep.subr.bf16.mxu0 %v8626_v39  ;;  %v8671_v39 = vld [vmem:[#allocation16 + $0x104] ss:$8 sps:$4 sm:$0xff]  }
 0x472   :  { %6516 = vmatpush1.bf16.msra.mxu1 %v8564_v23  ;;  %v8669_v23 = vld [vmem:[#allocation16 + $0x100] ss:$8 sps:$4 sm:$0xff]  }
 0x473   :  { %6517 = vmatprep.subr.bf16.mxu1 %v8569_v27  ;;  %v8674_v27 = vld [vmem:[#allocation16 + $0x1f4] ss:$8 sps:$4 sm:$0xff]  }
 0x474   :  { %6973 = vmatpush2.bf16.msra.mxu0 %v8624_v13  ;;  %v8672_v13 = vld [vmem:[#allocation16 + $0x1f0] ss:$8 sps:$4 sm:$0xff]  }
 0x475   :  { %6974 = vmatprep.subr.bf16.mxu0 %v8629_v29  ;;  %v8677_v29 = vld [vmem:[#allocation16 + $0x1e4] ss:$8 sps:$4 sm:$0xff]  }
 0x476   :  { %6518 = vmatpush1.bf16.msra.mxu1 %v8567_v32  ;;  %v8675_v32 = vld [vmem:[#allocation16 + $0x1e0] ss:$8 sps:$4 sm:$0xff]  }
 0x477   :  { %6519 = vmatprep.subr.bf16.mxu1 %v8572_v17  ;;  %v8680_v17 = vld [vmem:[#allocation16 + $0x1d4] ss:$8 sps:$4 sm:$0xff]  }
 0x478   :  { %6975 = vmatpush2.bf16.msra.mxu0 %v8627_v35  ;;  %v8678_v35 = vld [vmem:[#allocation16 + $0x1d0] ss:$8 sps:$4 sm:$0xff]  }
 0x479   :  { %6976 = vmatprep.subr.bf16.mxu0 %v8632_v12  ;;  %v8683_v12 = vld [vmem:[#allocation16 + $0x1c4] ss:$8 sps:$4 sm:$0xff]  }
 0x47a   :  { %6520 = vmatpush1.bf16.msra.mxu1 %v8570_v40  ;;  %v8681_v40 = vld [vmem:[#allocation16 + $0x1c0] ss:$8 sps:$4 sm:$0xff]  }
 0x47b   :  { %6521 = vmatprep.subr.bf16.mxu1 %v8575_v38 }
 0x47c   :  { %6977 = vmatpush2.bf16.msra.mxu0 %v8630_v9  ;;  %v8686_v9 = vld [vmem:[#allocation16 + $0x1b4] ss:$8 sps:$4 sm:$0xff]  }
 0x47d   :  { %6978 = vmatprep.subr.bf16.mxu0 %v8635_v41 }
 0x47e   :  { %6522 = vmatpush1.bf16.msra.mxu1 %v8573_v54  ;;  %v8684_v54 = vld [vmem:[#allocation16 + $0x1b0] ss:$8 sps:$4 sm:$0xff]  }
 0x47f   :  { %6523 = vmatprep.subr.bf16.mxu1 %v8578_v44 }
 0x480   :  { %6979 = vmatpush2.bf16.msra.mxu0 %v8633_v45 }
 0x481   :  { %6980 = vmatprep.subr.bf16.mxu0 %v8638_v46  ;;  %v8689_v46 = vld [vmem:[#allocation16 + $0x1a4] ss:$8 sps:$4 sm:$0xff]  }
 0x482   :  { %6524 = vmatpush2.bf16.msra.mxu1 %v8576_v30 }
 0x483   :  { %6525 = vmatprep.subr.bf16.mxu1 %v8581_v47  ;;  %v8687_v47 = vld [vmem:[#allocation16 + $0x1a0] ss:$8 sps:$4 sm:$0xff]  }
 0x484   :  { %6981 = vmatpush2.bf16.msra.mxu0 %v8636_v49 }
 0x485   :  { %6982 = vmatprep.subr.bf16.mxu0 %v8641_v53 }
 0x486   :  { %6526 = vmatpush2.bf16.msra.mxu1 %v8579_v28 }
 0x487   :  { %6527 = vmatprep.subr.bf16.mxu1 %v8584_v51 }
 0x488   :  { %6983 = vmatpush2.bf16.msra.mxu0 %v8639_v56  ;;  %v8692_v56 = vld [vmem:[#allocation16 + $0x194] ss:$8 sps:$4 sm:$0xff]  }
 0x489   :  { %6984 = vmatprep.subr.bf16.mxu0 %v8644_v57 }
 0x48a   :  { %6528 = vmatpush2.bf16.msra.mxu1 %v8582_v2  ;;  %v8690_v2 = vld [vmem:[#allocation16 + $0x190] ss:$8 sps:$4 sm:$0xff]  }
 0x48b   :  { %6529 = vmatprep.subr.bf16.mxu1 %v8587_v3 }
 0x48c   :  { %6985 = vmatpush2.bf16.msra.mxu0 %v8642_v36 }
 0x48d   :  { %6986 = vmatprep.subr.bf16.mxu0 %v8647_v8 }
 0x48e   :  { %6530 = vmatpush2.bf16.msra.mxu1 %v8585_v52 }
 0x48f   :  { %6531 = vmatprep.subr.bf16.mxu1 %v8590_v0  ;;  %v8695_v0 = vld [vmem:[#allocation16 + $0x184] ss:$8 sps:$4 sm:$0xff]  }
 0x490   :  { %6987 = vmatpush2.bf16.msra.mxu0 %v8645_v33  ;;  %v8693_v33 = vld [vmem:[#allocation16 + $0x180] ss:$8 sps:$4 sm:$0xff]  }
 0x492   :  { %6532 = vmatpush2.bf16.msra.mxu1 %v8588_v7 }
 0x493   :  { %v6336_v42 = vpop.f32.mrf.mxu0  ;;  %6533 = vmatprep.subr.bf16.mxu1 %v8593_v4 }
 0x494   :  { %v9403_v63 = vadd.f32 %v6336_v42, %v9396_v62  ;;  %v8653_v62 = vld [vmem:[#allocation16 + $0x164] ss:$8 sps:$4 sm:$0xff]  }
 0x495   :  { %v6338_v61 = vpop.f32.mrf.mxu0 }
 0x496   :  { %v9406_v1 = vadd.f32 %v6338_v61, %v9398_v14  ;;  %6534 = vmatpush2.bf16.msra.mxu1 %v8591_v58  ;;  %v8656_v14 = vld [vmem:[#allocation16 + $0x154] ss:$8 sps:$4 sm:$0xff]   ;;  %v4931_v61 = vrot.slane %v9389_v5, %v9170_v18  ;;  %v8700_v18 = vld [vmem:[#allocation19 + $0x68] sm:$0xff]  }
 0x497   :  { %v6340_v60 = vpop.f32.mrf.mxu0  ;;  %6535 = vmatprep.subr.bf16.mxu1 %v8596_v34 }
 0x499   :  { %v6341_v22 = vpop.f32.mrf.mxu0 }
 0x49a   :  { %6536 = vmatpush2.bf16.msra.mxu1 %v8594_v50 }
 0x49b   :  { %6537 = vmatprep.subr.bf16.mxu1 %v8599_v6 }
 0x49e   :  { %6538 = vmatpush2.bf16.msra.mxu1 %v8597_v43 }
 0x49f   :  { %6997 = vmatprep.subr.bf16.mxu1 %v8650_v59 }
 0x4a1   :  { %6540 = vmatmul.mubr.bf16.vlgmr.msra.gmra.mxu1 %v9384_v55  ;;  %v8665_v55 = vld [vmem:[#allocation16 + $0x124] ss:$8 sps:$4 sm:$0xff]  }
 0x4a2   :  { %6998 = vmatpush1.bf16.msra.mxu1 %v8648_v48 }
 0x4a3   :  { %6999 = vmatprep.subr.bf16.mxu1 %v8653_v62 }
 0x4a6   :  { %7000 = vmatpush1.bf16.msra.mxu1 %v8651_v15 }
 0x4a7   :  { %7001 = vmatprep.subr.bf16.mxu1 %v8656_v14 }
 0x4aa   :  { %7002 = vmatpush1.bf16.msra.mxu1 %v8654_v24  ;;  %v8696_v24 = vld [vmem:[#allocation19 + $0x78] sm:$0xff]  }
 0x4ab   :  { %7003 = vmatprep.subr.bf16.mxu1 %v8659_v37  ;;  %v8697_v37 = vld [vmem:[#allocation19 + $0x38] sm:$0xff]   ;;  %8172 = vmatprep.subr.bf16.mxu0 %v8696_v24 }
 0x4ae   :  { %7004 = vmatpush1.bf16.msra.mxu1 %v8657_v11  ;;  %v8698_v11 = vld [vmem:[#allocation19 + $0x70] sm:$0xff]  }
 0x4af   :  { %7005 = vmatprep.subr.bf16.mxu1 %v8662_v25  ;;  %v8699_v25 = vld [vmem:[#allocation19 + $0x30] sm:$0xff]  }
 0x4b2   :  { %7006 = vmatpush1.bf16.msra.mxu1 %v8660_v31  ;;  %v8703_v31 = vld [vmem:[#allocation19 + $0x20] sm:$0xff]  }
 0x4b3   :  { %7007 = vmatprep.subr.bf16.mxu1 %v8665_v55  ;;  %v8704_v55 = vld [vmem:[#allocation19 + $0x58] sm:$0xff]  }
 0x4b6   :  { %7008 = vmatpush1.bf16.msra.mxu1 %v8663_v26  ;;  %v8705_v26 = vld [vmem:[#allocation19 + $0x18] sm:$0xff]  }
 0x4b7   :  { %7009 = vmatprep.subr.bf16.mxu1 %v8668_v10 }
 0x4ba   :  { %7010 = vmatpush1.bf16.msra.mxu1 %v8666_v20 }
 0x4bb   :  { %7011 = vmatprep.subr.bf16.mxu1 %v8671_v39 }
 0x4be   :  { %7012 = vmatpush1.bf16.msra.mxu1 %v8669_v23 }
 0x4bf   :  { %7013 = vmatprep.subr.bf16.mxu1 %v8674_v27 }
 0x4c2   :  { %7014 = vmatpush2.bf16.msra.mxu1 %v8672_v13 }
 0x4c3   :  { %7015 = vmatprep.subr.bf16.mxu1 %v8677_v29 }
 0x4c6   :  { %7016 = vmatpush2.bf16.msra.mxu1 %v8675_v32 }
 0x4c7   :  { %7017 = vmatprep.subr.bf16.mxu1 %v8680_v17 }
 0x4ca   :  { %7018 = vmatpush2.bf16.msra.mxu1 %v8678_v35 }
 0x4cb   :  { %7019 = vmatprep.subr.bf16.mxu1 %v8683_v12 }
 0x4ce   :  { %7020 = vmatpush2.bf16.msra.mxu1 %v8681_v40 }
 0x4cf   :  { %7021 = vmatprep.subr.bf16.mxu1 %v8686_v9 }
 0x4d2   :  { %7022 = vmatpush2.bf16.msra.mxu1 %v8684_v54 }
 0x4d3   :  { %v6418_v38 = vpop.f32.mrf.mxu0  ;;  %7023 = vmatprep.subr.bf16.mxu1 %v8689_v46  ;;  %v8709_v46 = vld [vmem:[#allocation19 + $0x8] sm:$0xff]  }
 0x4d4   :  { %v6419_v50 = vadd.f32 %v6418_v38, %v4931_v61  ;;  %v8706_v38 = vld [vmem:[#allocation19 + $0x50] sm:$0xff]  }
 0x4d5   :  { %v6420_v41 = vpop.f32.mrf.mxu0 }
 0x4d6   :  { %7024 = vmatpush2.bf16.msra.mxu1 %v8687_v47  ;;  %v8710_v47 = vld [vmem:[#allocation19 + $0x40] sm:$0xff]  }
 0x4d7   :  { %v6422_v44 = vpop.f32.mrf.mxu0  ;;  %7025 = vmatprep.subr.bf16.mxu1 %v8692_v56 }
 0x4d8   :  { %v8708_v44 = vld [vmem:[#allocation19 + $0x48] sm:$0xff]  }
 0x4d9   :  { %v6423_v45 = vpop.f32.mrf.mxu0 }
 0x4da   :  { %7026 = vmatpush2.bf16.msra.mxu1 %v8690_v2 }
 0x4db   :  { %7027 = vmatprep.subr.bf16.mxu1 %v8695_v0 }
 0x4de   :  { %7028 = vmatpush2.bf16.msra.mxu1 %v8693_v33 }
 0x4e1   :  { %v6377_v30 = vpop.f32.mrf.mxu1 }
 0x4e2   :  { %v6378_v49 = vadd.f32 %v6377_v30, %v9403_v63 }
 0x4e3   :  { %v6379_v53 = vpop.f32.mrf.mxu1 }
 0x4e4   :  { %v6548_v28 = vmul.f32 0.01, %v6378_v49  ;;  %v6380_v51 = vadd.f32 %v6379_v53, %v9406_v1  ;;  %v4935_v1 = vrot.slane %v9389_v5, %v9178_v21  ;;  %v8701_v21 = vld [vmem:[#allocation19 + $0x28] sm:$0xff]   ;;  %v8702_v5 = vld [vmem:[#allocation19 + $0x60] sm:$0xff]   ;;  %v6624_v53 = vld [vmem:[#allocation17] sm:$0x3] }
 0x4e5   :  { %v6381_v57 = vpop.f32.mrf.mxu1 }
 0x4e6   :  { %v6549_v3 = vmul.f32 0.01, %v6380_v51  ;;  %v6552_v36 = vmax.f32 %v6378_v49, %v6548_v28  ;;  %v6421_v6 = vadd.f32 %v6420_v41, %v4935_v1  ;;  %v8707_v41 = vld [vmem:[#allocation19 + $0x10] sm:$0xff]   ;;  %v8711_v49 = vld [vmem:[#allocation19] sm:$0xff]   ;;  %v6629_v28 = vrot.slane %v6624_v53, %v9165_v16 }
 0x4e7   :  { %v6382_v8 = vpop.f32.mrf.mxu1  ;;  %v8153_v16 = vld [vmem:[#allocation20] ss:$0 sm:$0xff] }
 0x4e8   :  { %v6553_v52 = vmax.f32 %v6380_v51, %v6549_v3  ;;  %v6556_v4 = vpack.c.bf16 %v6552_v36, %v6552_v36  ;;  %v6633_v51 = vrot.slane %v6624_v53, %v9173_v19 }
 0x4ea   :  { %v6557_v7 = vpack.c.bf16 %v6553_v52, %v6553_v52 }
 0x4ec   :  { %6988 = vmatprep.mubr.bf16.mxu0 %v6557_v7 }
 0x4ed   :  { %6989 = vmatmul.mubr.bf16.vlgmr.msra.gmra.mxu0 %v6556_v4 }
 0x4ee   :  { %8173 = vmatpush3.bf16.msra.mxu0 %v8697_v37 }
 0x4ef   :  { %8174 = vmatprep.subr.bf16.mxu0 %v8698_v11 }
 0x4f2   :  { %8175 = vmatpush3.bf16.msra.mxu0 %v8699_v25 }
 0x4f3   :  { %8176 = vmatprep.subr.bf16.mxu0 %v8700_v18 }
 0x4f6   :  { %8177 = vmatpush3.bf16.msra.mxu0 %v8701_v21 }
 0x4f7   :  { %8178 = vmatprep.subr.bf16.mxu0 %v8702_v5 }
 0x4fa   :  { %8179 = vmatpush3.bf16.msra.mxu0 %v8703_v31 }
 0x4fb   :  { %8180 = vmatprep.subr.bf16.mxu0 %v8704_v55 }
 0x4fe   :  { %8181 = vmatpush3.bf16.msra.mxu0 %v8705_v26 }
 0x4ff   :  { %8182 = vmatprep.subr.bf16.mxu0 %v8706_v38 }
 0x502   :  { %8183 = vmatpush3.bf16.msra.mxu0 %v8707_v41 }
 0x503   :  { %8184 = vmatprep.subr.bf16.mxu0 %v8708_v44 }
 0x506   :  { %8185 = vmatpush3.bf16.msra.mxu0 %v8709_v46 }
 0x507   :  { %8186 = vmatprep.subr.bf16.mxu0 %v8710_v47 }
 0x50a   :  { %8187 = vmatpush3.bf16.msra.mxu0 %v8711_v49 }
 0x513   :  { %v6500_v58 = vpop.f32.mrf.mxu0 }
 0x515   :  { %v6502_v42 = vpop.f32.mrf.mxu0 }
 0x517   :  { %v6504_v34 = vpop.f32.mrf.mxu0 }
 0x519   :  { %v6505_v63 = vpop.f32.mrf.mxu0 }
 0x521   :  { %v6459_v60 = vpop.f32.mrf.mxu1 }
 0x522   :  { %v6460_v22 = vadd.f32 %v6459_v60, %v6419_v50 }
 0x523   :  { %v6461_v43 = vpop.f32.mrf.mxu1 }
 0x524   :  { %v6462_v48 = vadd.f32 %v6461_v43, %v6421_v6  ;;  %v6501_v59 = vadd.f32 %v6500_v58, %v6460_v22  ;;  %v8170_v22 = vld [vmem:[#allocation22] ss:$0 sm:$0xff] }
 0x525   :  { %v6463_v62 = vpop.f32.mrf.mxu1 }
 0x526   :  { %v6503_v15 = vadd.f32 %v6502_v42, %v6462_v48 }
 0x527   :  { %v6464_v14 = vpop.f32.mrf.mxu1 }
 0x561   :  { %v6541_v10 = vpop.f32.mrf.mxu1 }
 0x562   :  { %v6542_v20 = vadd.f32 %v6541_v10, %v6501_v59  ;;  %v8171_v59 = vld [vmem:[#allocation2] ss:$0 sm:$0xff] }
 0x563   :  { %v6543_v39 = vpop.f32.mrf.mxu1 }
 0x564   :  { %v6550_v23 = vmul.f32 0.01, %v6542_v20  ;;  %v6544_v27 = vadd.f32 %v6543_v39, %v6503_v15 }
 0x565   :  { %v6545_v13 = vpop.f32.mrf.mxu1 }
 0x566   :  { %v6551_v29 = vmul.f32 0.01, %v6544_v27  ;;  %v6554_v32 = vmax.f32 %v6542_v20, %v6550_v23 }
 0x567   :  { %v6546_v17 = vpop.f32.mrf.mxu1 }
 0x568   :  { %v6555_v35 = vmax.f32 %v6544_v27, %v6551_v29  ;;  %v6558_v40 = vpack.c.bf16 %v6554_v32, %v6554_v32 }
 0x56a   :  { %v6559_v12 = vpack.c.bf16 %v6555_v35, %v6555_v35 }
 0x56c   :  { %7029 = vmatprep.mubr.bf16.mxu1 %v6559_v12 }
 0x56d   :  { %7030 = vmatmul.mubr.bf16.vlgmr.msra.gmra.mxu1 %v6558_v40 }
 0x5ad   :  { %v6990_v9 = vpop.f32.mrf.mxu0 }
 0x5ae   :  { %v6991_v56 = vadd.f32 %v6990_v9, %v6629_v28 }
 0x5af   :  { %v6992_v54 = vpop.f32.mrf.mxu0 }
 0x5b0   :  { %v6993_v2 = vadd.f32 %v6992_v54, %v6633_v51 }
 0x5b1   :  { %v6994_v45 = vpop.f32.mrf.mxu0 }
 0x5b3   :  { %v6995_v30 = vpop.f32.mrf.mxu0 }
 0x62d   :  { %v7031_v57 = vpop.f32.mrf.mxu1 }
 0x62e   :  { %v7032_v3 = vadd.f32 %v7031_v57, %v6991_v56 }
 0x62f   :  { %v7033_v36 = vpop.f32.mrf.mxu1 }
 0x630   :  { %v7038_v8 = vmul.f32 0.01, %v7032_v3  ;;  %v7034_v52 = vadd.f32 %v7033_v36, %v6993_v2 }
 0x631   :  { %v7035_v0 = vpop.f32.mrf.mxu1 }
 0x632   :  { %v7039_v33 = vmul.f32 0.01, %v7034_v52  ;;  %v7040_v7 = vmax.f32 %v7032_v3, %v7038_v8 }
 0x633   :  { %v7036_v4 = vpop.f32.mrf.mxu1 }
 0x634   :  { %v7041_v58 = vmax.f32 %v7034_v52, %v7039_v33  ;;  %v7042_v34 = vpack.c.bf16 %v7040_v7, %v7040_v7 }
 0x636   :  { %v7043_v42 = vpack.c.bf16 %v7041_v58, %v7041_v58 }
 0x638   :  { %7211 = vmatprep.mubr.bf16.mxu0 %v7043_v42 }
 0x639   :  { %7212 = vmatmul.mubr.bf16.vlgmr.msra.gmra.mxu0 %v7042_v34 }
 0x6f9   :  { %v8188_v63 = vpop.f32.mrf.mxu0 }
 0x6fb   :  { %v8189_v61 = vpop.f32.mrf.mxu0 }
 0x6fc   :  { %v8190_v19 = vadd.f32 %v8189_v61, %v8188_v63 }
 0x6fd   :  { %v8191_v1 = vpop.f32.mrf.mxu0 }
 0x6fe   :  { %v7214_v50 = vadd.f32 %v8190_v19, %v8153_v16 }
 0x6ff   :  { %v8192_v60 = vpop.f32.mrf.mxu0 }
 0x700   :  { %v7219_v6 = vmul.f32 0.01, %v7214_v50 }
 0x702   :  { %v7220_v43 = vmax.f32 %v7214_v50, %v7219_v6 }
 0x704   :  { %v7228_v48 = vmul.f32 %v8170_v22, %v7220_v43 }
 0x706   :  { %7229 = vadd.xlane.f32.xlu0 %v7228_v48 }
 0x78f   :  { %v7230_v62 = vpop.xlane.xlu0 %7229 }
 0x790   :  { %v7238_v15 = vadd.f32 %v8171_v59, %v7230_v62 }
 0x792   :  { %v7239_v14 = vsub.f32 0.0, %v7238_v15 }
 0x794   :  { %v7240_v24 = vmul.f32 1.442695, %v7239_v14 }
 0x796   :  { %8712 = vpow2.f32 %v7240_v24 }
 0x7a3   :  { %v8713_v37 = vpop.eup %8712 }
 0x7a4   :  { %v7242_v11 = vadd.f32 1.0, %v8713_v37 }
 0x7a6   :  { %8714 = vrcp.f32 %v7242_v11 }
 0x7b3   :  { %v8715_v25 = vpop.eup %8714 }
 0x7b4   :  { %7245 = vst.msk [vmem:[%s9434_s14] sm:$0xff] %vm7244_vm0, %v8715_v25 }
 0x7b5   :  { %7250 = vsyncpa [#allocation4], 1 }
 0x7b6   :  { %7251 = vsyncpa [#allocation6], 1 }
 0x7b7   :  { %7252 = vsyncpa [#allocation9], 1 }
 0x7b8   :  { %7253 = vsyncpa [#allocation12], 1 }
 0x7b9   :  { %7254 = vsyncpa [#allocation15], 1 }
 0x7ba   :  { %7255 = vsyncpa [#allocation18], 1 }
 0x7bb   :  { %7256 = vsyncpa [#allocation21], 1 }

</bundles_post_ra>
